<compile_context>
chip_gen: v7x
topology: tpu7x:2x2x1
jax: 0.10.0
libtpu: 0.0.40
codegen_flags: <defaults>
</compile_context>

<pallas_src>
import functools

import numpy as np
import jax
import jax.numpy as jnp
from jax.experimental import pallas as pl
from jax.experimental.pallas import tpu as pltpu

BN_EPS = 0.8  # torch.nn.BatchNorm2d(out_filters, 0.8) -> eps = 0.8 (positional arg)


# ------------------------------ Pallas kernel ------------------------------ #

def _fused_discriminator_kernel(*refs, layer_cfg, eps):
    """Whole Discriminator forward on VMEM-resident 2-D tiles.

    refs = [x0] + [rs, m, bias_cols, gamma_cols, beta_cols, p] * n_layers
           + [wl, bl] + [out]
      x0         : (B*H0, W0)           input image, rows=(b,h), cols=w (Cin=1)
      rs         : (3, B*Ho, B*H)       per-kh row selectors  I_B (x) R_kh
      m          : (9, W*Cin, Wo*Cout)  per-tap  Q_kw^T (x) W[:, :, kh, kw]^T
      bias_cols  : (1, Wo*Cout)         conv bias broadcast over ow
      gamma_cols : (1, Wo*Cout)         BN gamma broadcast over ow
      beta_cols  : (1, Wo*Cout)         BN beta  broadcast over ow
      p          : (Wo*Cout, Wo*Cout)   per-channel sum / broadcast matrix
      wl, bl     : (16, 1), (1, 1)      val_layer Linear
      out        : (B, 1)
    """
    x = refs[0][...]
    idx = 1
    for (use_bn, n_stat) in layer_cfg:
        rs_ref, m_ref, b_ref, g_ref, beta_ref, p_ref = refs[idx:idx + 6]
        idx += 6

        # Conv2d(3, stride=2, pad=1) as 3 gather-matmuls + 9 weight-matmuls.
        acc = None
        for kh in range(3):
            l_kh = jnp.dot(rs_ref[kh], x, preferred_element_type=jnp.float32)
            for kw in range(3):
                contrib = jnp.dot(l_kh, m_ref[kh * 3 + kw],
                                  preferred_element_type=jnp.float32)
                acc = contrib if acc is None else acc + contrib
        y = jnp.maximum(acc + b_ref[...], 0.0)               # bias + ReLU

        if use_bn:
            # Training-mode BatchNorm: biased batch stats per channel, single
            # pass (sum & sum-of-squares).  Channel reduce + broadcast over the
            # (ow, c) lane axis done with the constant P matmul.
            inv_n = 1.0 / float(n_stat)
            s1 = jnp.sum(y, axis=0, keepdims=True)
            s2 = jnp.sum(y * y, axis=0, keepdims=True)
            mean = jnp.dot(s1, p_ref[...], preferred_element_type=jnp.float32) * inv_n
            ex2 = jnp.dot(s2, p_ref[...], preferred_element_type=jnp.float32) * inv_n
            var = ex2 - mean * mean
            y = g_ref[...] * (y - mean) * jax.lax.rsqrt(var + eps) + beta_ref[...]
        x = y

    # val_layer: Linear(16, 1) + Sigmoid, fused into the same kernel.
    wl_ref, bl_ref, out_ref = refs[idx], refs[idx + 1], refs[idx + 2]
    logit = jnp.dot(x, wl_ref[...], preferred_element_type=jnp.float32) + bl_ref[...]
    out_ref[...] = 1.0 / (1.0 + jnp.exp(-logit))


# --------------------------- host-side constants ---------------------------- #

def _stride2_selector(n_out, n_in, k):
    """0/1 matrix S with S[o, 2*o + k - 1] = 1 (zero rows for padded positions)."""
    sel = np.zeros((n_out, n_in), np.float32)
    for o in range(n_out):
        i = 2 * o + k - 1
        if 0 <= i < n_in:
            sel[o, i] = 1.0
    return sel


def _layer_operands(B, H, w, b, gamma, beta):
    """Constant matrices turning Conv2d(3,s=2,p=1)+bias(+BN) into 2-D matmuls."""
    cout, cin = w.shape[0], w.shape[1]
    Ho = H // 2                                            # square input, s=2, p=1
    sels = [_stride2_selector(Ho, H, k) for k in range(3)]
    rs = np.stack([np.kron(np.eye(B, dtype=np.float32), s) for s in sels])
    m = jnp.stack([jnp.kron(jnp.asarray(sels[kw].T), w[:, :, kh, kw].T)
                   for kh in range(3) for kw in range(3)])  # (9, H*cin, Ho*cout)
    bias_cols = jnp.tile(b, Ho)[None, :]                    # (1, Ho*cout)
    gamma_cols = jnp.tile(gamma, Ho)[None, :]
    beta_cols = jnp.tile(beta, Ho)[None, :]
    p = np.kron(np.ones((Ho, Ho), np.float32), np.eye(cout, dtype=np.float32))
    return [jnp.asarray(rs), m, bias_cols, gamma_cols, beta_cols, jnp.asarray(p)], Ho


# --------------------------------- forward ---------------------------------- #

def discriminator_forward(image, params):
    """image: (B, 1, 64, 64) float32 -> (B, 1) float32 sigmoid validity."""
    image = image.astype(jnp.float32)
    B, C, H, W = image.shape
    assert C == 1 and H == W, "module expects single-channel square input"

    inputs = [image.reshape(B * H, W)]      # (b,h) rows x w cols  (Cin == 1)
    layer_cfg = []
    h = H
    for (w, b, gamma, beta, use_bn) in params["conv"]:
        ops, ho = _layer_operands(B, h, w, b, gamma, beta)
        inputs += ops
        layer_cfg.append((use_bn, B * ho * ho))
        h = ho
    wl, bl = params["lin"]
    inputs += [wl, bl]

    vmem = pl.BlockSpec(memory_space=pltpu.MemorySpace.VMEM)
    kernel = functools.partial(_fused_discriminator_kernel,
                               layer_cfg=tuple(layer_cfg), eps=BN_EPS)
    return pl.pallas_call(
        kernel,
        out_shape=jax.ShapeDtypeStruct((B, 1), jnp.float32),
        in_specs=[vmem] * len(inputs),
        out_specs=vmem,
    )(*inputs)


# ------------------------- pure-JAX reference check ------------------------- #

def _reference_forward(image, params):
    x = image.astype(jnp.float32)
    for (w, b, g, beta, use_bn) in params["conv"]:
        x = jax.lax.conv_general_dilated(
            x, w, window_strides=(2, 2), padding=((1, 1), (1, 1)),
            dimension_numbers=("NCHW", "OIHW", "NCHW"),
            precision=jax.lax.Precision.HIGHEST)
        x = jnp.maximum(x + b[None, :, None, None], 0.0)
        if use_bn:
            mean = jnp.mean(x, axis=(0, 2, 3), keepdims=True)
            var = jnp.mean((x - mean) ** 2, axis=(0, 2, 3), keepdims=True)
            x = (g[None, :, None, None] * (x - mean) * jax.lax.rsqrt(var + BN_EPS)
                 + beta[None, :, None, None])
    feat = x.reshape(x.shape[0], -1)
    wl, bl = params["lin"]
    return jax.nn.sigmoid(feat @ wl + bl)


# ------------------------------- parameters --------------------------------- #

def init_params(key, dis_channel_number=1):
    """Deterministic parameter init mirroring the module's layer shapes."""
    c = dis_channel_number
    layer_defs = [
        (1, 2 * c, False),   # block 1 (bn=False)
        (2 * c, 4 * c, True),
        (4 * c, 8 * c, True),
        (8 * c, 8 * c, True),
        (8 * c, 16, True),
        (16, 16, True),      # extra block appended in __init__
    ]
    conv = []
    for (cin, cout, bn) in layer_defs:
        key, k1, k2 = jax.random.split(key, 3)
        bound = 1.0 / float(cin * 9) ** 0.5
        w = jax.random.uniform(k1, (cout, cin, 3, 3), jnp.float32, -bound, bound)
        b = jax.random.uniform(k2, (cout,), jnp.float32, -bound, bound)
        gamma = jnp.ones((cout,), jnp.float32)
        beta = jnp.zeros((cout,), jnp.float32)
        conv.append((w, b, gamma, beta, bn))
    key, k1, k2 = jax.random.split(key, 3)
    bound = 1.0 / 16.0 ** 0.5
    wl = jax.random.uniform(k1, (16, 1), jnp.float32, -bound, bound)
    bl = jax.random.uniform(k2, (1, 1), jnp.float32, -bound, bound)
    return {"conv": conv, "lin": (wl, bl)}


if __name__ == "__main__":
    key = jax.random.PRNGKey(0)
    pkey, xkey = jax.random.split(key)
    params = init_params(pkey, dis_channel_number=1)

    # 64x64 is the smallest spatial size consistent with the module: six
    # stride-2 convs must reduce the spatial extent to 1x1 so that
    # reshape(B, -1) yields exactly 16 features for Linear(16, 1).
    image = jax.random.normal(xkey, (2, 1, 64, 64), jnp.float32)

    out = jax.block_until_ready(discriminator_forward(image, params))
    ref = jax.block_until_ready(_reference_forward(image, params))

    assert out.shape == (2, 1)
    assert bool(jnp.all((out >= 0.0) & (out <= 1.0)))
    assert bool(jnp.max(jnp.abs(out - ref)) < 1e-2), float(jnp.max(jnp.abs(out - ref)))
    print("KERNEL_OK")
</pallas_src>

<mosaic_0001>
module attributes {stable_mosaic.version = 11 : i64} {
  func.func @_fused_discriminator_kernel(%arg0: memref<128x64xf32, #tpu.memory_space<vmem>>, %arg1: memref<3x64x128xf32, #tpu.memory_space<vmem>>, %arg2: memref<9x64x64xf32, #tpu.memory_space<vmem>>, %arg3: memref<1x64xf32, #tpu.memory_space<vmem>>, %arg4: memref<1x64xf32, #tpu.memory_space<vmem>>, %arg5: memref<1x64xf32, #tpu.memory_space<vmem>>, %arg6: memref<64x64xf32, #tpu.memory_space<vmem>>, %arg7: memref<3x32x64xf32, #tpu.memory_space<vmem>>, %arg8: memref<9x64x64xf32, #tpu.memory_space<vmem>>, %arg9: memref<1x64xf32, #tpu.memory_space<vmem>>, %arg10: memref<1x64xf32, #tpu.memory_space<vmem>>, %arg11: memref<1x64xf32, #tpu.memory_space<vmem>>, %arg12: memref<64x64xf32, #tpu.memory_space<vmem>>, %arg13: memref<3x16x32xf32, #tpu.memory_space<vmem>>, %arg14: memref<9x64x64xf32, #tpu.memory_space<vmem>>, %arg15: memref<1x64xf32, #tpu.memory_space<vmem>>, %arg16: memref<1x64xf32, #tpu.memory_space<vmem>>, %arg17: memref<1x64xf32, #tpu.memory_space<vmem>>, %arg18: memref<64x64xf32, #tpu.memory_space<vmem>>, %arg19: memref<3x8x16xf32, #tpu.memory_space<vmem>>, %arg20: memref<9x64x32xf32, #tpu.memory_space<vmem>>, %arg21: memref<1x32xf32, #tpu.memory_space<vmem>>, %arg22: memref<1x32xf32, #tpu.memory_space<vmem>>, %arg23: memref<1x32xf32, #tpu.memory_space<vmem>>, %arg24: memref<32x32xf32, #tpu.memory_space<vmem>>, %arg25: memref<3x4x8xf32, #tpu.memory_space<vmem>>, %arg26: memref<9x32x32xf32, #tpu.memory_space<vmem>>, %arg27: memref<1x32xf32, #tpu.memory_space<vmem>>, %arg28: memref<1x32xf32, #tpu.memory_space<vmem>>, %arg29: memref<1x32xf32, #tpu.memory_space<vmem>>, %arg30: memref<32x32xf32, #tpu.memory_space<vmem>>, %arg31: memref<3x2x4xf32, #tpu.memory_space<vmem>>, %arg32: memref<9x32x16xf32, #tpu.memory_space<vmem>>, %arg33: memref<1x16xf32, #tpu.memory_space<vmem>>, %arg34: memref<1x16xf32, #tpu.memory_space<vmem>>, %arg35: memref<1x16xf32, #tpu.memory_space<vmem>>, %arg36: memref<16x16xf32, #tpu.memory_space<vmem>>, %arg37: memref<16x1xf32, #tpu.memory_space<vmem>>, %arg38: memref<1x1xf32, #tpu.memory_space<vmem>>, %arg39: memref<2x1xf32, #tpu.memory_space<vmem>>) attributes {dimension_semantics = [], scalar_prefetch = 0 : i64, scratch_operands = 0 : i64, tpu.core_type = #tpu.core_type<tc>} {
    %c0 = arith.constant 0 : index
    %c0_0 = arith.constant 0 : index
    %0 = vector.load %arg0[%c0, %c0_0] : memref<128x64xf32, #tpu.memory_space<vmem>>, vector<128x64xf32>
    %c0_1 = arith.constant 0 : index
    %c0_2 = arith.constant 0 : index
    %c0_3 = arith.constant 0 : index
    %1 = vector.load %arg1[%c0_1, %c0_2, %c0_3] : memref<3x64x128xf32, #tpu.memory_space<vmem>>, vector<1x64x128xf32>
    %2 = vector.shape_cast %1 : vector<1x64x128xf32> to vector<64x128xf32>
    %cst = arith.constant dense<0.000000e+00> : vector<64x64xf32>
    %3 = tpu.matmul %2, %0, %cst {dimension_numbers = #tpu.dot_dimension_numbers<[1], [0], [0], [1], [0, 0, 1, 1], [], []>} : vector<64x128xf32>, vector<128x64xf32>, vector<64x64xf32> -> vector<64x64xf32>
    %c0_4 = arith.constant 0 : index
    %c0_5 = arith.constant 0 : index
    %c0_6 = arith.constant 0 : index
    %4 = vector.load %arg2[%c0_4, %c0_5, %c0_6] : memref<9x64x64xf32, #tpu.memory_space<vmem>>, vector<1x64x64xf32>
    %5 = vector.shape_cast %4 : vector<1x64x64xf32> to vector<64x64xf32>
    %cst_7 = arith.constant dense<0.000000e+00> : vector<64x64xf32>
    %6 = tpu.matmul %3, %5, %cst_7 {dimension_numbers = #tpu.dot_dimension_numbers<[1], [0], [0], [1], [0, 0, 1, 1], [], []>} : vector<64x64xf32>, vector<64x64xf32>, vector<64x64xf32> -> vector<64x64xf32>
    %c1 = arith.constant 1 : index
    %c0_8 = arith.constant 0 : index
    %c0_9 = arith.constant 0 : index
    %7 = vector.load %arg2[%c1, %c0_8, %c0_9] : memref<9x64x64xf32, #tpu.memory_space<vmem>>, vector<1x64x64xf32>
    %8 = vector.shape_cast %7 : vector<1x64x64xf32> to vector<64x64xf32>
    %cst_10 = arith.constant dense<0.000000e+00> : vector<64x64xf32>
    %9 = tpu.matmul %3, %8, %cst_10 {dimension_numbers = #tpu.dot_dimension_numbers<[1], [0], [0], [1], [0, 0, 1, 1], [], []>} : vector<64x64xf32>, vector<64x64xf32>, vector<64x64xf32> -> vector<64x64xf32>
    %10 = arith.addf %6, %9 : vector<64x64xf32>
    %c2 = arith.constant 2 : index
    %c0_11 = arith.constant 0 : index
    %c0_12 = arith.constant 0 : index
    %11 = vector.load %arg2[%c2, %c0_11, %c0_12] : memref<9x64x64xf32, #tpu.memory_space<vmem>>, vector<1x64x64xf32>
    %12 = vector.shape_cast %11 : vector<1x64x64xf32> to vector<64x64xf32>
    %cst_13 = arith.constant dense<0.000000e+00> : vector<64x64xf32>
    %13 = tpu.matmul %3, %12, %cst_13 {dimension_numbers = #tpu.dot_dimension_numbers<[1], [0], [0], [1], [0, 0, 1, 1], [], []>} : vector<64x64xf32>, vector<64x64xf32>, vector<64x64xf32> -> vector<64x64xf32>
    %14 = arith.addf %10, %13 : vector<64x64xf32>
    %c1_14 = arith.constant 1 : index
    %c0_15 = arith.constant 0 : index
    %c0_16 = arith.constant 0 : index
    %15 = vector.load %arg1[%c1_14, %c0_15, %c0_16] : memref<3x64x128xf32, #tpu.memory_space<vmem>>, vector<1x64x128xf32>
    %16 = vector.shape_cast %15 : vector<1x64x128xf32> to vector<64x128xf32>
    %cst_17 = arith.constant dense<0.000000e+00> : vector<64x64xf32>
    %17 = tpu.matmul %16, %0, %cst_17 {dimension_numbers = #tpu.dot_dimension_numbers<[1], [0], [0], [1], [0, 0, 1, 1], [], []>} : vector<64x128xf32>, vector<128x64xf32>, vector<64x64xf32> -> vector<64x64xf32>
    %c3 = arith.constant 3 : index
    %c0_18 = arith.constant 0 : index
    %c0_19 = arith.constant 0 : index
    %18 = vector.load %arg2[%c3, %c0_18, %c0_19] : memref<9x64x64xf32, #tpu.memory_space<vmem>>, vector<1x64x64xf32>
    %19 = vector.shape_cast %18 : vector<1x64x64xf32> to vector<64x64xf32>
    %cst_20 = arith.constant dense<0.000000e+00> : vector<64x64xf32>
    %20 = tpu.matmul %17, %19, %cst_20 {dimension_numbers = #tpu.dot_dimension_numbers<[1], [0], [0], [1], [0, 0, 1, 1], [], []>} : vector<64x64xf32>, vector<64x64xf32>, vector<64x64xf32> -> vector<64x64xf32>
    %21 = arith.addf %14, %20 : vector<64x64xf32>
    %c4 = arith.constant 4 : index
    %c0_21 = arith.constant 0 : index
    %c0_22 = arith.constant 0 : index
    %22 = vector.load %arg2[%c4, %c0_21, %c0_22] : memref<9x64x64xf32, #tpu.memory_space<vmem>>, vector<1x64x64xf32>
    %23 = vector.shape_cast %22 : vector<1x64x64xf32> to vector<64x64xf32>
    %cst_23 = arith.constant dense<0.000000e+00> : vector<64x64xf32>
    %24 = tpu.matmul %17, %23, %cst_23 {dimension_numbers = #tpu.dot_dimension_numbers<[1], [0], [0], [1], [0, 0, 1, 1], [], []>} : vector<64x64xf32>, vector<64x64xf32>, vector<64x64xf32> -> vector<64x64xf32>
    %25 = arith.addf %21, %24 : vector<64x64xf32>
    %c5 = arith.constant 5 : index
    %c0_24 = arith.constant 0 : index
    %c0_25 = arith.constant 0 : index
    %26 = vector.load %arg2[%c5, %c0_24, %c0_25] : memref<9x64x64xf32, #tpu.memory_space<vmem>>, vector<1x64x64xf32>
    %27 = vector.shape_cast %26 : vector<1x64x64xf32> to vector<64x64xf32>
    %cst_26 = arith.constant dense<0.000000e+00> : vector<64x64xf32>
    %28 = tpu.matmul %17, %27, %cst_26 {dimension_numbers = #tpu.dot_dimension_numbers<[1], [0], [0], [1], [0, 0, 1, 1], [], []>} : vector<64x64xf32>, vector<64x64xf32>, vector<64x64xf32> -> vector<64x64xf32>
    %29 = arith.addf %25, %28 : vector<64x64xf32>
    %c2_27 = arith.constant 2 : index
    %c0_28 = arith.constant 0 : index
    %c0_29 = arith.constant 0 : index
    %30 = vector.load %arg1[%c2_27, %c0_28, %c0_29] : memref<3x64x128xf32, #tpu.memory_space<vmem>>, vector<1x64x128xf32>
    %31 = vector.shape_cast %30 : vector<1x64x128xf32> to vector<64x128xf32>
    %cst_30 = arith.constant dense<0.000000e+00> : vector<64x64xf32>
    %32 = tpu.matmul %31, %0, %cst_30 {dimension_numbers = #tpu.dot_dimension_numbers<[1], [0], [0], [1], [0, 0, 1, 1], [], []>} : vector<64x128xf32>, vector<128x64xf32>, vector<64x64xf32> -> vector<64x64xf32>
    %c6 = arith.constant 6 : index
    %c0_31 = arith.constant 0 : index
    %c0_32 = arith.constant 0 : index
    %33 = vector.load %arg2[%c6, %c0_31, %c0_32] : memref<9x64x64xf32, #tpu.memory_space<vmem>>, vector<1x64x64xf32>
    %34 = vector.shape_cast %33 : vector<1x64x64xf32> to vector<64x64xf32>
    %cst_33 = arith.constant dense<0.000000e+00> : vector<64x64xf32>
    %35 = tpu.matmul %32, %34, %cst_33 {dimension_numbers = #tpu.dot_dimension_numbers<[1], [0], [0], [1], [0, 0, 1, 1], [], []>} : vector<64x64xf32>, vector<64x64xf32>, vector<64x64xf32> -> vector<64x64xf32>
    %36 = arith.addf %29, %35 : vector<64x64xf32>
    %c7 = arith.constant 7 : index
    %c0_34 = arith.constant 0 : index
    %c0_35 = arith.constant 0 : index
    %37 = vector.load %arg2[%c7, %c0_34, %c0_35] : memref<9x64x64xf32, #tpu.memory_space<vmem>>, vector<1x64x64xf32>
    %38 = vector.shape_cast %37 : vector<1x64x64xf32> to vector<64x64xf32>
    %cst_36 = arith.constant dense<0.000000e+00> : vector<64x64xf32>
    %39 = tpu.matmul %32, %38, %cst_36 {dimension_numbers = #tpu.dot_dimension_numbers<[1], [0], [0], [1], [0, 0, 1, 1], [], []>} : vector<64x64xf32>, vector<64x64xf32>, vector<64x64xf32> -> vector<64x64xf32>
    %40 = arith.addf %36, %39 : vector<64x64xf32>
    %c8 = arith.constant 8 : index
    %c0_37 = arith.constant 0 : index
    %c0_38 = arith.constant 0 : index
    %41 = vector.load %arg2[%c8, %c0_37, %c0_38] : memref<9x64x64xf32, #tpu.memory_space<vmem>>, vector<1x64x64xf32>
    %42 = vector.shape_cast %41 : vector<1x64x64xf32> to vector<64x64xf32>
    %cst_39 = arith.constant dense<0.000000e+00> : vector<64x64xf32>
    %43 = tpu.matmul %32, %42, %cst_39 {dimension_numbers = #tpu.dot_dimension_numbers<[1], [0], [0], [1], [0, 0, 1, 1], [], []>} : vector<64x64xf32>, vector<64x64xf32>, vector<64x64xf32> -> vector<64x64xf32>
    %44 = arith.addf %40, %43 : vector<64x64xf32>
    %c0_40 = arith.constant 0 : index
    %c0_41 = arith.constant 0 : index
    %45 = vector.load %arg3[%c0_40, %c0_41] : memref<1x64xf32, #tpu.memory_space<vmem>>, vector<1x64xf32>
    %46 = vector.broadcast %45 : vector<1x64xf32> to vector<64x64xf32>
    %47 = arith.addf %44, %46 : vector<64x64xf32>
    %cst_42 = arith.constant 0.000000e+00 : f32
    %48 = vector.broadcast %cst_42 : f32 to vector<64x64xf32>
    %49 = arith.maximumf %47, %48 : vector<64x64xf32>
    %c0_43 = arith.constant 0 : index
    %c0_44 = arith.constant 0 : index
    %c0_45 = arith.constant 0 : index
    %50 = vector.load %arg7[%c0_43, %c0_44, %c0_45] : memref<3x32x64xf32, #tpu.memory_space<vmem>>, vector<1x32x64xf32>
    %51 = vector.shape_cast %50 : vector<1x32x64xf32> to vector<32x64xf32>
    %cst_46 = arith.constant dense<0.000000e+00> : vector<32x64xf32>
    %52 = tpu.matmul %51, %49, %cst_46 {dimension_numbers = #tpu.dot_dimension_numbers<[1], [0], [0], [1], [0, 0, 1, 1], [], []>} : vector<32x64xf32>, vector<64x64xf32>, vector<32x64xf32> -> vector<32x64xf32>
    %c0_47 = arith.constant 0 : index
    %c0_48 = arith.constant 0 : index
    %c0_49 = arith.constant 0 : index
    %53 = vector.load %arg8[%c0_47, %c0_48, %c0_49] : memref<9x64x64xf32, #tpu.memory_space<vmem>>, vector<1x64x64xf32>
    %54 = vector.shape_cast %53 : vector<1x64x64xf32> to vector<64x64xf32>
    %cst_50 = arith.constant dense<0.000000e+00> : vector<32x64xf32>
    %55 = tpu.matmul %52, %54, %cst_50 {dimension_numbers = #tpu.dot_dimension_numbers<[1], [0], [0], [1], [0, 0, 1, 1], [], []>} : vector<32x64xf32>, vector<64x64xf32>, vector<32x64xf32> -> vector<32x64xf32>
    %c1_51 = arith.constant 1 : index
    %c0_52 = arith.constant 0 : index
    %c0_53 = arith.constant 0 : index
    %56 = vector.load %arg8[%c1_51, %c0_52, %c0_53] : memref<9x64x64xf32, #tpu.memory_space<vmem>>, vector<1x64x64xf32>
    %57 = vector.shape_cast %56 : vector<1x64x64xf32> to vector<64x64xf32>
    %cst_54 = arith.constant dense<0.000000e+00> : vector<32x64xf32>
    %58 = tpu.matmul %52, %57, %cst_54 {dimension_numbers = #tpu.dot_dimension_numbers<[1], [0], [0], [1], [0, 0, 1, 1], [], []>} : vector<32x64xf32>, vector<64x64xf32>, vector<32x64xf32> -> vector<32x64xf32>
    %59 = arith.addf %55, %58 : vector<32x64xf32>
    %c2_55 = arith.constant 2 : index
    %c0_56 = arith.constant 0 : index
    %c0_57 = arith.constant 0 : index
    %60 = vector.load %arg8[%c2_55, %c0_56, %c0_57] : memref<9x64x64xf32, #tpu.memory_space<vmem>>, vector<1x64x64xf32>
    %61 = vector.shape_cast %60 : vector<1x64x64xf32> to vector<64x64xf32>
    %cst_58 = arith.constant dense<0.000000e+00> : vector<32x64xf32>
    %62 = tpu.matmul %52, %61, %cst_58 {dimension_numbers = #tpu.dot_dimension_numbers<[1], [0], [0], [1], [0, 0, 1, 1], [], []>} : vector<32x64xf32>, vector<64x64xf32>, vector<32x64xf32> -> vector<32x64xf32>
    %63 = arith.addf %59, %62 : vector<32x64xf32>
    %c1_59 = arith.constant 1 : index
    %c0_60 = arith.constant 0 : index
    %c0_61 = arith.constant 0 : index
    %64 = vector.load %arg7[%c1_59, %c0_60, %c0_61] : memref<3x32x64xf32, #tpu.memory_space<vmem>>, vector<1x32x64xf32>
    %65 = vector.shape_cast %64 : vector<1x32x64xf32> to vector<32x64xf32>
    %cst_62 = arith.constant dense<0.000000e+00> : vector<32x64xf32>
    %66 = tpu.matmul %65, %49, %cst_62 {dimension_numbers = #tpu.dot_dimension_numbers<[1], [0], [0], [1], [0, 0, 1, 1], [], []>} : vector<32x64xf32>, vector<64x64xf32>, vector<32x64xf32> -> vector<32x64xf32>
    %c3_63 = arith.constant 3 : index
    %c0_64 = arith.constant 0 : index
    %c0_65 = arith.constant 0 : index
    %67 = vector.load %arg8[%c3_63, %c0_64, %c0_65] : memref<9x64x64xf32, #tpu.memory_space<vmem>>, vector<1x64x64xf32>
    %68 = vector.shape_cast %67 : vector<1x64x64xf32> to vector<64x64xf32>
    %cst_66 = arith.constant dense<0.000000e+00> : vector<32x64xf32>
    %69 = tpu.matmul %66, %68, %cst_66 {dimension_numbers = #tpu.dot_dimension_numbers<[1], [0], [0], [1], [0, 0, 1, 1], [], []>} : vector<32x64xf32>, vector<64x64xf32>, vector<32x64xf32> -> vector<32x64xf32>
    %70 = arith.addf %63, %69 : vector<32x64xf32>
    %c4_67 = arith.constant 4 : index
    %c0_68 = arith.constant 0 : index
    %c0_69 = arith.constant 0 : index
    %71 = vector.load %arg8[%c4_67, %c0_68, %c0_69] : memref<9x64x64xf32, #tpu.memory_space<vmem>>, vector<1x64x64xf32>
    %72 = vector.shape_cast %71 : vector<1x64x64xf32> to vector<64x64xf32>
    %cst_70 = arith.constant dense<0.000000e+00> : vector<32x64xf32>
    %73 = tpu.matmul %66, %72, %cst_70 {dimension_numbers = #tpu.dot_dimension_numbers<[1], [0], [0], [1], [0, 0, 1, 1], [], []>} : vector<32x64xf32>, vector<64x64xf32>, vector<32x64xf32> -> vector<32x64xf32>
    %74 = arith.addf %70, %73 : vector<32x64xf32>
    %c5_71 = arith.constant 5 : index
    %c0_72 = arith.constant 0 : index
    %c0_73 = arith.constant 0 : index
    %75 = vector.load %arg8[%c5_71, %c0_72, %c0_73] : memref<9x64x64xf32, #tpu.memory_space<vmem>>, vector<1x64x64xf32>
    %76 = vector.shape_cast %75 : vector<1x64x64xf32> to vector<64x64xf32>
    %cst_74 = arith.constant dense<0.000000e+00> : vector<32x64xf32>
    %77 = tpu.matmul %66, %76, %cst_74 {dimension_numbers = #tpu.dot_dimension_numbers<[1], [0], [0], [1], [0, 0, 1, 1], [], []>} : vector<32x64xf32>, vector<64x64xf32>, vector<32x64xf32> -> vector<32x64xf32>
    %78 = arith.addf %74, %77 : vector<32x64xf32>
    %c2_75 = arith.constant 2 : index
    %c0_76 = arith.constant 0 : index
    %c0_77 = arith.constant 0 : index
    %79 = vector.load %arg7[%c2_75, %c0_76, %c0_77] : memref<3x32x64xf32, #tpu.memory_space<vmem>>, vector<1x32x64xf32>
    %80 = vector.shape_cast %79 : vector<1x32x64xf32> to vector<32x64xf32>
    %cst_78 = arith.constant dense<0.000000e+00> : vector<32x64xf32>
    %81 = tpu.matmul %80, %49, %cst_78 {dimension_numbers = #tpu.dot_dimension_numbers<[1], [0], [0], [1], [0, 0, 1, 1], [], []>} : vector<32x64xf32>, vector<64x64xf32>, vector<32x64xf32> -> vector<32x64xf32>
    %c6_79 = arith.constant 6 : index
    %c0_80 = arith.constant 0 : index
    %c0_81 = arith.constant 0 : index
    %82 = vector.load %arg8[%c6_79, %c0_80, %c0_81] : memref<9x64x64xf32, #tpu.memory_space<vmem>>, vector<1x64x64xf32>
    %83 = vector.shape_cast %82 : vector<1x64x64xf32> to vector<64x64xf32>
    %cst_82 = arith.constant dense<0.000000e+00> : vector<32x64xf32>
    %84 = tpu.matmul %81, %83, %cst_82 {dimension_numbers = #tpu.dot_dimension_numbers<[1], [0], [0], [1], [0, 0, 1, 1], [], []>} : vector<32x64xf32>, vector<64x64xf32>, vector<32x64xf32> -> vector<32x64xf32>
    %85 = arith.addf %78, %84 : vector<32x64xf32>
    %c7_83 = arith.constant 7 : index
    %c0_84 = arith.constant 0 : index
    %c0_85 = arith.constant 0 : index
    %86 = vector.load %arg8[%c7_83, %c0_84, %c0_85] : memref<9x64x64xf32, #tpu.memory_space<vmem>>, vector<1x64x64xf32>
    %87 = vector.shape_cast %86 : vector<1x64x64xf32> to vector<64x64xf32>
    %cst_86 = arith.constant dense<0.000000e+00> : vector<32x64xf32>
    %88 = tpu.matmul %81, %87, %cst_86 {dimension_numbers = #tpu.dot_dimension_numbers<[1], [0], [0], [1], [0, 0, 1, 1], [], []>} : vector<32x64xf32>, vector<64x64xf32>, vector<32x64xf32> -> vector<32x64xf32>
    %89 = arith.addf %85, %88 : vector<32x64xf32>
    %c8_87 = arith.constant 8 : index
    %c0_88 = arith.constant 0 : index
    %c0_89 = arith.constant 0 : index
    %90 = vector.load %arg8[%c8_87, %c0_88, %c0_89] : memref<9x64x64xf32, #tpu.memory_space<vmem>>, vector<1x64x64xf32>
    %91 = vector.shape_cast %90 : vector<1x64x64xf32> to vector<64x64xf32>
    %cst_90 = arith.constant dense<0.000000e+00> : vector<32x64xf32>
    %92 = tpu.matmul %81, %91, %cst_90 {dimension_numbers = #tpu.dot_dimension_numbers<[1], [0], [0], [1], [0, 0, 1, 1], [], []>} : vector<32x64xf32>, vector<64x64xf32>, vector<32x64xf32> -> vector<32x64xf32>
    %93 = arith.addf %89, %92 : vector<32x64xf32>
    %c0_91 = arith.constant 0 : index
    %c0_92 = arith.constant 0 : index
    %94 = vector.load %arg9[%c0_91, %c0_92] : memref<1x64xf32, #tpu.memory_space<vmem>>, vector<1x64xf32>
    %95 = vector.broadcast %94 : vector<1x64xf32> to vector<32x64xf32>
    %96 = arith.addf %93, %95 : vector<32x64xf32>
    %cst_93 = arith.constant 0.000000e+00 : f32
    %97 = vector.broadcast %cst_93 : f32 to vector<32x64xf32>
    %98 = arith.maximumf %96, %97 : vector<32x64xf32>
    %cst_94 = arith.constant dense<0.000000e+00> : vector<64xf32>
    %99 = vector.multi_reduction <add>, %98, %cst_94 [0] : vector<32x64xf32> to vector<64xf32>
    %100 = vector.shape_cast %99 : vector<64xf32> to vector<1x64xf32>
    %101 = arith.mulf %98, %98 : vector<32x64xf32>
    %cst_95 = arith.constant dense<0.000000e+00> : vector<64xf32>
    %102 = vector.multi_reduction <add>, %101, %cst_95 [0] : vector<32x64xf32> to vector<64xf32>
    %103 = vector.shape_cast %102 : vector<64xf32> to vector<1x64xf32>
    %c0_96 = arith.constant 0 : index
    %c0_97 = arith.constant 0 : index
    %104 = vector.load %arg12[%c0_96, %c0_97] : memref<64x64xf32, #tpu.memory_space<vmem>>, vector<64x64xf32>
    %cst_98 = arith.constant dense<0.000000e+00> : vector<1x64xf32>
    %105 = tpu.matmul %100, %104, %cst_98 {dimension_numbers = #tpu.dot_dimension_numbers<[1], [0], [0], [1], [0, 0, 1, 1], [], []>} : vector<1x64xf32>, vector<64x64xf32>, vector<1x64xf32> -> vector<1x64xf32>
    %cst_99 = arith.constant 0.001953125 : f32
    %106 = vector.broadcast %cst_99 : f32 to vector<1x64xf32>
    %107 = arith.mulf %105, %106 : vector<1x64xf32>
    %c0_100 = arith.constant 0 : index
    %c0_101 = arith.constant 0 : index
    %108 = vector.load %arg12[%c0_100, %c0_101] : memref<64x64xf32, #tpu.memory_space<vmem>>, vector<64x64xf32>
    %cst_102 = arith.constant dense<0.000000e+00> : vector<1x64xf32>
    %109 = tpu.matmul %103, %108, %cst_102 {dimension_numbers = #tpu.dot_dimension_numbers<[1], [0], [0], [1], [0, 0, 1, 1], [], []>} : vector<1x64xf32>, vector<64x64xf32>, vector<1x64xf32> -> vector<1x64xf32>
    %cst_103 = arith.constant 0.001953125 : f32
    %110 = vector.broadcast %cst_103 : f32 to vector<1x64xf32>
    %111 = arith.mulf %109, %110 : vector<1x64xf32>
    %112 = arith.mulf %107, %107 : vector<1x64xf32>
    %113 = arith.subf %111, %112 : vector<1x64xf32>
    %c0_104 = arith.constant 0 : index
    %c0_105 = arith.constant 0 : index
    %114 = vector.load %arg10[%c0_104, %c0_105] : memref<1x64xf32, #tpu.memory_space<vmem>>, vector<1x64xf32>
    %115 = vector.broadcast %107 : vector<1x64xf32> to vector<32x64xf32>
    %116 = arith.subf %98, %115 : vector<32x64xf32>
    %117 = vector.broadcast %114 : vector<1x64xf32> to vector<32x64xf32>
    %118 = arith.mulf %117, %116 : vector<32x64xf32>
    %cst_106 = arith.constant 8.000000e-01 : f32
    %119 = vector.broadcast %cst_106 : f32 to vector<1x64xf32>
    %120 = arith.addf %113, %119 : vector<1x64xf32>
    %121 = math.rsqrt %120 : vector<1x64xf32>
    %122 = vector.broadcast %121 : vector<1x64xf32> to vector<32x64xf32>
    %123 = arith.mulf %118, %122 : vector<32x64xf32>
    %c0_107 = arith.constant 0 : index
    %c0_108 = arith.constant 0 : index
    %124 = vector.load %arg11[%c0_107, %c0_108] : memref<1x64xf32, #tpu.memory_space<vmem>>, vector<1x64xf32>
    %125 = vector.broadcast %124 : vector<1x64xf32> to vector<32x64xf32>
    %126 = arith.addf %123, %125 : vector<32x64xf32>
    %c0_109 = arith.constant 0 : index
    %c0_110 = arith.constant 0 : index
    %c0_111 = arith.constant 0 : index
    %127 = vector.load %arg13[%c0_109, %c0_110, %c0_111] : memref<3x16x32xf32, #tpu.memory_space<vmem>>, vector<1x16x32xf32>
    %128 = vector.shape_cast %127 : vector<1x16x32xf32> to vector<16x32xf32>
    %cst_112 = arith.constant dense<0.000000e+00> : vector<16x64xf32>
    %129 = tpu.matmul %128, %126, %cst_112 {dimension_numbers = #tpu.dot_dimension_numbers<[1], [0], [0], [1], [0, 0, 1, 1], [], []>} : vector<16x32xf32>, vector<32x64xf32>, vector<16x64xf32> -> vector<16x64xf32>
    %c0_113 = arith.constant 0 : index
    %c0_114 = arith.constant 0 : index
    %c0_115 = arith.constant 0 : index
    %130 = vector.load %arg14[%c0_113, %c0_114, %c0_115] : memref<9x64x64xf32, #tpu.memory_space<vmem>>, vector<1x64x64xf32>
    %131 = vector.shape_cast %130 : vector<1x64x64xf32> to vector<64x64xf32>
    %cst_116 = arith.constant dense<0.000000e+00> : vector<16x64xf32>
    %132 = tpu.matmul %129, %131, %cst_116 {dimension_numbers = #tpu.dot_dimension_numbers<[1], [0], [0], [1], [0, 0, 1, 1], [], []>} : vector<16x64xf32>, vector<64x64xf32>, vector<16x64xf32> -> vector<16x64xf32>
    %c1_117 = arith.constant 1 : index
    %c0_118 = arith.constant 0 : index
    %c0_119 = arith.constant 0 : index
    %133 = vector.load %arg14[%c1_117, %c0_118, %c0_119] : memref<9x64x64xf32, #tpu.memory_space<vmem>>, vector<1x64x64xf32>
    %134 = vector.shape_cast %133 : vector<1x64x64xf32> to vector<64x64xf32>
    %cst_120 = arith.constant dense<0.000000e+00> : vector<16x64xf32>
    %135 = tpu.matmul %129, %134, %cst_120 {dimension_numbers = #tpu.dot_dimension_numbers<[1], [0], [0], [1], [0, 0, 1, 1], [], []>} : vector<16x64xf32>, vector<64x64xf32>, vector<16x64xf32> -> vector<16x64xf32>
    %136 = arith.addf %132, %135 : vector<16x64xf32>
    %c2_121 = arith.constant 2 : index
    %c0_122 = arith.constant 0 : index
    %c0_123 = arith.constant 0 : index
    %137 = vector.load %arg14[%c2_121, %c0_122, %c0_123] : memref<9x64x64xf32, #tpu.memory_space<vmem>>, vector<1x64x64xf32>
    %138 = vector.shape_cast %137 : vector<1x64x64xf32> to vector<64x64xf32>
    %cst_124 = arith.constant dense<0.000000e+00> : vector<16x64xf32>
    %139 = tpu.matmul %129, %138, %cst_124 {dimension_numbers = #tpu.dot_dimension_numbers<[1], [0], [0], [1], [0, 0, 1, 1], [], []>} : vector<16x64xf32>, vector<64x64xf32>, vector<16x64xf32> -> vector<16x64xf32>
    %140 = arith.addf %136, %139 : vector<16x64xf32>
    %c1_125 = arith.constant 1 : index
    %c0_126 = arith.constant 0 : index
    %c0_127 = arith.constant 0 : index
    %141 = vector.load %arg13[%c1_125, %c0_126, %c0_127] : memref<3x16x32xf32, #tpu.memory_space<vmem>>, vector<1x16x32xf32>
    %142 = vector.shape_cast %141 : vector<1x16x32xf32> to vector<16x32xf32>
    %cst_128 = arith.constant dense<0.000000e+00> : vector<16x64xf32>
    %143 = tpu.matmul %142, %126, %cst_128 {dimension_numbers = #tpu.dot_dimension_numbers<[1], [0], [0], [1], [0, 0, 1, 1], [], []>} : vector<16x32xf32>, vector<32x64xf32>, vector<16x64xf32> -> vector<16x64xf32>
    %c3_129 = arith.constant 3 : index
    %c0_130 = arith.constant 0 : index
    %c0_131 = arith.constant 0 : index
    %144 = vector.load %arg14[%c3_129, %c0_130, %c0_131] : memref<9x64x64xf32, #tpu.memory_space<vmem>>, vector<1x64x64xf32>
    %145 = vector.shape_cast %144 : vector<1x64x64xf32> to vector<64x64xf32>
    %cst_132 = arith.constant dense<0.000000e+00> : vector<16x64xf32>
    %146 = tpu.matmul %143, %145, %cst_132 {dimension_numbers = #tpu.dot_dimension_numbers<[1], [0], [0], [1], [0, 0, 1, 1], [], []>} : vector<16x64xf32>, vector<64x64xf32>, vector<16x64xf32> -> vector<16x64xf32>
    %147 = arith.addf %140, %146 : vector<16x64xf32>
    %c4_133 = arith.constant 4 : index
    %c0_134 = arith.constant 0 : index
    %c0_135 = arith.constant 0 : index
    %148 = vector.load %arg14[%c4_133, %c0_134, %c0_135] : memref<9x64x64xf32, #tpu.memory_space<vmem>>, vector<1x64x64xf32>
    %149 = vector.shape_cast %148 : vector<1x64x64xf32> to vector<64x64xf32>
    %cst_136 = arith.constant dense<0.000000e+00> : vector<16x64xf32>
    %150 = tpu.matmul %143, %149, %cst_136 {dimension_numbers = #tpu.dot_dimension_numbers<[1], [0], [0], [1], [0, 0, 1, 1], [], []>} : vector<16x64xf32>, vector<64x64xf32>, vector<16x64xf32> -> vector<16x64xf32>
    %151 = arith.addf %147, %150 : vector<16x64xf32>
    %c5_137 = arith.constant 5 : index
    %c0_138 = arith.constant 0 : index
    %c0_139 = arith.constant 0 : index
    %152 = vector.load %arg14[%c5_137, %c0_138, %c0_139] : memref<9x64x64xf32, #tpu.memory_space<vmem>>, vector<1x64x64xf32>
    %153 = vector.shape_cast %152 : vector<1x64x64xf32> to vector<64x64xf32>
    %cst_140 = arith.constant dense<0.000000e+00> : vector<16x64xf32>
    %154 = tpu.matmul %143, %153, %cst_140 {dimension_numbers = #tpu.dot_dimension_numbers<[1], [0], [0], [1], [0, 0, 1, 1], [], []>} : vector<16x64xf32>, vector<64x64xf32>, vector<16x64xf32> -> vector<16x64xf32>
    %155 = arith.addf %151, %154 : vector<16x64xf32>
    %c2_141 = arith.constant 2 : index
    %c0_142 = arith.constant 0 : index
    %c0_143 = arith.constant 0 : index
    %156 = vector.load %arg13[%c2_141, %c0_142, %c0_143] : memref<3x16x32xf32, #tpu.memory_space<vmem>>, vector<1x16x32xf32>
    %157 = vector.shape_cast %156 : vector<1x16x32xf32> to vector<16x32xf32>
    %cst_144 = arith.constant dense<0.000000e+00> : vector<16x64xf32>
    %158 = tpu.matmul %157, %126, %cst_144 {dimension_numbers = #tpu.dot_dimension_numbers<[1], [0], [0], [1], [0, 0, 1, 1], [], []>} : vector<16x32xf32>, vector<32x64xf32>, vector<16x64xf32> -> vector<16x64xf32>
    %c6_145 = arith.constant 6 : index
    %c0_146 = arith.constant 0 : index
    %c0_147 = arith.constant 0 : index
    %159 = vector.load %arg14[%c6_145, %c0_146, %c0_147] : memref<9x64x64xf32, #tpu.memory_space<vmem>>, vector<1x64x64xf32>
    %160 = vector.shape_cast %159 : vector<1x64x64xf32> to vector<64x64xf32>
    %cst_148 = arith.constant dense<0.000000e+00> : vector<16x64xf32>
    %161 = tpu.matmul %158, %160, %cst_148 {dimension_numbers = #tpu.dot_dimension_numbers<[1], [0], [0], [1], [0, 0, 1, 1], [], []>} : vector<16x64xf32>, vector<64x64xf32>, vector<16x64xf32> -> vector<16x64xf32>
    %162 = arith.addf %155, %161 : vector<16x64xf32>
    %c7_149 = arith.constant 7 : index
    %c0_150 = arith.constant 0 : index
    %c0_151 = arith.constant 0 : index
    %163 = vector.load %arg14[%c7_149, %c0_150, %c0_151] : memref<9x64x64xf32, #tpu.memory_space<vmem>>, vector<1x64x64xf32>
    %164 = vector.shape_cast %163 : vector<1x64x64xf32> to vector<64x64xf32>
    %cst_152 = arith.constant dense<0.000000e+00> : vector<16x64xf32>
    %165 = tpu.matmul %158, %164, %cst_152 {dimension_numbers = #tpu.dot_dimension_numbers<[1], [0], [0], [1], [0, 0, 1, 1], [], []>} : vector<16x64xf32>, vector<64x64xf32>, vector<16x64xf32> -> vector<16x64xf32>
    %166 = arith.addf %162, %165 : vector<16x64xf32>
    %c8_153 = arith.constant 8 : index
    %c0_154 = arith.constant 0 : index
    %c0_155 = arith.constant 0 : index
    %167 = vector.load %arg14[%c8_153, %c0_154, %c0_155] : memref<9x64x64xf32, #tpu.memory_space<vmem>>, vector<1x64x64xf32>
    %168 = vector.shape_cast %167 : vector<1x64x64xf32> to vector<64x64xf32>
    %cst_156 = arith.constant dense<0.000000e+00> : vector<16x64xf32>
    %169 = tpu.matmul %158, %168, %cst_156 {dimension_numbers = #tpu.dot_dimension_numbers<[1], [0], [0], [1], [0, 0, 1, 1], [], []>} : vector<16x64xf32>, vector<64x64xf32>, vector<16x64xf32> -> vector<16x64xf32>
    %170 = arith.addf %166, %169 : vector<16x64xf32>
    %c0_157 = arith.constant 0 : index
    %c0_158 = arith.constant 0 : index
    %171 = vector.load %arg15[%c0_157, %c0_158] : memref<1x64xf32, #tpu.memory_space<vmem>>, vector<1x64xf32>
    %172 = vector.broadcast %171 : vector<1x64xf32> to vector<16x64xf32>
    %173 = arith.addf %170, %172 : vector<16x64xf32>
    %cst_159 = arith.constant 0.000000e+00 : f32
    %174 = vector.broadcast %cst_159 : f32 to vector<16x64xf32>
    %175 = arith.maximumf %173, %174 : vector<16x64xf32>
    %cst_160 = arith.constant dense<0.000000e+00> : vector<64xf32>
    %176 = vector.multi_reduction <add>, %175, %cst_160 [0] : vector<16x64xf32> to vector<64xf32>
    %177 = vector.shape_cast %176 : vector<64xf32> to vector<1x64xf32>
    %178 = arith.mulf %175, %175 : vector<16x64xf32>
    %cst_161 = arith.constant dense<0.000000e+00> : vector<64xf32>
    %179 = vector.multi_reduction <add>, %178, %cst_161 [0] : vector<16x64xf32> to vector<64xf32>
    %180 = vector.shape_cast %179 : vector<64xf32> to vector<1x64xf32>
    %c0_162 = arith.constant 0 : index
    %c0_163 = arith.constant 0 : index
    %181 = vector.load %arg18[%c0_162, %c0_163] : memref<64x64xf32, #tpu.memory_space<vmem>>, vector<64x64xf32>
    %cst_164 = arith.constant dense<0.000000e+00> : vector<1x64xf32>
    %182 = tpu.matmul %177, %181, %cst_164 {dimension_numbers = #tpu.dot_dimension_numbers<[1], [0], [0], [1], [0, 0, 1, 1], [], []>} : vector<1x64xf32>, vector<64x64xf32>, vector<1x64xf32> -> vector<1x64xf32>
    %cst_165 = arith.constant 7.812500e-03 : f32
    %183 = vector.broadcast %cst_165 : f32 to vector<1x64xf32>
    %184 = arith.mulf %182, %183 : vector<1x64xf32>
    %c0_166 = arith.constant 0 : index
    %c0_167 = arith.constant 0 : index
    %185 = vector.load %arg18[%c0_166, %c0_167] : memref<64x64xf32, #tpu.memory_space<vmem>>, vector<64x64xf32>
    %cst_168 = arith.constant dense<0.000000e+00> : vector<1x64xf32>
    %186 = tpu.matmul %180, %185, %cst_168 {dimension_numbers = #tpu.dot_dimension_numbers<[1], [0], [0], [1], [0, 0, 1, 1], [], []>} : vector<1x64xf32>, vector<64x64xf32>, vector<1x64xf32> -> vector<1x64xf32>
    %cst_169 = arith.constant 7.812500e-03 : f32
    %187 = vector.broadcast %cst_169 : f32 to vector<1x64xf32>
    %188 = arith.mulf %186, %187 : vector<1x64xf32>
    %189 = arith.mulf %184, %184 : vector<1x64xf32>
    %190 = arith.subf %188, %189 : vector<1x64xf32>
    %c0_170 = arith.constant 0 : index
    %c0_171 = arith.constant 0 : index
    %191 = vector.load %arg16[%c0_170, %c0_171] : memref<1x64xf32, #tpu.memory_space<vmem>>, vector<1x64xf32>
    %192 = vector.broadcast %184 : vector<1x64xf32> to vector<16x64xf32>
    %193 = arith.subf %175, %192 : vector<16x64xf32>
    %194 = vector.broadcast %191 : vector<1x64xf32> to vector<16x64xf32>
    %195 = arith.mulf %194, %193 : vector<16x64xf32>
    %cst_172 = arith.constant 8.000000e-01 : f32
    %196 = vector.broadcast %cst_172 : f32 to vector<1x64xf32>
    %197 = arith.addf %190, %196 : vector<1x64xf32>
    %198 = math.rsqrt %197 : vector<1x64xf32>
    %199 = vector.broadcast %198 : vector<1x64xf32> to vector<16x64xf32>
    %200 = arith.mulf %195, %199 : vector<16x64xf32>
    %c0_173 = arith.constant 0 : index
    %c0_174 = arith.constant 0 : index
    %201 = vector.load %arg17[%c0_173, %c0_174] : memref<1x64xf32, #tpu.memory_space<vmem>>, vector<1x64xf32>
    %202 = vector.broadcast %201 : vector<1x64xf32> to vector<16x64xf32>
    %203 = arith.addf %200, %202 : vector<16x64xf32>
    %c0_175 = arith.constant 0 : index
    %c0_176 = arith.constant 0 : index
    %c0_177 = arith.constant 0 : index
    %204 = vector.load %arg19[%c0_175, %c0_176, %c0_177] : memref<3x8x16xf32, #tpu.memory_space<vmem>>, vector<1x8x16xf32>
    %205 = vector.shape_cast %204 : vector<1x8x16xf32> to vector<8x16xf32>
    %cst_178 = arith.constant dense<0.000000e+00> : vector<8x64xf32>
    %206 = tpu.matmul %205, %203, %cst_178 {dimension_numbers = #tpu.dot_dimension_numbers<[1], [0], [0], [1], [0, 0, 1, 1], [], []>} : vector<8x16xf32>, vector<16x64xf32>, vector<8x64xf32> -> vector<8x64xf32>
    %c0_179 = arith.constant 0 : index
    %c0_180 = arith.constant 0 : index
    %c0_181 = arith.constant 0 : index
    %207 = vector.load %arg20[%c0_179, %c0_180, %c0_181] : memref<9x64x32xf32, #tpu.memory_space<vmem>>, vector<1x64x32xf32>
    %208 = vector.shape_cast %207 : vector<1x64x32xf32> to vector<64x32xf32>
    %cst_182 = arith.constant dense<0.000000e+00> : vector<8x32xf32>
    %209 = tpu.matmul %206, %208, %cst_182 {dimension_numbers = #tpu.dot_dimension_numbers<[1], [0], [0], [1], [0, 0, 1, 1], [], []>} : vector<8x64xf32>, vector<64x32xf32>, vector<8x32xf32> -> vector<8x32xf32>
    %c1_183 = arith.constant 1 : index
    %c0_184 = arith.constant 0 : index
    %c0_185 = arith.constant 0 : index
    %210 = vector.load %arg20[%c1_183, %c0_184, %c0_185] : memref<9x64x32xf32, #tpu.memory_space<vmem>>, vector<1x64x32xf32>
    %211 = vector.shape_cast %210 : vector<1x64x32xf32> to vector<64x32xf32>
    %cst_186 = arith.constant dense<0.000000e+00> : vector<8x32xf32>
    %212 = tpu.matmul %206, %211, %cst_186 {dimension_numbers = #tpu.dot_dimension_numbers<[1], [0], [0], [1], [0, 0, 1, 1], [], []>} : vector<8x64xf32>, vector<64x32xf32>, vector<8x32xf32> -> vector<8x32xf32>
    %213 = arith.addf %209, %212 : vector<8x32xf32>
    %c2_187 = arith.constant 2 : index
    %c0_188 = arith.constant 0 : index
    %c0_189 = arith.constant 0 : index
    %214 = vector.load %arg20[%c2_187, %c0_188, %c0_189] : memref<9x64x32xf32, #tpu.memory_space<vmem>>, vector<1x64x32xf32>
    %215 = vector.shape_cast %214 : vector<1x64x32xf32> to vector<64x32xf32>
    %cst_190 = arith.constant dense<0.000000e+00> : vector<8x32xf32>
    %216 = tpu.matmul %206, %215, %cst_190 {dimension_numbers = #tpu.dot_dimension_numbers<[1], [0], [0], [1], [0, 0, 1, 1], [], []>} : vector<8x64xf32>, vector<64x32xf32>, vector<8x32xf32> -> vector<8x32xf32>
    %217 = arith.addf %213, %216 : vector<8x32xf32>
    %c1_191 = arith.constant 1 : index
    %c0_192 = arith.constant 0 : index
    %c0_193 = arith.constant 0 : index
    %218 = vector.load %arg19[%c1_191, %c0_192, %c0_193] : memref<3x8x16xf32, #tpu.memory_space<vmem>>, vector<1x8x16xf32>
    %219 = vector.shape_cast %218 : vector<1x8x16xf32> to vector<8x16xf32>
    %cst_194 = arith.constant dense<0.000000e+00> : vector<8x64xf32>
    %220 = tpu.matmul %219, %203, %cst_194 {dimension_numbers = #tpu.dot_dimension_numbers<[1], [0], [0], [1], [0, 0, 1, 1], [], []>} : vector<8x16xf32>, vector<16x64xf32>, vector<8x64xf32> -> vector<8x64xf32>
    %c3_195 = arith.constant 3 : index
    %c0_196 = arith.constant 0 : index
    %c0_197 = arith.constant 0 : index
    %221 = vector.load %arg20[%c3_195, %c0_196, %c0_197] : memref<9x64x32xf32, #tpu.memory_space<vmem>>, vector<1x64x32xf32>
    %222 = vector.shape_cast %221 : vector<1x64x32xf32> to vector<64x32xf32>
    %cst_198 = arith.constant dense<0.000000e+00> : vector<8x32xf32>
    %223 = tpu.matmul %220, %222, %cst_198 {dimension_numbers = #tpu.dot_dimension_numbers<[1], [0], [0], [1], [0, 0, 1, 1], [], []>} : vector<8x64xf32>, vector<64x32xf32>, vector<8x32xf32> -> vector<8x32xf32>
    %224 = arith.addf %217, %223 : vector<8x32xf32>
    %c4_199 = arith.constant 4 : index
    %c0_200 = arith.constant 0 : index
    %c0_201 = arith.constant 0 : index
    %225 = vector.load %arg20[%c4_199, %c0_200, %c0_201] : memref<9x64x32xf32, #tpu.memory_space<vmem>>, vector<1x64x32xf32>
    %226 = vector.shape_cast %225 : vector<1x64x32xf32> to vector<64x32xf32>
    %cst_202 = arith.constant dense<0.000000e+00> : vector<8x32xf32>
    %227 = tpu.matmul %220, %226, %cst_202 {dimension_numbers = #tpu.dot_dimension_numbers<[1], [0], [0], [1], [0, 0, 1, 1], [], []>} : vector<8x64xf32>, vector<64x32xf32>, vector<8x32xf32> -> vector<8x32xf32>
    %228 = arith.addf %224, %227 : vector<8x32xf32>
    %c5_203 = arith.constant 5 : index
    %c0_204 = arith.constant 0 : index
    %c0_205 = arith.constant 0 : index
    %229 = vector.load %arg20[%c5_203, %c0_204, %c0_205] : memref<9x64x32xf32, #tpu.memory_space<vmem>>, vector<1x64x32xf32>
    %230 = vector.shape_cast %229 : vector<1x64x32xf32> to vector<64x32xf32>
    %cst_206 = arith.constant dense<0.000000e+00> : vector<8x32xf32>
    %231 = tpu.matmul %220, %230, %cst_206 {dimension_numbers = #tpu.dot_dimension_numbers<[1], [0], [0], [1], [0, 0, 1, 1], [], []>} : vector<8x64xf32>, vector<64x32xf32>, vector<8x32xf32> -> vector<8x32xf32>
    %232 = arith.addf %228, %231 : vector<8x32xf32>
    %c2_207 = arith.constant 2 : index
    %c0_208 = arith.constant 0 : index
    %c0_209 = arith.constant 0 : index
    %233 = vector.load %arg19[%c2_207, %c0_208, %c0_209] : memref<3x8x16xf32, #tpu.memory_space<vmem>>, vector<1x8x16xf32>
    %234 = vector.shape_cast %233 : vector<1x8x16xf32> to vector<8x16xf32>
    %cst_210 = arith.constant dense<0.000000e+00> : vector<8x64xf32>
    %235 = tpu.matmul %234, %203, %cst_210 {dimension_numbers = #tpu.dot_dimension_numbers<[1], [0], [0], [1], [0, 0, 1, 1], [], []>} : vector<8x16xf32>, vector<16x64xf32>, vector<8x64xf32> -> vector<8x64xf32>
    %c6_211 = arith.constant 6 : index
    %c0_212 = arith.constant 0 : index
    %c0_213 = arith.constant 0 : index
    %236 = vector.load %arg20[%c6_211, %c0_212, %c0_213] : memref<9x64x32xf32, #tpu.memory_space<vmem>>, vector<1x64x32xf32>
    %237 = vector.shape_cast %236 : vector<1x64x32xf32> to vector<64x32xf32>
    %cst_214 = arith.constant dense<0.000000e+00> : vector<8x32xf32>
    %238 = tpu.matmul %235, %237, %cst_214 {dimension_numbers = #tpu.dot_dimension_numbers<[1], [0], [0], [1], [0, 0, 1, 1], [], []>} : vector<8x64xf32>, vector<64x32xf32>, vector<8x32xf32> -> vector<8x32xf32>
    %239 = arith.addf %232, %238 : vector<8x32xf32>
    %c7_215 = arith.constant 7 : index
    %c0_216 = arith.constant 0 : index
    %c0_217 = arith.constant 0 : index
    %240 = vector.load %arg20[%c7_215, %c0_216, %c0_217] : memref<9x64x32xf32, #tpu.memory_space<vmem>>, vector<1x64x32xf32>
    %241 = vector.shape_cast %240 : vector<1x64x32xf32> to vector<64x32xf32>
    %cst_218 = arith.constant dense<0.000000e+00> : vector<8x32xf32>
    %242 = tpu.matmul %235, %241, %cst_218 {dimension_numbers = #tpu.dot_dimension_numbers<[1], [0], [0], [1], [0, 0, 1, 1], [], []>} : vector<8x64xf32>, vector<64x32xf32>, vector<8x32xf32> -> vector<8x32xf32>
    %243 = arith.addf %239, %242 : vector<8x32xf32>
    %c8_219 = arith.constant 8 : index
    %c0_220 = arith.constant 0 : index
    %c0_221 = arith.constant 0 : index
    %244 = vector.load %arg20[%c8_219, %c0_220, %c0_221] : memref<9x64x32xf32, #tpu.memory_space<vmem>>, vector<1x64x32xf32>
    %245 = vector.shape_cast %244 : vector<1x64x32xf32> to vector<64x32xf32>
    %cst_222 = arith.constant dense<0.000000e+00> : vector<8x32xf32>
    %246 = tpu.matmul %235, %245, %cst_222 {dimension_numbers = #tpu.dot_dimension_numbers<[1], [0], [0], [1], [0, 0, 1, 1], [], []>} : vector<8x64xf32>, vector<64x32xf32>, vector<8x32xf32> -> vector<8x32xf32>
    %247 = arith.addf %243, %246 : vector<8x32xf32>
    %c0_223 = arith.constant 0 : index
    %c0_224 = arith.constant 0 : index
    %248 = vector.load %arg21[%c0_223, %c0_224] : memref<1x32xf32, #tpu.memory_space<vmem>>, vector<1x32xf32>
    %249 = vector.broadcast %248 : vector<1x32xf32> to vector<8x32xf32>
    %250 = arith.addf %247, %249 : vector<8x32xf32>
    %cst_225 = arith.constant 0.000000e+00 : f32
    %251 = vector.broadcast %cst_225 : f32 to vector<8x32xf32>
    %252 = arith.maximumf %250, %251 : vector<8x32xf32>
    %cst_226 = arith.constant dense<0.000000e+00> : vector<32xf32>
    %253 = vector.multi_reduction <add>, %252, %cst_226 [0] : vector<8x32xf32> to vector<32xf32>
    %254 = vector.shape_cast %253 : vector<32xf32> to vector<1x32xf32>
    %255 = arith.mulf %252, %252 : vector<8x32xf32>
    %cst_227 = arith.constant dense<0.000000e+00> : vector<32xf32>
    %256 = vector.multi_reduction <add>, %255, %cst_227 [0] : vector<8x32xf32> to vector<32xf32>
    %257 = vector.shape_cast %256 : vector<32xf32> to vector<1x32xf32>
    %c0_228 = arith.constant 0 : index
    %c0_229 = arith.constant 0 : index
    %258 = vector.load %arg24[%c0_228, %c0_229] : memref<32x32xf32, #tpu.memory_space<vmem>>, vector<32x32xf32>
    %cst_230 = arith.constant dense<0.000000e+00> : vector<1x32xf32>
    %259 = tpu.matmul %254, %258, %cst_230 {dimension_numbers = #tpu.dot_dimension_numbers<[1], [0], [0], [1], [0, 0, 1, 1], [], []>} : vector<1x32xf32>, vector<32x32xf32>, vector<1x32xf32> -> vector<1x32xf32>
    %cst_231 = arith.constant 3.125000e-02 : f32
    %260 = vector.broadcast %cst_231 : f32 to vector<1x32xf32>
    %261 = arith.mulf %259, %260 : vector<1x32xf32>
    %c0_232 = arith.constant 0 : index
    %c0_233 = arith.constant 0 : index
    %262 = vector.load %arg24[%c0_232, %c0_233] : memref<32x32xf32, #tpu.memory_space<vmem>>, vector<32x32xf32>
    %cst_234 = arith.constant dense<0.000000e+00> : vector<1x32xf32>
    %263 = tpu.matmul %257, %262, %cst_234 {dimension_numbers = #tpu.dot_dimension_numbers<[1], [0], [0], [1], [0, 0, 1, 1], [], []>} : vector<1x32xf32>, vector<32x32xf32>, vector<1x32xf32> -> vector<1x32xf32>
    %cst_235 = arith.constant 3.125000e-02 : f32
    %264 = vector.broadcast %cst_235 : f32 to vector<1x32xf32>
    %265 = arith.mulf %263, %264 : vector<1x32xf32>
    %266 = arith.mulf %261, %261 : vector<1x32xf32>
    %267 = arith.subf %265, %266 : vector<1x32xf32>
    %c0_236 = arith.constant 0 : index
    %c0_237 = arith.constant 0 : index
    %268 = vector.load %arg22[%c0_236, %c0_237] : memref<1x32xf32, #tpu.memory_space<vmem>>, vector<1x32xf32>
    %269 = vector.broadcast %261 : vector<1x32xf32> to vector<8x32xf32>
    %270 = arith.subf %252, %269 : vector<8x32xf32>
    %271 = vector.broadcast %268 : vector<1x32xf32> to vector<8x32xf32>
    %272 = arith.mulf %271, %270 : vector<8x32xf32>
    %cst_238 = arith.constant 8.000000e-01 : f32
    %273 = vector.broadcast %cst_238 : f32 to vector<1x32xf32>
    %274 = arith.addf %267, %273 : vector<1x32xf32>
    %275 = math.rsqrt %274 : vector<1x32xf32>
    %276 = vector.broadcast %275 : vector<1x32xf32> to vector<8x32xf32>
    %277 = arith.mulf %272, %276 : vector<8x32xf32>
    %c0_239 = arith.constant 0 : index
    %c0_240 = arith.constant 0 : index
    %278 = vector.load %arg23[%c0_239, %c0_240] : memref<1x32xf32, #tpu.memory_space<vmem>>, vector<1x32xf32>
    %279 = vector.broadcast %278 : vector<1x32xf32> to vector<8x32xf32>
    %280 = arith.addf %277, %279 : vector<8x32xf32>
    %c0_241 = arith.constant 0 : index
    %c0_242 = arith.constant 0 : index
    %c0_243 = arith.constant 0 : index
    %281 = vector.load %arg25[%c0_241, %c0_242, %c0_243] : memref<3x4x8xf32, #tpu.memory_space<vmem>>, vector<1x4x8xf32>
    %282 = vector.shape_cast %281 : vector<1x4x8xf32> to vector<4x8xf32>
    %cst_244 = arith.constant dense<0.000000e+00> : vector<4x32xf32>
    %283 = tpu.matmul %282, %280, %cst_244 {dimension_numbers = #tpu.dot_dimension_numbers<[1], [0], [0], [1], [0, 0, 1, 1], [], []>} : vector<4x8xf32>, vector<8x32xf32>, vector<4x32xf32> -> vector<4x32xf32>
    %c0_245 = arith.constant 0 : index
    %c0_246 = arith.constant 0 : index
    %c0_247 = arith.constant 0 : index
    %284 = vector.load %arg26[%c0_245, %c0_246, %c0_247] : memref<9x32x32xf32, #tpu.memory_space<vmem>>, vector<1x32x32xf32>
    %285 = vector.shape_cast %284 : vector<1x32x32xf32> to vector<32x32xf32>
    %cst_248 = arith.constant dense<0.000000e+00> : vector<4x32xf32>
    %286 = tpu.matmul %283, %285, %cst_248 {dimension_numbers = #tpu.dot_dimension_numbers<[1], [0], [0], [1], [0, 0, 1, 1], [], []>} : vector<4x32xf32>, vector<32x32xf32>, vector<4x32xf32> -> vector<4x32xf32>
    %c1_249 = arith.constant 1 : index
    %c0_250 = arith.constant 0 : index
    %c0_251 = arith.constant 0 : index
    %287 = vector.load %arg26[%c1_249, %c0_250, %c0_251] : memref<9x32x32xf32, #tpu.memory_space<vmem>>, vector<1x32x32xf32>
    %288 = vector.shape_cast %287 : vector<1x32x32xf32> to vector<32x32xf32>
    %cst_252 = arith.constant dense<0.000000e+00> : vector<4x32xf32>
    %289 = tpu.matmul %283, %288, %cst_252 {dimension_numbers = #tpu.dot_dimension_numbers<[1], [0], [0], [1], [0, 0, 1, 1], [], []>} : vector<4x32xf32>, vector<32x32xf32>, vector<4x32xf32> -> vector<4x32xf32>
    %290 = arith.addf %286, %289 : vector<4x32xf32>
    %c2_253 = arith.constant 2 : index
    %c0_254 = arith.constant 0 : index
    %c0_255 = arith.constant 0 : index
    %291 = vector.load %arg26[%c2_253, %c0_254, %c0_255] : memref<9x32x32xf32, #tpu.memory_space<vmem>>, vector<1x32x32xf32>
    %292 = vector.shape_cast %291 : vector<1x32x32xf32> to vector<32x32xf32>
    %cst_256 = arith.constant dense<0.000000e+00> : vector<4x32xf32>
    %293 = tpu.matmul %283, %292, %cst_256 {dimension_numbers = #tpu.dot_dimension_numbers<[1], [0], [0], [1], [0, 0, 1, 1], [], []>} : vector<4x32xf32>, vector<32x32xf32>, vector<4x32xf32> -> vector<4x32xf32>
    %294 = arith.addf %290, %293 : vector<4x32xf32>
    %c1_257 = arith.constant 1 : index
    %c0_258 = arith.constant 0 : index
    %c0_259 = arith.constant 0 : index
    %295 = vector.load %arg25[%c1_257, %c0_258, %c0_259] : memref<3x4x8xf32, #tpu.memory_space<vmem>>, vector<1x4x8xf32>
    %296 = vector.shape_cast %295 : vector<1x4x8xf32> to vector<4x8xf32>
    %cst_260 = arith.constant dense<0.000000e+00> : vector<4x32xf32>
    %297 = tpu.matmul %296, %280, %cst_260 {dimension_numbers = #tpu.dot_dimension_numbers<[1], [0], [0], [1], [0, 0, 1, 1], [], []>} : vector<4x8xf32>, vector<8x32xf32>, vector<4x32xf32> -> vector<4x32xf32>
    %c3_261 = arith.constant 3 : index
    %c0_262 = arith.constant 0 : index
    %c0_263 = arith.constant 0 : index
    %298 = vector.load %arg26[%c3_261, %c0_262, %c0_263] : memref<9x32x32xf32, #tpu.memory_space<vmem>>, vector<1x32x32xf32>
    %299 = vector.shape_cast %298 : vector<1x32x32xf32> to vector<32x32xf32>
    %cst_264 = arith.constant dense<0.000000e+00> : vector<4x32xf32>
    %300 = tpu.matmul %297, %299, %cst_264 {dimension_numbers = #tpu.dot_dimension_numbers<[1], [0], [0], [1], [0, 0, 1, 1], [], []>} : vector<4x32xf32>, vector<32x32xf32>, vector<4x32xf32> -> vector<4x32xf32>
    %301 = arith.addf %294, %300 : vector<4x32xf32>
    %c4_265 = arith.constant 4 : index
    %c0_266 = arith.constant 0 : index
    %c0_267 = arith.constant 0 : index
    %302 = vector.load %arg26[%c4_265, %c0_266, %c0_267] : memref<9x32x32xf32, #tpu.memory_space<vmem>>, vector<1x32x32xf32>
    %303 = vector.shape_cast %302 : vector<1x32x32xf32> to vector<32x32xf32>
    %cst_268 = arith.constant dense<0.000000e+00> : vector<4x32xf32>
    %304 = tpu.matmul %297, %303, %cst_268 {dimension_numbers = #tpu.dot_dimension_numbers<[1], [0], [0], [1], [0, 0, 1, 1], [], []>} : vector<4x32xf32>, vector<32x32xf32>, vector<4x32xf32> -> vector<4x32xf32>
    %305 = arith.addf %301, %304 : vector<4x32xf32>
    %c5_269 = arith.constant 5 : index
    %c0_270 = arith.constant 0 : index
    %c0_271 = arith.constant 0 : index
    %306 = vector.load %arg26[%c5_269, %c0_270, %c0_271] : memref<9x32x32xf32, #tpu.memory_space<vmem>>, vector<1x32x32xf32>
    %307 = vector.shape_cast %306 : vector<1x32x32xf32> to vector<32x32xf32>
    %cst_272 = arith.constant dense<0.000000e+00> : vector<4x32xf32>
    %308 = tpu.matmul %297, %307, %cst_272 {dimension_numbers = #tpu.dot_dimension_numbers<[1], [0], [0], [1], [0, 0, 1, 1], [], []>} : vector<4x32xf32>, vector<32x32xf32>, vector<4x32xf32> -> vector<4x32xf32>
    %309 = arith.addf %305, %308 : vector<4x32xf32>
    %c2_273 = arith.constant 2 : index
    %c0_274 = arith.constant 0 : index
    %c0_275 = arith.constant 0 : index
    %310 = vector.load %arg25[%c2_273, %c0_274, %c0_275] : memref<3x4x8xf32, #tpu.memory_space<vmem>>, vector<1x4x8xf32>
    %311 = vector.shape_cast %310 : vector<1x4x8xf32> to vector<4x8xf32>
    %cst_276 = arith.constant dense<0.000000e+00> : vector<4x32xf32>
    %312 = tpu.matmul %311, %280, %cst_276 {dimension_numbers = #tpu.dot_dimension_numbers<[1], [0], [0], [1], [0, 0, 1, 1], [], []>} : vector<4x8xf32>, vector<8x32xf32>, vector<4x32xf32> -> vector<4x32xf32>
    %c6_277 = arith.constant 6 : index
    %c0_278 = arith.constant 0 : index
    %c0_279 = arith.constant 0 : index
    %313 = vector.load %arg26[%c6_277, %c0_278, %c0_279] : memref<9x32x32xf32, #tpu.memory_space<vmem>>, vector<1x32x32xf32>
    %314 = vector.shape_cast %313 : vector<1x32x32xf32> to vector<32x32xf32>
    %cst_280 = arith.constant dense<0.000000e+00> : vector<4x32xf32>
    %315 = tpu.matmul %312, %314, %cst_280 {dimension_numbers = #tpu.dot_dimension_numbers<[1], [0], [0], [1], [0, 0, 1, 1], [], []>} : vector<4x32xf32>, vector<32x32xf32>, vector<4x32xf32> -> vector<4x32xf32>
    %316 = arith.addf %309, %315 : vector<4x32xf32>
    %c7_281 = arith.constant 7 : index
    %c0_282 = arith.constant 0 : index
    %c0_283 = arith.constant 0 : index
    %317 = vector.load %arg26[%c7_281, %c0_282, %c0_283] : memref<9x32x32xf32, #tpu.memory_space<vmem>>, vector<1x32x32xf32>
    %318 = vector.shape_cast %317 : vector<1x32x32xf32> to vector<32x32xf32>
    %cst_284 = arith.constant dense<0.000000e+00> : vector<4x32xf32>
    %319 = tpu.matmul %312, %318, %cst_284 {dimension_numbers = #tpu.dot_dimension_numbers<[1], [0], [0], [1], [0, 0, 1, 1], [], []>} : vector<4x32xf32>, vector<32x32xf32>, vector<4x32xf32> -> vector<4x32xf32>
    %320 = arith.addf %316, %319 : vector<4x32xf32>
    %c8_285 = arith.constant 8 : index
    %c0_286 = arith.constant 0 : index
    %c0_287 = arith.constant 0 : index
    %321 = vector.load %arg26[%c8_285, %c0_286, %c0_287] : memref<9x32x32xf32, #tpu.memory_space<vmem>>, vector<1x32x32xf32>
    %322 = vector.shape_cast %321 : vector<1x32x32xf32> to vector<32x32xf32>
    %cst_288 = arith.constant dense<0.000000e+00> : vector<4x32xf32>
    %323 = tpu.matmul %312, %322, %cst_288 {dimension_numbers = #tpu.dot_dimension_numbers<[1], [0], [0], [1], [0, 0, 1, 1], [], []>} : vector<4x32xf32>, vector<32x32xf32>, vector<4x32xf32> -> vector<4x32xf32>
    %324 = arith.addf %320, %323 : vector<4x32xf32>
    %c0_289 = arith.constant 0 : index
    %c0_290 = arith.constant 0 : index
    %325 = vector.load %arg27[%c0_289, %c0_290] : memref<1x32xf32, #tpu.memory_space<vmem>>, vector<1x32xf32>
    %326 = vector.broadcast %325 : vector<1x32xf32> to vector<4x32xf32>
    %327 = arith.addf %324, %326 : vector<4x32xf32>
    %cst_291 = arith.constant 0.000000e+00 : f32
    %328 = vector.broadcast %cst_291 : f32 to vector<4x32xf32>
    %329 = arith.maximumf %327, %328 : vector<4x32xf32>
    %cst_292 = arith.constant dense<0.000000e+00> : vector<32xf32>
    %330 = vector.multi_reduction <add>, %329, %cst_292 [0] : vector<4x32xf32> to vector<32xf32>
    %331 = vector.shape_cast %330 : vector<32xf32> to vector<1x32xf32>
    %332 = arith.mulf %329, %329 : vector<4x32xf32>
    %cst_293 = arith.constant dense<0.000000e+00> : vector<32xf32>
    %333 = vector.multi_reduction <add>, %332, %cst_293 [0] : vector<4x32xf32> to vector<32xf32>
    %334 = vector.shape_cast %333 : vector<32xf32> to vector<1x32xf32>
    %c0_294 = arith.constant 0 : index
    %c0_295 = arith.constant 0 : index
    %335 = vector.load %arg30[%c0_294, %c0_295] : memref<32x32xf32, #tpu.memory_space<vmem>>, vector<32x32xf32>
    %cst_296 = arith.constant dense<0.000000e+00> : vector<1x32xf32>
    %336 = tpu.matmul %331, %335, %cst_296 {dimension_numbers = #tpu.dot_dimension_numbers<[1], [0], [0], [1], [0, 0, 1, 1], [], []>} : vector<1x32xf32>, vector<32x32xf32>, vector<1x32xf32> -> vector<1x32xf32>
    %cst_297 = arith.constant 1.250000e-01 : f32
    %337 = vector.broadcast %cst_297 : f32 to vector<1x32xf32>
    %338 = arith.mulf %336, %337 : vector<1x32xf32>
    %c0_298 = arith.constant 0 : index
    %c0_299 = arith.constant 0 : index
    %339 = vector.load %arg30[%c0_298, %c0_299] : memref<32x32xf32, #tpu.memory_space<vmem>>, vector<32x32xf32>
    %cst_300 = arith.constant dense<0.000000e+00> : vector<1x32xf32>
    %340 = tpu.matmul %334, %339, %cst_300 {dimension_numbers = #tpu.dot_dimension_numbers<[1], [0], [0], [1], [0, 0, 1, 1], [], []>} : vector<1x32xf32>, vector<32x32xf32>, vector<1x32xf32> -> vector<1x32xf32>
    %cst_301 = arith.constant 1.250000e-01 : f32
    %341 = vector.broadcast %cst_301 : f32 to vector<1x32xf32>
    %342 = arith.mulf %340, %341 : vector<1x32xf32>
    %343 = arith.mulf %338, %338 : vector<1x32xf32>
    %344 = arith.subf %342, %343 : vector<1x32xf32>
    %c0_302 = arith.constant 0 : index
    %c0_303 = arith.constant 0 : index
    %345 = vector.load %arg28[%c0_302, %c0_303] : memref<1x32xf32, #tpu.memory_space<vmem>>, vector<1x32xf32>
    %346 = vector.broadcast %338 : vector<1x32xf32> to vector<4x32xf32>
    %347 = arith.subf %329, %346 : vector<4x32xf32>
    %348 = vector.broadcast %345 : vector<1x32xf32> to vector<4x32xf32>
    %349 = arith.mulf %348, %347 : vector<4x32xf32>
    %cst_304 = arith.constant 8.000000e-01 : f32
    %350 = vector.broadcast %cst_304 : f32 to vector<1x32xf32>
    %351 = arith.addf %344, %350 : vector<1x32xf32>
    %352 = math.rsqrt %351 : vector<1x32xf32>
    %353 = vector.broadcast %352 : vector<1x32xf32> to vector<4x32xf32>
    %354 = arith.mulf %349, %353 : vector<4x32xf32>
    %c0_305 = arith.constant 0 : index
    %c0_306 = arith.constant 0 : index
    %355 = vector.load %arg29[%c0_305, %c0_306] : memref<1x32xf32, #tpu.memory_space<vmem>>, vector<1x32xf32>
    %356 = vector.broadcast %355 : vector<1x32xf32> to vector<4x32xf32>
    %357 = arith.addf %354, %356 : vector<4x32xf32>
    %c0_307 = arith.constant 0 : index
    %c0_308 = arith.constant 0 : index
    %c0_309 = arith.constant 0 : index
    %358 = vector.load %arg31[%c0_307, %c0_308, %c0_309] : memref<3x2x4xf32, #tpu.memory_space<vmem>>, vector<1x2x4xf32>
    %359 = vector.shape_cast %358 : vector<1x2x4xf32> to vector<2x4xf32>
    %cst_310 = arith.constant dense<0.000000e+00> : vector<2x32xf32>
    %360 = tpu.matmul %359, %357, %cst_310 {dimension_numbers = #tpu.dot_dimension_numbers<[1], [0], [0], [1], [0, 0, 1, 1], [], []>} : vector<2x4xf32>, vector<4x32xf32>, vector<2x32xf32> -> vector<2x32xf32>
    %c0_311 = arith.constant 0 : index
    %c0_312 = arith.constant 0 : index
    %c0_313 = arith.constant 0 : index
    %361 = vector.load %arg32[%c0_311, %c0_312, %c0_313] : memref<9x32x16xf32, #tpu.memory_space<vmem>>, vector<1x32x16xf32>
    %362 = vector.shape_cast %361 : vector<1x32x16xf32> to vector<32x16xf32>
    %cst_314 = arith.constant dense<0.000000e+00> : vector<2x16xf32>
    %363 = tpu.matmul %360, %362, %cst_314 {dimension_numbers = #tpu.dot_dimension_numbers<[1], [0], [0], [1], [0, 0, 1, 1], [], []>} : vector<2x32xf32>, vector<32x16xf32>, vector<2x16xf32> -> vector<2x16xf32>
    %c1_315 = arith.constant 1 : index
    %c0_316 = arith.constant 0 : index
    %c0_317 = arith.constant 0 : index
    %364 = vector.load %arg32[%c1_315, %c0_316, %c0_317] : memref<9x32x16xf32, #tpu.memory_space<vmem>>, vector<1x32x16xf32>
    %365 = vector.shape_cast %364 : vector<1x32x16xf32> to vector<32x16xf32>
    %cst_318 = arith.constant dense<0.000000e+00> : vector<2x16xf32>
    %366 = tpu.matmul %360, %365, %cst_318 {dimension_numbers = #tpu.dot_dimension_numbers<[1], [0], [0], [1], [0, 0, 1, 1], [], []>} : vector<2x32xf32>, vector<32x16xf32>, vector<2x16xf32> -> vector<2x16xf32>
    %367 = arith.addf %363, %366 : vector<2x16xf32>
    %c2_319 = arith.constant 2 : index
    %c0_320 = arith.constant 0 : index
    %c0_321 = arith.constant 0 : index
    %368 = vector.load %arg32[%c2_319, %c0_320, %c0_321] : memref<9x32x16xf32, #tpu.memory_space<vmem>>, vector<1x32x16xf32>
    %369 = vector.shape_cast %368 : vector<1x32x16xf32> to vector<32x16xf32>
    %cst_322 = arith.constant dense<0.000000e+00> : vector<2x16xf32>
    %370 = tpu.matmul %360, %369, %cst_322 {dimension_numbers = #tpu.dot_dimension_numbers<[1], [0], [0], [1], [0, 0, 1, 1], [], []>} : vector<2x32xf32>, vector<32x16xf32>, vector<2x16xf32> -> vector<2x16xf32>
    %371 = arith.addf %367, %370 : vector<2x16xf32>
    %c1_323 = arith.constant 1 : index
    %c0_324 = arith.constant 0 : index
    %c0_325 = arith.constant 0 : index
    %372 = vector.load %arg31[%c1_323, %c0_324, %c0_325] : memref<3x2x4xf32, #tpu.memory_space<vmem>>, vector<1x2x4xf32>
    %373 = vector.shape_cast %372 : vector<1x2x4xf32> to vector<2x4xf32>
    %cst_326 = arith.constant dense<0.000000e+00> : vector<2x32xf32>
    %374 = tpu.matmul %373, %357, %cst_326 {dimension_numbers = #tpu.dot_dimension_numbers<[1], [0], [0], [1], [0, 0, 1, 1], [], []>} : vector<2x4xf32>, vector<4x32xf32>, vector<2x32xf32> -> vector<2x32xf32>
    %c3_327 = arith.constant 3 : index
    %c0_328 = arith.constant 0 : index
    %c0_329 = arith.constant 0 : index
    %375 = vector.load %arg32[%c3_327, %c0_328, %c0_329] : memref<9x32x16xf32, #tpu.memory_space<vmem>>, vector<1x32x16xf32>
    %376 = vector.shape_cast %375 : vector<1x32x16xf32> to vector<32x16xf32>
    %cst_330 = arith.constant dense<0.000000e+00> : vector<2x16xf32>
    %377 = tpu.matmul %374, %376, %cst_330 {dimension_numbers = #tpu.dot_dimension_numbers<[1], [0], [0], [1], [0, 0, 1, 1], [], []>} : vector<2x32xf32>, vector<32x16xf32>, vector<2x16xf32> -> vector<2x16xf32>
    %378 = arith.addf %371, %377 : vector<2x16xf32>
    %c4_331 = arith.constant 4 : index
    %c0_332 = arith.constant 0 : index
    %c0_333 = arith.constant 0 : index
    %379 = vector.load %arg32[%c4_331, %c0_332, %c0_333] : memref<9x32x16xf32, #tpu.memory_space<vmem>>, vector<1x32x16xf32>
    %380 = vector.shape_cast %379 : vector<1x32x16xf32> to vector<32x16xf32>
    %cst_334 = arith.constant dense<0.000000e+00> : vector<2x16xf32>
    %381 = tpu.matmul %374, %380, %cst_334 {dimension_numbers = #tpu.dot_dimension_numbers<[1], [0], [0], [1], [0, 0, 1, 1], [], []>} : vector<2x32xf32>, vector<32x16xf32>, vector<2x16xf32> -> vector<2x16xf32>
    %382 = arith.addf %378, %381 : vector<2x16xf32>
    %c5_335 = arith.constant 5 : index
    %c0_336 = arith.constant 0 : index
    %c0_337 = arith.constant 0 : index
    %383 = vector.load %arg32[%c5_335, %c0_336, %c0_337] : memref<9x32x16xf32, #tpu.memory_space<vmem>>, vector<1x32x16xf32>
    %384 = vector.shape_cast %383 : vector<1x32x16xf32> to vector<32x16xf32>
    %cst_338 = arith.constant dense<0.000000e+00> : vector<2x16xf32>
    %385 = tpu.matmul %374, %384, %cst_338 {dimension_numbers = #tpu.dot_dimension_numbers<[1], [0], [0], [1], [0, 0, 1, 1], [], []>} : vector<2x32xf32>, vector<32x16xf32>, vector<2x16xf32> -> vector<2x16xf32>
    %386 = arith.addf %382, %385 : vector<2x16xf32>
    %c2_339 = arith.constant 2 : index
    %c0_340 = arith.constant 0 : index
    %c0_341 = arith.constant 0 : index
    %387 = vector.load %arg31[%c2_339, %c0_340, %c0_341] : memref<3x2x4xf32, #tpu.memory_space<vmem>>, vector<1x2x4xf32>
    %388 = vector.shape_cast %387 : vector<1x2x4xf32> to vector<2x4xf32>
    %cst_342 = arith.constant dense<0.000000e+00> : vector<2x32xf32>
    %389 = tpu.matmul %388, %357, %cst_342 {dimension_numbers = #tpu.dot_dimension_numbers<[1], [0], [0], [1], [0, 0, 1, 1], [], []>} : vector<2x4xf32>, vector<4x32xf32>, vector<2x32xf32> -> vector<2x32xf32>
    %c6_343 = arith.constant 6 : index
    %c0_344 = arith.constant 0 : index
    %c0_345 = arith.constant 0 : index
    %390 = vector.load %arg32[%c6_343, %c0_344, %c0_345] : memref<9x32x16xf32, #tpu.memory_space<vmem>>, vector<1x32x16xf32>
    %391 = vector.shape_cast %390 : vector<1x32x16xf32> to vector<32x16xf32>
    %cst_346 = arith.constant dense<0.000000e+00> : vector<2x16xf32>
    %392 = tpu.matmul %389, %391, %cst_346 {dimension_numbers = #tpu.dot_dimension_numbers<[1], [0], [0], [1], [0, 0, 1, 1], [], []>} : vector<2x32xf32>, vector<32x16xf32>, vector<2x16xf32> -> vector<2x16xf32>
    %393 = arith.addf %386, %392 : vector<2x16xf32>
    %c7_347 = arith.constant 7 : index
    %c0_348 = arith.constant 0 : index
    %c0_349 = arith.constant 0 : index
    %394 = vector.load %arg32[%c7_347, %c0_348, %c0_349] : memref<9x32x16xf32, #tpu.memory_space<vmem>>, vector<1x32x16xf32>
    %395 = vector.shape_cast %394 : vector<1x32x16xf32> to vector<32x16xf32>
    %cst_350 = arith.constant dense<0.000000e+00> : vector<2x16xf32>
    %396 = tpu.matmul %389, %395, %cst_350 {dimension_numbers = #tpu.dot_dimension_numbers<[1], [0], [0], [1], [0, 0, 1, 1], [], []>} : vector<2x32xf32>, vector<32x16xf32>, vector<2x16xf32> -> vector<2x16xf32>
    %397 = arith.addf %393, %396 : vector<2x16xf32>
    %c8_351 = arith.constant 8 : index
    %c0_352 = arith.constant 0 : index
    %c0_353 = arith.constant 0 : index
    %398 = vector.load %arg32[%c8_351, %c0_352, %c0_353] : memref<9x32x16xf32, #tpu.memory_space<vmem>>, vector<1x32x16xf32>
    %399 = vector.shape_cast %398 : vector<1x32x16xf32> to vector<32x16xf32>
    %cst_354 = arith.constant dense<0.000000e+00> : vector<2x16xf32>
    %400 = tpu.matmul %389, %399, %cst_354 {dimension_numbers = #tpu.dot_dimension_numbers<[1], [0], [0], [1], [0, 0, 1, 1], [], []>} : vector<2x32xf32>, vector<32x16xf32>, vector<2x16xf32> -> vector<2x16xf32>
    %401 = arith.addf %397, %400 : vector<2x16xf32>
    %c0_355 = arith.constant 0 : index
    %c0_356 = arith.constant 0 : index
    %402 = vector.load %arg33[%c0_355, %c0_356] : memref<1x16xf32, #tpu.memory_space<vmem>>, vector<1x16xf32>
    %403 = vector.broadcast %402 : vector<1x16xf32> to vector<2x16xf32>
    %404 = arith.addf %401, %403 : vector<2x16xf32>
    %cst_357 = arith.constant 0.000000e+00 : f32
    %405 = vector.broadcast %cst_357 : f32 to vector<2x16xf32>
    %406 = arith.maximumf %404, %405 : vector<2x16xf32>
    %cst_358 = arith.constant dense<0.000000e+00> : vector<16xf32>
    %407 = vector.multi_reduction <add>, %406, %cst_358 [0] : vector<2x16xf32> to vector<16xf32>
    %408 = vector.shape_cast %407 : vector<16xf32> to vector<1x16xf32>
    %409 = arith.mulf %406, %406 : vector<2x16xf32>
    %cst_359 = arith.constant dense<0.000000e+00> : vector<16xf32>
    %410 = vector.multi_reduction <add>, %409, %cst_359 [0] : vector<2x16xf32> to vector<16xf32>
    %411 = vector.shape_cast %410 : vector<16xf32> to vector<1x16xf32>
    %c0_360 = arith.constant 0 : index
    %c0_361 = arith.constant 0 : index
    %412 = vector.load %arg36[%c0_360, %c0_361] : memref<16x16xf32, #tpu.memory_space<vmem>>, vector<16x16xf32>
    %cst_362 = arith.constant dense<0.000000e+00> : vector<1x16xf32>
    %413 = tpu.matmul %408, %412, %cst_362 {dimension_numbers = #tpu.dot_dimension_numbers<[1], [0], [0], [1], [0, 0, 1, 1], [], []>} : vector<1x16xf32>, vector<16x16xf32>, vector<1x16xf32> -> vector<1x16xf32>
    %cst_363 = arith.constant 5.000000e-01 : f32
    %414 = vector.broadcast %cst_363 : f32 to vector<1x16xf32>
    %415 = arith.mulf %413, %414 : vector<1x16xf32>
    %c0_364 = arith.constant 0 : index
    %c0_365 = arith.constant 0 : index
    %416 = vector.load %arg36[%c0_364, %c0_365] : memref<16x16xf32, #tpu.memory_space<vmem>>, vector<16x16xf32>
    %cst_366 = arith.constant dense<0.000000e+00> : vector<1x16xf32>
    %417 = tpu.matmul %411, %416, %cst_366 {dimension_numbers = #tpu.dot_dimension_numbers<[1], [0], [0], [1], [0, 0, 1, 1], [], []>} : vector<1x16xf32>, vector<16x16xf32>, vector<1x16xf32> -> vector<1x16xf32>
    %cst_367 = arith.constant 5.000000e-01 : f32
    %418 = vector.broadcast %cst_367 : f32 to vector<1x16xf32>
    %419 = arith.mulf %417, %418 : vector<1x16xf32>
    %420 = arith.mulf %415, %415 : vector<1x16xf32>
    %421 = arith.subf %419, %420 : vector<1x16xf32>
    %c0_368 = arith.constant 0 : index
    %c0_369 = arith.constant 0 : index
    %422 = vector.load %arg34[%c0_368, %c0_369] : memref<1x16xf32, #tpu.memory_space<vmem>>, vector<1x16xf32>
    %423 = vector.broadcast %415 : vector<1x16xf32> to vector<2x16xf32>
    %424 = arith.subf %406, %423 : vector<2x16xf32>
    %425 = vector.broadcast %422 : vector<1x16xf32> to vector<2x16xf32>
    %426 = arith.mulf %425, %424 : vector<2x16xf32>
    %cst_370 = arith.constant 8.000000e-01 : f32
    %427 = vector.broadcast %cst_370 : f32 to vector<1x16xf32>
    %428 = arith.addf %421, %427 : vector<1x16xf32>
    %429 = math.rsqrt %428 : vector<1x16xf32>
    %430 = vector.broadcast %429 : vector<1x16xf32> to vector<2x16xf32>
    %431 = arith.mulf %426, %430 : vector<2x16xf32>
    %c0_371 = arith.constant 0 : index
    %c0_372 = arith.constant 0 : index
    %432 = vector.load %arg35[%c0_371, %c0_372] : memref<1x16xf32, #tpu.memory_space<vmem>>, vector<1x16xf32>
    %433 = vector.broadcast %432 : vector<1x16xf32> to vector<2x16xf32>
    %434 = arith.addf %431, %433 : vector<2x16xf32>
    %c0_373 = arith.constant 0 : index
    %c0_374 = arith.constant 0 : index
    %435 = vector.load %arg37[%c0_373, %c0_374] : memref<16x1xf32, #tpu.memory_space<vmem>>, vector<16x1xf32>
    %cst_375 = arith.constant dense<0.000000e+00> : vector<2x1xf32>
    %436 = tpu.matmul %434, %435, %cst_375 {dimension_numbers = #tpu.dot_dimension_numbers<[1], [0], [0], [1], [0, 0, 1, 1], [], []>} : vector<2x16xf32>, vector<16x1xf32>, vector<2x1xf32> -> vector<2x1xf32>
    %c0_376 = arith.constant 0 : index
    %c0_377 = arith.constant 0 : index
    %437 = vector.load %arg38[%c0_376, %c0_377] : memref<1x1xf32, #tpu.memory_space<vmem>>, vector<1x1xf32>
    %438 = vector.broadcast %437 : vector<1x1xf32> to vector<2x1xf32>
    %439 = arith.addf %436, %438 : vector<2x1xf32>
    %cst_378 = arith.constant 0.000000e+00 : f32
    %440 = vector.broadcast %cst_378 : f32 to vector<2x1xf32>
    %441 = arith.subf %440, %439 : vector<2x1xf32>
    %442 = math.exp %441 : vector<2x1xf32>
    %cst_379 = arith.constant 1.000000e+00 : f32
    %443 = vector.broadcast %cst_379 : f32 to vector<2x1xf32>
    %444 = arith.addf %443, %442 : vector<2x1xf32>
    %cst_380 = arith.constant 1.000000e+00 : f32
    %445 = vector.broadcast %cst_380 : f32 to vector<2x1xf32>
    %446 = arith.divf %445, %444 : vector<2x1xf32>
    %c0_381 = arith.constant 0 : index
    %c0_382 = arith.constant 0 : index
    %447 = vector.load %arg39[%c0_381, %c0_382] : memref<2x1xf32, #tpu.memory_space<vmem>>, vector<2x1xf32>
    tpu.vector_store %arg39[%c0_381, %c0_382], %446 {strides = array<i32>} : memref<2x1xf32, #tpu.memory_space<vmem>>, vector<2x1xf32>,
    return
  }
}

</mosaic_0001>

<bundles_post_ra>
// kernel: tpu_custom_call.1
= control target key start
LH: loop header
LB: loop body
LE: loop exit
PB: predicated region body
PF: predicated region fallthrough
CT: control target
= control target key end

     0   :  { %s12560_s6 = smov 1   ;;  %s12561_s10 = smov 2   ;;  %s14006_s0 = inlined_call_operand.smem [shape: u32[40], index: -1, kind: input, shape index: {}] }
   0x1   :  { %s12641_s5 = sld [smem:[%s14006_s0]]   ;;  %s12562_s14 = smov 3  }
   0x2   :  { %s12646_s9 = sld [smem:[%s14006_s0 + %s12560_s6]]   ;;  %s12563_s18 = smov 4  }
   0x3   :  { %s12651_s13 = sld [smem:[%s14006_s0 + %s12561_s10]]   ;;  %s12564_s22 = smov 5  }
   0x4   :  { %s12656_s17 = sld [smem:[%s14006_s0 + %s12562_s14]]   ;;  %s12565_s26 = smov 6  }
   0x5   :  { %s12661_s21 = sld [smem:[%s14006_s0 + %s12563_s18]]   ;;  %s12566_s30 = smov 7  }
   0x6   :  { %s12666_s25 = sld [smem:[%s14006_s0 + %s12564_s22]]   ;;  %s12567_s4 = smov 8  }
   0x7   :  { %14025 = sst [smem:[#allocation54_spill]] %s12641_s5  ;;  %s12568_s10 = smov 9  }
   0x8   :  { %s12671_s29 = sld [smem:[%s14006_s0 + %s12565_s26]]   ;;  %s12569_s15 = smov 10  }
   0x9   :  { %14026 = sst [smem:[#allocation55_spill]] %s12651_s13  ;;  %s12570_s20 = smov 11  }
   0xa   :  { %s12676_s3 = sld [smem:[%s14006_s0 + %s12566_s30]]   ;;  %s12571_s26 = smov 12  }
   0xb   :  { %s12681_s8 = sld [smem:[%s14006_s0 + %s12567_s4]]   ;;  %s12572_s1 = smov 13  }
   0xc   :  { %s12686_s14 = sld [smem:[%s14006_s0 + %s12568_s10]]   ;;  %s12573_s7 = smov 14  }
   0xd   :  { %s12691_s19 = sld [smem:[%s14006_s0 + %s12569_s15]]   ;;  %s12574_s15 = smov 15  }
   0xe   :  { %14027 = sst [smem:[#allocation56_spill]] %s12671_s29  ;;  %s12575_s22 = smov 16  }
   0xf   :  { %s12696_s24 = sld [smem:[%s14006_s0 + %s12570_s20]]   ;;  %s12576_s28 = smov 17  }
  0x10   :  { %s12701_s30 = sld [smem:[%s14006_s0 + %s12571_s26]]   ;;  %s12598_s16 = smov 39  }
  0x11   :  { %14028 = sst [smem:[#allocation57_spill]] %s12681_s8 }
  0x12   :  { %14029 = sst [smem:[#allocation58_spill]] %s12686_s14 }
  0x13   :  { %s12706_s6 = sld [smem:[%s14006_s0 + %s12572_s1]]  }
  0x14   :  { %s12711_s12 = sld [smem:[%s14006_s0 + %s12573_s7]]   ;;  %s12577_s7 = smov 18  }
  0x15   :  { %14030 = sst [smem:[#allocation59_spill]] %s12696_s24 }
  0x16   :  { %s12716_s20 = sld [smem:[%s14006_s0 + %s12574_s15]]   ;;  %s12578_s15 = smov 19  }
  0x17   :  { %s12721_s27 = sld [smem:[%s14006_s0 + %s12575_s22]]   ;;  %s12579_s22 = smov 20  }
  0x18   :  { %s12726_s4 = sld [smem:[%s14006_s0 + %s12576_s28]]   ;;  %s12580_s28 = smov 21  }
  0x19   :  { %14031 = sst [smem:[#allocation60_spill]] %s12706_s6 }
  0x1a   :  { %s12731_s8 = sld [smem:[%s14006_s0 + %s12577_s7]]   ;;  %s12581_s7 = smov 22  }
  0x1b   :  { %s12736_s13 = sld [smem:[%s14006_s0 + %s12578_s15]]   ;;  %s12582_s15 = smov 23  }
  0x1c   :  { %14032 = sst [smem:[#allocation61_spill]] %s12716_s20 }
  0x1d   :  { %s12741_s5 = sld [smem:[%s14006_s0 + %s12579_s22]]   ;;  %s12583_s22 = smov 24  }
  0x1e   :  { %14033 = sst [smem:[#allocation62_spill]] %s12726_s4 }
  0x1f   :  { %s12746_s4 = sld [smem:[%s14006_s0 + %s12580_s28]]   ;;  %s12584_s28 = smov 25  }
  0x20   :  { %s12751_s20 = sld [smem:[%s14006_s0 + %s12581_s7]]   ;;  %s12585_s7 = smov 26  }
  0x21   :  { %14034 = sst [smem:[#allocation63_spill]] %s12736_s13 }
  0x22   :  { %s12756_s13 = sld [smem:[%s14006_s0 + %s12582_s15]]   ;;  %s12586_s15 = smov 27  }
  0x23   :  { %14035 = sst [smem:[#allocation64_spill]] %s12741_s5 }
  0x24   :  { %s12761_s5 = sld [smem:[%s14006_s0 + %s12583_s22]]   ;;  %s12587_s22 = smov 28  }
  0x25   :  { %s12766_s6 = sld [smem:[%s14006_s0 + %s12584_s28]]   ;;  %s12588_s28 = smov 29  }
  0x26   :  { %14036 = sst [smem:[#allocation65_spill]] %s12751_s20 }
  0x27   :  { %s12771_s20 = sld [smem:[%s14006_s0 + %s12585_s7]]   ;;  %s12589_s7 = smov 30  }
  0x28   :  { %s12776_s24 = sld [smem:[%s14006_s0 + %s12586_s15]]   ;;  %s12590_s15 = smov 31  }
  0x29   :  { %s12786_s14 = sld [smem:[%s14006_s0 + %s12588_s28]]   ;;  %s12592_s28 = smov 33  }
  0x2a   :  { %14037 = sst [smem:[#allocation66_spill]] %s12761_s5 }
  0x2b   :  { %s12781_s5 = sld [smem:[%s14006_s0 + %s12587_s22]]   ;;  %s12591_s22 = smov 32  }
  0x2d   :  { %14038 = sst [smem:[#allocation67_spill]] %s12771_s20 }
  0x2e   :  { %14039 = sst [smem:[#allocation68_spill]] %s12776_s24 }
  0x2f   :  { %14041 = sst [smem:[#allocation70_spill]] %s12786_s14 }
  0x30   :  { %s12791_s20 = sld [smem:[%s14006_s0 + %s12589_s7]]   ;;  %s12593_s7 = smov 34  }
  0x31   :  { %14040 = sst [smem:[#allocation69_spill]] %s12781_s5 }
  0x32   :  { %s12796_s24 = sld [smem:[%s14006_s0 + %s12590_s15]]   ;;  %s12594_s15 = smov 35  }
  0x33   :  { %s12801_s5 = sld [smem:[%s14006_s0 + %s12591_s22]]   ;;  %s12595_s22 = smov 36  }
  0x34   :  { %s12806_s14 = sld [smem:[%s14006_s0 + %s12592_s28]]   ;;  %s12596_s28 = smov 37  }
  0x35   :  { %s12816_s29 = sld [smem:[%s14006_s0 + %s12594_s15]]  }
  0x36   :  { %14042 = sst [smem:[#allocation71_spill]] %s12791_s20 }
  0x37   :  { %s12811_s20 = sld [smem:[%s14006_s0 + %s12593_s7]]   ;;  %s12597_s7 = smov 38  }
  0x39   :  { %14043 = sst [smem:[#allocation72_spill]] %s12801_s5 }
  0x3a   :  { %14044 = sst [smem:[#allocation73_spill]] %s12806_s14 }
  0x3b   :  { %14046 = sst [smem:[#allocation75_spill]] %s12816_s29 }
  0x3c   :  { %s12821_s5 = sld [smem:[%s14006_s0 + %s12595_s22]]  }
  0x3d   :  { %14045 = sst [smem:[#allocation74_spill]] %s12811_s20 }
  0x3e   :  { %s12826_s14 = sld [smem:[%s14006_s0 + %s12596_s28]]  }
  0x3f   :  { %s8272_s20 = sld [smem:[%s14006_s0 + %s12597_s7]]  }
  0x40   :  { %s12834_s29 = sld [smem:[%s14006_s0 + %s12598_s16]]  }
  0x45   :  { %v84_v0 = vstv %s8272_s20 }
  0x46   :  { %85 = vst [vmem:[#allocation2] sm:$0x1] %v84_v0 }
  0x47   :  { %86 = vsyncpa [#allocation4], 0 }
  0x48   :  { %87 = vsyncpa [#allocation6], 0 }
  0x49   :  { %88 = vsyncpa [#allocation9], 0 }
  0x4a   :  { %89 = vsyncpa [#allocation12], 0 }
  0x4b   :  { %90 = vsyncpa [#allocation15], 0 }
  0x4c   :  { %91 = vsyncpa [#allocation18], 0 }
  0x4d   :  { %92 = vsyncpa [#allocation21], 0 }
  0x4e   :  { %93 = vsyncpa [#allocation24], 0 }
  0x4f   :  { %94 = vsyncpa [#allocation27], 0 }
  0x50   :  { %95 = vsyncpa [#allocation30], 0 }
  0x51   :  { %96 = vsyncpa [#allocation33], 0 }
  0x52   :  { %97 = vsyncpa [#allocation36], 0 }
  0x53   :  { %98 = vsyncpa [#allocation39], 0  ;;  %s12599_s0 = smov [#allocation5]   ;;  %s12600_s20 = smov [#allocation8]  }
  0x54   :  { %s121_s22 = sshll.u32 %s12599_s0, 4  ;;  %s141_s23 = sshll.u32 %s12600_s20, 4  ;;  %s122_s22 = int_to_ptr.vmem [resolvable:$true] %s121_s22  ;;  %s142_s23 = int_to_ptr.vmem [resolvable:$true] %s141_s23 }
  0x55   :  { %s11984_s26 = scalar_lea.hbm %s12656_s17, 16 }
  0x56   :  { %p11985_p0 = scmp.ne.s32.totalorder %s12656_s17, %s11984_s26  ;;  %p11988_p1 = scmp.lt.u32.totalorder %s11984_s26, %s12656_s17 }
  0x58   :  { %p11990_p2 = pnand %p11988_p1, %p11985_p0 }
  0x5a   :  { %11993 = shalt.err (!%p11990_p2)
}
  0x5b   :  { %s11994_s28 = scalar_lea.vmem %s122_s22, 16  ;;  %s11998_s1 = scalar_lea.vmem %s122_s22, 32 }
  0x5c   :  { %p11995_p3 = scmp.ne.s32.totalorder %s122_s22, %s11994_s28  ;;  %p11999_p4 = scmp.lt.s32.totalorder %s122_s22, %s122_s22 }
  0x5d   :  { %p12000_p5 = scmp.lt.s32.totalorder %s11998_s1, %s11994_s28 }
  0x5f   :  { %p12001_p6 = por %p12000_p5, %p11999_p4 }
  0x61   :  { %p12002_p7 = pnand %p12001_p6, %p11995_p3 }
  0x63   :  { %12005 = shalt.err (!%p12002_p7)
}
  0x64   :  { %124 = dma.hbm_to_vmem [thread:$0]  %s12656_s17, 16, %s122_s22, [#allocation6]  }
  0x65   :  { %s12006_s2 = scalar_lea.hbm %s12666_s25, 16 }
  0x66   :  { %p12007_p8 = scmp.ne.s32.totalorder %s12666_s25, %s12006_s2  ;;  %p12010_p9 = scmp.lt.u32.totalorder %s12006_s2, %s12666_s25 }
  0x68   :  { %p12012_p10 = pnand %p12010_p9, %p12007_p8 }
  0x6a   :  { %12015 = shalt.err (!%p12012_p10)
}
  0x6b   :  { %s12016_s7 = scalar_lea.vmem %s142_s23, 16  ;;  %s12020_s10 = scalar_lea.vmem %s142_s23, 32 }
  0x6c   :  { %p12017_p11 = scmp.ne.s32.totalorder %s142_s23, %s12016_s7  ;;  %p12021_p12 = scmp.lt.s32.totalorder %s142_s23, %s142_s23 }
  0x6d   :  { %p12022_p13 = scmp.lt.s32.totalorder %s12020_s10, %s12016_s7 }
  0x6f   :  { %p12023_p0 = por %p12022_p13, %p12021_p12 }
  0x71   :  { %p12024_p1 = pnand %p12023_p0, %p12017_p11 }
  0x73   :  { %12027 = shalt.err (!%p12024_p1)
}
  0x74   :  { %144 = dma.hbm_to_vmem [thread:$0]  %s12666_s25, 16, %s142_s23, [#allocation9]  }
  0x75   :  { %s12601_s11 = smov [#allocation11]   ;;  %s12602_s16 = smov [#allocation14]  }
  0x76   :  { %s162_s17 = sshll.u32 %s12601_s11, 4  ;;  %s187_s15 = sshll.u32 %s12602_s16, 4  ;;  %s163_s17 = int_to_ptr.vmem [resolvable:$true] %s162_s17  ;;  %s12844_s15 = int_to_ptr.vmem [resolvable:$true] %s187_s15 }
  0x77   :  { %s12028_s18 = scalar_lea.hbm %s12676_s3, 1536 }
  0x78   :  { %p12029_p2 = scmp.ne.s32.totalorder %s12676_s3, %s12028_s18  ;;  %p12032_p3 = scmp.lt.u32.totalorder %s12028_s18, %s12676_s3 }
  0x7a   :  { %p12034_p4 = pnand %p12032_p3, %p12029_p2 }
  0x7c   :  { %12037 = shalt.err (!%p12034_p4)
}
  0x7d   :  { %s12038_s0 = scalar_lea.vmem %s163_s17, 1536  ;;  %p12043_p6 = scmp.lt.s32.totalorder %s163_s17, %s163_s17 }
  0x7e   :  { %p12039_p5 = scmp.ne.s32.totalorder %s163_s17, %s12038_s0  ;;  %p12044_p7 = scmp.lt.s32.totalorder %s12038_s0, %s12038_s0 }
  0x80   :  { %p12045_p8 = por %p12044_p7, %p12043_p6 }
  0x82   :  { %p12046_p9 = pnand %p12045_p8, %p12039_p5 }
  0x84   :  { %12049 = shalt.err (!%p12046_p9)
}
  0x85   :  { %s12603_s25 = smov 128   ;;  %s12604_s22 = smov 8  }
  0x86   :  { %168 = dma.hbm_to_vmem [thread:$0]  %s12676_s3, 1536, %s163_s17, [#allocation12], %s12603_s25, %s12603_s25, %s12604_s22  }
  0x87   :  { %s12050_s20 = scalar_lea.hbm %s12691_s19, 16 }
  0x88   :  { %p12051_p10 = scmp.ne.s32.totalorder %s12691_s19, %s12050_s20  ;;  %p12054_p11 = scmp.lt.u32.totalorder %s12050_s20, %s12691_s19 }
  0x8a   :  { %p12056_p12 = pnand %p12054_p11, %p12051_p10 }
  0x8c   :  { %12059 = shalt.err (!%p12056_p12)
}
  0x8d   :  { %s12060_s23 = scalar_lea.vmem %s12844_s15, 16  ;;  %s12064_s26 = scalar_lea.vmem %s12844_s15, 32 }
  0x8e   :  { %p12061_p13 = scmp.ne.s32.totalorder %s12844_s15, %s12060_s23  ;;  %p12065_p0 = scmp.lt.s32.totalorder %s12844_s15, %s12844_s15 }
  0x8f   :  { %p12066_p1 = scmp.lt.s32.totalorder %s12064_s26, %s12060_s23 }
  0x91   :  { %p12067_p2 = por %p12066_p1, %p12065_p0 }
  0x93   :  { %p12068_p3 = pnand %p12067_p2, %p12061_p13 }
  0x95   :  { %12071 = shalt.err (!%p12068_p3)
}
  0x96   :  { %190 = dma.hbm_to_vmem [thread:$0]  %s12691_s19, 16, %s12844_s15, [#allocation15]  }
  0x97   :  { %s12605_s3 = smov [#allocation17]   ;;  %s12606_s1 = smov [#allocation20]  }
  0x98   :  { %s206_s28 = sshll.u32 %s12605_s3, 4  ;;  %s230_s2 = sshll.u32 %s12606_s1, 4  ;;  %s207_s28 = int_to_ptr.vmem [resolvable:$true] %s206_s28  ;;  %s12863_s2 = int_to_ptr.vmem [resolvable:$true] %s230_s2 }
  0x99   :  { %s12072_s7 = scalar_lea.hbm %s12701_s30, 1024 }
  0x9a   :  { %p12073_p4 = scmp.ne.s32.totalorder %s12701_s30, %s12072_s7  ;;  %p12076_p5 = scmp.lt.u32.totalorder %s12072_s7, %s12701_s30 }
  0x9c   :  { %p12078_p6 = pnand %p12076_p5, %p12073_p4 }
  0x9e   :  { %12081 = shalt.err (!%p12078_p6)
}
  0x9f   :  { %s12082_s10 = scalar_lea.vmem %s207_s28, 1024  ;;  %p12087_p8 = scmp.lt.s32.totalorder %s207_s28, %s207_s28 }
  0xa0   :  { %p12083_p7 = scmp.ne.s32.totalorder %s207_s28, %s12082_s10  ;;  %p12088_p9 = scmp.lt.s32.totalorder %s12082_s10, %s12082_s10 }
  0xa2   :  { %p12089_p10 = por %p12088_p9, %p12087_p8 }
  0xa4   :  { %p12090_p11 = pnand %p12089_p10, %p12083_p7 }
  0xa6   :  { %12093 = shalt.err (!%p12090_p11)
}
  0xa7   :  { %212 = dma.hbm_to_vmem [thread:$0]  %s12701_s30, 1024, %s207_s28, [#allocation18], %s12603_s25, %s12603_s25, %s12604_s22  }
  0xa8   :  { %s12094_s19 = scalar_lea.hbm %s12711_s12, 9216 }
  0xa9   :  { %p12095_p12 = scmp.ne.s32.totalorder %s12711_s12, %s12094_s19  ;;  %p12098_p13 = scmp.lt.u32.totalorder %s12094_s19, %s12711_s12 }
  0xab   :  { %p12100_p0 = pnand %p12098_p13, %p12095_p12 }
  0xad   :  { %12103 = shalt.err (!%p12100_p0)
}
  0xae   :  { %s12104_s11 = scalar_lea.vmem %s12863_s2, 9216  ;;  %p12109_p2 = scmp.lt.s32.totalorder %s12863_s2, %s12863_s2 }
  0xaf   :  { %p12105_p1 = scmp.ne.s32.totalorder %s12863_s2, %s12104_s11  ;;  %p12110_p3 = scmp.lt.s32.totalorder %s12104_s11, %s12104_s11 }
  0xb1   :  { %p12111_p4 = por %p12110_p3, %p12109_p2 }
  0xb3   :  { %p12112_p5 = pnand %p12111_p4, %p12105_p1 }
  0xb5   :  { %12115 = shalt.err (!%p12112_p5)
}
  0xb6   :  { %236 = dma.hbm_to_vmem [thread:$0]  %s12711_s12, 9216, %s12863_s2, [#allocation21], %s12603_s25, %s12603_s25, %s12604_s22  }
  0xb7   :  { %s12607_s30 = smov [#allocation23]   ;;  %s12608_s16 = smov [#allocation26]  }
  0xb8   :  { %s253_s17 = sshll.u32 %s12607_s30, 4  ;;  %s272_s15 = sshll.u32 %s12608_s16, 4  ;;  %s254_s17 = int_to_ptr.vmem [resolvable:$true] %s253_s17  ;;  %s12884_s15 = int_to_ptr.vmem [resolvable:$true] %s272_s15 }
  0xb9   :  { %s12116_s18 = scalar_lea.hbm %s12721_s27, 16 }
  0xba   :  { %p12117_p6 = scmp.ne.s32.totalorder %s12721_s27, %s12116_s18  ;;  %p12120_p7 = scmp.lt.u32.totalorder %s12116_s18, %s12721_s27 }
  0xbc   :  { %p12122_p8 = pnand %p12120_p7, %p12117_p6 }
  0xbe   :  { %12125 = shalt.err (!%p12122_p8)
}
  0xbf   :  { %s12126_s0 = scalar_lea.vmem %s254_s17, 16  ;;  %s12130_s20 = scalar_lea.vmem %s254_s17, 32 }
  0xc0   :  { %p12127_p9 = scmp.ne.s32.totalorder %s254_s17, %s12126_s0  ;;  %p12131_p10 = scmp.lt.s32.totalorder %s254_s17, %s254_s17 }
  0xc1   :  { %p12132_p11 = scmp.lt.s32.totalorder %s12130_s20, %s12126_s0 }
  0xc3   :  { %p12133_p12 = por %p12132_p11, %p12131_p10 }
  0xc5   :  { %p12134_p13 = pnand %p12133_p12, %p12127_p9 }
  0xc7   :  { %12137 = shalt.err (!%p12134_p13)
}
  0xc8   :  { %256 = dma.hbm_to_vmem [thread:$0]  %s12721_s27, 16, %s254_s17, [#allocation24]  }
  0xc9   :  { %s12138_s12 = scalar_lea.hbm %s12731_s8, 1024 }
  0xca   :  { %p12139_p0 = scmp.ne.s32.totalorder %s12731_s8, %s12138_s12  ;;  %p12142_p1 = scmp.lt.u32.totalorder %s12138_s12, %s12731_s8 }
  0xcc   :  { %p12144_p2 = pnand %p12142_p1, %p12139_p0 }
  0xce   :  { %12147 = shalt.err (!%p12144_p2)
}
  0xcf   :  { %s12148_s23 = scalar_lea.vmem %s12884_s15, 1024  ;;  %p12153_p4 = scmp.lt.s32.totalorder %s12884_s15, %s12884_s15 }
  0xd0   :  { %p12149_p3 = scmp.ne.s32.totalorder %s12884_s15, %s12148_s23  ;;  %p12154_p5 = scmp.lt.s32.totalorder %s12148_s23, %s12148_s23 }
  0xd2   :  { %p12155_p6 = por %p12154_p5, %p12153_p4 }
  0xd4   :  { %p12156_p7 = pnand %p12155_p6, %p12149_p3 }
  0xd6   :  { %12159 = shalt.err (!%p12156_p7)
}
  0xd7   :  { %278 = dma.hbm_to_vmem [thread:$0]  %s12731_s8, 1024, %s12884_s15, [#allocation27], %s12603_s25, %s12603_s25, %s12604_s22  }
  0xd8   :  { %s12609_s27 = smov [#allocation29]   ;;  %s12610_s3 = smov [#allocation32]  }
  0xd9   :  { %s299_s26 = sshll.u32 %s12609_s27, 4  ;;  %s319_s28 = sshll.u32 %s12610_s3, 4  ;;  %s300_s26 = int_to_ptr.vmem [resolvable:$true] %s299_s26  ;;  %s320_s28 = int_to_ptr.vmem [resolvable:$true] %s319_s28 }
  0xda   :  { %s12160_s1 = scalar_lea.hbm %s12746_s4, 16 }
  0xdb   :  { %p12161_p8 = scmp.ne.s32.totalorder %s12746_s4, %s12160_s1  ;;  %p12164_p9 = scmp.lt.u32.totalorder %s12160_s1, %s12746_s4 }
  0xdd   :  { %p12166_p10 = pnand %p12164_p9, %p12161_p8 }
  0xdf   :  { %12169 = shalt.err (!%p12166_p10)
}
  0xe0   :  { %s12170_s2 = scalar_lea.vmem %s300_s26, 16  ;;  %s12174_s7 = scalar_lea.vmem %s300_s26, 32 }
  0xe1   :  { %p12171_p11 = scmp.ne.s32.totalorder %s300_s26, %s12170_s2  ;;  %p12175_p12 = scmp.lt.s32.totalorder %s300_s26, %s300_s26 }
  0xe2   :  { %p12176_p13 = scmp.lt.s32.totalorder %s12174_s7, %s12170_s2 }
  0xe4   :  { %p12177_p0 = por %p12176_p13, %p12175_p12 }
  0xe6   :  { %p12178_p1 = pnand %p12177_p0, %p12171_p11 }
  0xe8   :  { %12181 = shalt.err (!%p12178_p1)
}
  0xe9   :  { %302 = dma.hbm_to_vmem [thread:$0]  %s12746_s4, 16, %s300_s26, [#allocation30]  }
  0xea   :  { %s12182_s8 = scalar_lea.hbm %s12756_s13, 16 }
  0xeb   :  { %p12183_p2 = scmp.ne.s32.totalorder %s12756_s13, %s12182_s8  ;;  %p12186_p3 = scmp.lt.u32.totalorder %s12182_s8, %s12756_s13 }
  0xed   :  { %p12188_p4 = pnand %p12186_p3, %p12183_p2 }
  0xef   :  { %12191 = shalt.err (!%p12188_p4)
}
  0xf0   :  { %s12192_s10 = scalar_lea.vmem %s320_s28, 16  ;;  %s12196_s19 = scalar_lea.vmem %s320_s28, 32 }
  0xf1   :  { %p12193_p5 = scmp.ne.s32.totalorder %s320_s28, %s12192_s10  ;;  %p12197_p6 = scmp.lt.s32.totalorder %s320_s28, %s320_s28 }
  0xf2   :  { %p12198_p7 = scmp.lt.s32.totalorder %s12196_s19, %s12192_s10 }
  0xf4   :  { %p12199_p8 = por %p12198_p7, %p12197_p6 }
  0xf6   :  { %p12200_p9 = pnand %p12199_p8, %p12193_p5 }
  0xf8   :  { %12203 = shalt.err (!%p12200_p9)
}
  0xf9   :  { %322 = dma.hbm_to_vmem [thread:$0]  %s12756_s13, 16, %s320_s28, [#allocation33]  }
  0xfa   :  { %s12611_s11 = smov [#allocation35]   ;;  %s12204_s30 = scalar_lea.hbm %s12766_s6, 192 }
  0xfb   :  { %s340_s4 = sshll.u32 %s12611_s11, 4  ;;  %p12205_p10 = scmp.ne.s32.totalorder %s12766_s6, %s12204_s30  ;;  %s341_s4 = int_to_ptr.vmem [resolvable:$true] %s340_s4 }
  0xfc   :  { %p12208_p11 = scmp.lt.u32.totalorder %s12204_s30, %s12766_s6 }
  0xfe   :  { %p12210_p12 = pnand %p12208_p11, %p12205_p10 }
 0x100   :  { %12213 = shalt.err (!%p12210_p12)
}
 0x101   :  { %s12214_s17 = scalar_lea.vmem %s341_s4, 192  ;;  %p12219_p0 = scmp.lt.s32.totalorder %s341_s4, %s341_s4 }
 0x102   :  { %p12215_p13 = scmp.ne.s32.totalorder %s341_s4, %s12214_s17  ;;  %p12220_p1 = scmp.lt.s32.totalorder %s12214_s17, %s12214_s17 }
 0x104   :  { %p12221_p2 = por %p12220_p1, %p12219_p0 }
 0x106   :  { %p12222_p3 = pnand %p12221_p2, %p12215_p13 }
 0x108   :  { %12225 = shalt.err (!%p12222_p3)
}
 0x109   :  { %s12612_s16 = smov 64   ;;  %s12613_s13 = smov 4  }
 0x10a   :  { %346 = dma.hbm_to_vmem [thread:$0]  %s12766_s6, 192, %s341_s4, [#allocation36], %s12612_s16, %s12612_s16, %s12613_s13  }
 0x10b   :  { %s12614_s15 = smov [#allocation38]   ;;  %s12226_s0 = scalar_lea.hbm %s12796_s24, 96 }
 0x10c   :  { %s370_s18 = sshll.u32 %s12614_s15, 4  ;;  %p12227_p4 = scmp.ne.s32.totalorder %s12796_s24, %s12226_s0  ;;  %s371_s18 = int_to_ptr.vmem [resolvable:$true] %s370_s18 }
 0x10d   :  { %p12230_p5 = scmp.lt.u32.totalorder %s12226_s0, %s12796_s24 }
 0x10f   :  { %p12232_p6 = pnand %p12230_p5, %p12227_p4 }
 0x111   :  { %12235 = shalt.err (!%p12232_p6)
}
 0x112   :  { %s12236_s20 = scalar_lea.vmem %s371_s18, 96  ;;  %p12241_p8 = scmp.lt.s32.totalorder %s371_s18, %s371_s18 }
 0x113   :  { %p12237_p7 = scmp.ne.s32.totalorder %s371_s18, %s12236_s20  ;;  %p12242_p9 = scmp.lt.s32.totalorder %s12236_s20, %s12236_s20 }
 0x115   :  { %p12243_p10 = por %p12242_p9, %p12241_p8 }
 0x117   :  { %p12244_p11 = pnand %p12243_p10, %p12237_p7 }
 0x119   :  { %12247 = shalt.err (!%p12244_p11)
}
 0x11a   :  { %s12615_s12 = smov 32   ;;  %s12616_s6 = smov 2  }
 0x11b   :  { %376 = dma.hbm_to_vmem [thread:$0]  %s12796_s24, 96, %s371_s18, [#allocation39], %s12615_s12, %s12615_s12, %s12616_s6  }
 0x11c   :  { %s12617_s23 = smov [#allocation3]   ;;  %s12618_s26 = smov [#allocation7]  }
 0x11d   :  { %s106_s27 = sshll.u32 %s12617_s23, 4  ;;  %s131_s3 = sshll.u32 %s12618_s26, 4  ;;  %s107_s27 = int_to_ptr.vmem [resolvable:$true] %s106_s27  ;;  %s132_s3 = int_to_ptr.vmem [resolvable:$true] %s131_s3 }
 0x11e   :  { %s12248_s28 = scalar_lea.hbm %s12646_s9, 3072 }
 0x11f   :  { %p12249_p12 = scmp.ne.s32.totalorder %s12646_s9, %s12248_s28  ;;  %p12252_p13 = scmp.lt.u32.totalorder %s12248_s28, %s12646_s9 }
 0x121   :  { %p12254_p0 = pnand %p12252_p13, %p12249_p12 }
 0x123   :  { %12257 = shalt.err (!%p12254_p0)
}
 0x124   :  { %s12258_s1 = scalar_lea.vmem %s107_s27, 3072  ;;  %p12263_p2 = scmp.lt.s32.totalorder %s107_s27, %s107_s27 }
 0x125   :  { %p12259_p1 = scmp.ne.s32.totalorder %s107_s27, %s12258_s1  ;;  %p12264_p3 = scmp.lt.s32.totalorder %s12258_s1, %s12258_s1 }
 0x127   :  { %p12265_p4 = por %p12264_p3, %p12263_p2 }
 0x129   :  { %p12266_p5 = pnand %p12265_p4, %p12259_p1 }
 0x12b   :  { %12269 = shalt.err (!%p12266_p5)
}
 0x12c   :  { %112 = dma.hbm_to_vmem [thread:$0]  %s12646_s9, 3072, %s107_s27, [#allocation4], %s12603_s25, %s12603_s25, %s12604_s22  }
 0x12d   :  { %s12270_s24 = scalar_lea.hbm %s12661_s21, 16 }
 0x12e   :  { %p12271_p6 = scmp.ne.s32.totalorder %s12661_s21, %s12270_s24  ;;  %p12274_p7 = scmp.lt.u32.totalorder %s12270_s24, %s12661_s21 }
 0x130   :  { %p12276_p8 = pnand %p12274_p7, %p12271_p6 }
 0x132   :  { %12279 = shalt.err (!%p12276_p8)
}
 0x133   :  { %s12280_s2 = scalar_lea.vmem %s132_s3, 16  ;;  %s12284_s7 = scalar_lea.vmem %s132_s3, 32 }
 0x134   :  { %p12281_p9 = scmp.ne.s32.totalorder %s132_s3, %s12280_s2  ;;  %p12285_p10 = scmp.lt.s32.totalorder %s132_s3, %s132_s3 }
 0x135   :  { %p12286_p11 = scmp.lt.s32.totalorder %s12284_s7, %s12280_s2 }
 0x137   :  { %p12287_p12 = por %p12286_p11, %p12285_p10 }
 0x139   :  { %p12288_p13 = pnand %p12287_p12, %p12281_p9 }
 0x13b   :  { %12291 = shalt.err (!%p12288_p13)
}
 0x13c   :  { %s14047_s8 = sld [smem:[#allocation56_spill]]  ;;  %s12619_s10 = smov [#allocation10]  }
 0x13d   :  { %134 = dma.hbm_to_vmem [thread:$0]  %s12661_s21, 16, %s132_s3, [#allocation6]  }
 0x13e   :  { %s150_s9 = sshll.u32 %s12619_s10, 4  ;;  %s12620_s19 = smov [#allocation13]   ;;  %s151_s9 = int_to_ptr.vmem [resolvable:$true] %s150_s9 }
 0x13f   :  { %s177_s11 = sshll.u32 %s12620_s19, 4  ;;  %s178_s11 = int_to_ptr.vmem [resolvable:$true] %s177_s11 }
 0x142   :  { %s12292_s4 = scalar_lea.hbm %s14047_s8, 1024 }
 0x143   :  { %p12293_p0 = scmp.ne.s32.totalorder %s14047_s8, %s12292_s4  ;;  %p12296_p1 = scmp.lt.u32.totalorder %s12292_s4, %s14047_s8 }
 0x145   :  { %p12298_p2 = pnand %p12296_p1, %p12293_p0 }
 0x147   :  { %12301 = shalt.err (!%p12298_p2)
}
 0x148   :  { %s12302_s30 = scalar_lea.vmem %s151_s9, 1024  ;;  %p12307_p4 = scmp.lt.s32.totalorder %s151_s9, %s151_s9 }
 0x149   :  { %p12303_p3 = scmp.ne.s32.totalorder %s151_s9, %s12302_s30  ;;  %p12308_p5 = scmp.lt.s32.totalorder %s12302_s30, %s12302_s30 }
 0x14b   :  { %p12309_p6 = por %p12308_p5, %p12307_p4 }
 0x14d   :  { %p12310_p7 = pnand %p12309_p6, %p12303_p3 }
 0x14f   :  { %12313 = shalt.err (!%p12310_p7)
}
 0x150   :  { %s14048_s21 = sld [smem:[#allocation58_spill]] }
 0x151   :  { %156 = dma.hbm_to_vmem [thread:$0]  %s14047_s8, 1024, %s151_s9, [#allocation9], %s12603_s25, %s12603_s25, %s12604_s22  }
 0x156   :  { %s12314_s17 = scalar_lea.hbm %s14048_s21, 16 }
 0x157   :  { %p12315_p8 = scmp.ne.s32.totalorder %s14048_s21, %s12314_s17  ;;  %p12318_p9 = scmp.lt.u32.totalorder %s12314_s17, %s14048_s21 }
 0x159   :  { %p12320_p10 = pnand %p12318_p9, %p12315_p8 }
 0x15b   :  { %12323 = shalt.err (!%p12320_p10)
}
 0x15c   :  { %s12324_s16 = scalar_lea.vmem %s178_s11, 16  ;;  %s12328_s13 = scalar_lea.vmem %s178_s11, 32 }
 0x15d   :  { %p12325_p11 = scmp.ne.s32.totalorder %s178_s11, %s12324_s16  ;;  %p12329_p12 = scmp.lt.s32.totalorder %s178_s11, %s178_s11 }
 0x15e   :  { %p12330_p13 = scmp.lt.s32.totalorder %s12328_s13, %s12324_s16 }
 0x160   :  { %p12331_p0 = por %p12330_p13, %p12329_p12 }
 0x162   :  { %p12332_p1 = pnand %p12331_p0, %p12325_p11 }
 0x164   :  { %12335 = shalt.err (!%p12332_p1)
}
 0x165   :  { %s14049_s15 = sld [smem:[#allocation59_spill]]  ;;  %s12621_s18 = smov [#allocation16]  }
 0x166   :  { %180 = dma.hbm_to_vmem [thread:$0]  %s14048_s21, 16, %s178_s11, [#allocation12]  }
 0x167   :  { %s197_s0 = sshll.u32 %s12621_s18, 4  ;;  %s12622_s20 = smov [#allocation19]   ;;  %s198_s0 = int_to_ptr.vmem [resolvable:$true] %s197_s0 }
 0x168   :  { %s218_s12 = sshll.u32 %s12622_s20, 4  ;;  %s12940_s12 = int_to_ptr.vmem [resolvable:$true] %s218_s12 }
 0x16b   :  { %s12336_s6 = scalar_lea.hbm %s14049_s15, 16 }
 0x16c   :  { %p12337_p2 = scmp.ne.s32.totalorder %s14049_s15, %s12336_s6  ;;  %p12340_p3 = scmp.lt.u32.totalorder %s12336_s6, %s14049_s15 }
 0x16e   :  { %p12342_p4 = pnand %p12340_p3, %p12337_p2 }
 0x170   :  { %12345 = shalt.err (!%p12342_p4)
}
 0x171   :  { %s12346_s23 = scalar_lea.vmem %s198_s0, 16  ;;  %s12350_s27 = scalar_lea.vmem %s198_s0, 32 }
 0x172   :  { %p12347_p5 = scmp.ne.s32.totalorder %s198_s0, %s12346_s23  ;;  %p12351_p6 = scmp.lt.s32.totalorder %s198_s0, %s198_s0 }
 0x173   :  { %p12352_p7 = scmp.lt.s32.totalorder %s12350_s27, %s12346_s23 }
 0x175   :  { %p12353_p8 = por %p12352_p7, %p12351_p6 }
 0x177   :  { %p12354_p9 = pnand %p12353_p8, %p12347_p5 }
 0x179   :  { %12357 = shalt.err (!%p12354_p9)
}
 0x17a   :  { %s14050_s26 = sld [smem:[#allocation60_spill]] }
 0x17b   :  { %200 = dma.hbm_to_vmem [thread:$0]  %s14049_s15, 16, %s198_s0, [#allocation15]  }
 0x180   :  { %s12358_s3 = scalar_lea.hbm %s14050_s26, 768 }
 0x181   :  { %p12359_p10 = scmp.ne.s32.totalorder %s14050_s26, %s12358_s3  ;;  %p12362_p11 = scmp.lt.u32.totalorder %s12358_s3, %s14050_s26 }
 0x183   :  { %p12364_p12 = pnand %p12362_p11, %p12359_p10 }
 0x185   :  { %12367 = shalt.err (!%p12364_p12)
}
 0x186   :  { %s12368_s28 = scalar_lea.vmem %s12940_s12, 768  ;;  %p12373_p0 = scmp.lt.s32.totalorder %s12940_s12, %s12940_s12 }
 0x187   :  { %p12369_p13 = scmp.ne.s32.totalorder %s12940_s12, %s12368_s28  ;;  %p12374_p1 = scmp.lt.s32.totalorder %s12368_s28, %s12368_s28 }
 0x189   :  { %p12375_p2 = por %p12374_p1, %p12373_p0 }
 0x18b   :  { %p12376_p3 = pnand %p12375_p2, %p12369_p13 }
 0x18d   :  { %12379 = shalt.err (!%p12376_p3)
}
 0x18e   :  { %s14051_s1 = sld [smem:[#allocation61_spill]]  ;;  %s12623_s24 = smov [#allocation22]  }
 0x18f   :  { %224 = dma.hbm_to_vmem [thread:$0]  %s14050_s26, 768, %s12940_s12, [#allocation18], %s12603_s25, %s12603_s25, %s12604_s22  }
 0x190   :  { %s243_s2 = sshll.u32 %s12623_s24, 4  ;;  %s12624_s7 = smov [#allocation25]   ;;  %s244_s2 = int_to_ptr.vmem [resolvable:$true] %s243_s2 }
 0x191   :  { %s263_s8 = sshll.u32 %s12624_s7, 4  ;;  %s264_s8 = int_to_ptr.vmem [resolvable:$true] %s263_s8 }
 0x194   :  { %s12380_s10 = scalar_lea.hbm %s14051_s1, 16 }
 0x195   :  { %p12381_p4 = scmp.ne.s32.totalorder %s14051_s1, %s12380_s10  ;;  %p12384_p5 = scmp.lt.u32.totalorder %s12380_s10, %s14051_s1 }
 0x197   :  { %p12386_p6 = pnand %p12384_p5, %p12381_p4 }
 0x199   :  { %12389 = shalt.err (!%p12386_p6)
}
 0x19a   :  { %s12390_s9 = scalar_lea.vmem %s244_s2, 16  ;;  %s12394_s19 = scalar_lea.vmem %s244_s2, 32 }
 0x19b   :  { %p12391_p7 = scmp.ne.s32.totalorder %s244_s2, %s12390_s9  ;;  %p12395_p8 = scmp.lt.s32.totalorder %s244_s2, %s244_s2 }
 0x19c   :  { %p12396_p9 = scmp.lt.s32.totalorder %s12394_s19, %s12390_s9 }
 0x19e   :  { %p12397_p10 = por %p12396_p9, %p12395_p8 }
 0x1a0   :  { %p12398_p11 = pnand %p12397_p10, %p12391_p7 }
 0x1a2   :  { %12401 = shalt.err (!%p12398_p11)
}
 0x1a3   :  { %s14052_s11 = sld [smem:[#allocation62_spill]] }
 0x1a4   :  { %246 = dma.hbm_to_vmem [thread:$0]  %s14051_s1, 16, %s244_s2, [#allocation21]  }
 0x1a9   :  { %s12402_s4 = scalar_lea.hbm %s14052_s11, 16 }
 0x1aa   :  { %p12403_p12 = scmp.ne.s32.totalorder %s14052_s11, %s12402_s4  ;;  %p12406_p13 = scmp.lt.u32.totalorder %s12402_s4, %s14052_s11 }
 0x1ac   :  { %p12408_p0 = pnand %p12406_p13, %p12403_p12 }
 0x1ae   :  { %12411 = shalt.err (!%p12408_p0)
}
 0x1af   :  { %s12412_s30 = scalar_lea.vmem %s264_s8, 16  ;;  %s12416_s21 = scalar_lea.vmem %s264_s8, 32 }
 0x1b0   :  { %p12413_p1 = scmp.ne.s32.totalorder %s264_s8, %s12412_s30  ;;  %p12417_p2 = scmp.lt.s32.totalorder %s264_s8, %s264_s8 }
 0x1b1   :  { %p12418_p3 = scmp.lt.s32.totalorder %s12416_s21, %s12412_s30 }
 0x1b3   :  { %p12419_p4 = por %p12418_p3, %p12417_p2 }
 0x1b5   :  { %p12420_p5 = pnand %p12419_p4, %p12413_p1 }
 0x1b7   :  { %12423 = shalt.err (!%p12420_p5)
}
 0x1b8   :  { %s14053_s17 = sld [smem:[#allocation63_spill]]  ;;  %s12625_s16 = smov [#allocation28]  }
 0x1b9   :  { %266 = dma.hbm_to_vmem [thread:$0]  %s14052_s11, 16, %s264_s8, [#allocation24]  }
 0x1ba   :  { %s284_s13 = sshll.u32 %s12625_s16, 4  ;;  %s12626_s15 = smov [#allocation31]   ;;  %s285_s13 = int_to_ptr.vmem [resolvable:$true] %s284_s13 }
 0x1bb   :  { %s309_s18 = sshll.u32 %s12626_s15, 4  ;;  %s310_s18 = int_to_ptr.vmem [resolvable:$true] %s309_s18 }
 0x1be   :  { %s12424_s0 = scalar_lea.hbm %s14053_s17, 384 }
 0x1bf   :  { %p12425_p6 = scmp.ne.s32.totalorder %s14053_s17, %s12424_s0  ;;  %p12428_p7 = scmp.lt.u32.totalorder %s12424_s0, %s14053_s17 }
 0x1c1   :  { %p12430_p8 = pnand %p12428_p7, %p12425_p6 }
 0x1c3   :  { %12433 = shalt.err (!%p12430_p8)
}
 0x1c4   :  { %s12434_s20 = scalar_lea.vmem %s285_s13, 384  ;;  %p12439_p10 = scmp.lt.s32.totalorder %s285_s13, %s285_s13 }
 0x1c5   :  { %p12435_p9 = scmp.ne.s32.totalorder %s285_s13, %s12434_s20  ;;  %p12440_p11 = scmp.lt.s32.totalorder %s12434_s20, %s12434_s20 }
 0x1c7   :  { %p12441_p12 = por %p12440_p11, %p12439_p10 }
 0x1c9   :  { %p12442_p13 = pnand %p12441_p12, %p12435_p9 }
 0x1cb   :  { %12445 = shalt.err (!%p12442_p13)
}
 0x1cc   :  { %s14054_s12 = sld [smem:[#allocation65_spill]] }
 0x1cd   :  { %290 = dma.hbm_to_vmem [thread:$0]  %s14053_s17, 384, %s285_s13, [#allocation27], %s12603_s25, %s12603_s25, %s12604_s22  }
 0x1d2   :  { %s12446_s6 = scalar_lea.hbm %s14054_s12, 16 }
 0x1d3   :  { %p12447_p0 = scmp.ne.s32.totalorder %s14054_s12, %s12446_s6  ;;  %p12450_p1 = scmp.lt.u32.totalorder %s12446_s6, %s14054_s12 }
 0x1d5   :  { %p12452_p2 = pnand %p12450_p1, %p12447_p0 }
 0x1d7   :  { %12455 = shalt.err (!%p12452_p2)
}
 0x1d8   :  { %s12456_s23 = scalar_lea.vmem %s310_s18, 16  ;;  %s12460_s27 = scalar_lea.vmem %s310_s18, 32 }
 0x1d9   :  { %p12457_p3 = scmp.ne.s32.totalorder %s310_s18, %s12456_s23  ;;  %p12461_p4 = scmp.lt.s32.totalorder %s310_s18, %s310_s18 }
 0x1da   :  { %p12462_p5 = scmp.lt.s32.totalorder %s12460_s27, %s12456_s23 }
 0x1dc   :  { %p12463_p6 = por %p12462_p5, %p12461_p4 }
 0x1de   :  { %p12464_p7 = pnand %p12463_p6, %p12457_p3 }
 0x1e0   :  { %12467 = shalt.err (!%p12464_p7)
}
 0x1e1   :  { %s14055_s26 = sld [smem:[#allocation66_spill]]  ;;  %s12627_s3 = smov [#allocation34]  }
 0x1e2   :  { %312 = dma.hbm_to_vmem [thread:$0]  %s14054_s12, 16, %s310_s18, [#allocation30]  }
 0x1e3   :  { %s328_s28 = sshll.u32 %s12627_s3, 4  ;;  %s12628_s1 = smov [#allocation37]   ;;  %s329_s28 = int_to_ptr.vmem [resolvable:$true] %s328_s28 }
 0x1e4   :  { %s359_s24 = sshll.u32 %s12628_s1, 4  ;;  %s360_s24 = int_to_ptr.vmem [resolvable:$true] %s359_s24 }
 0x1e7   :  { %s12468_s2 = scalar_lea.hbm %s14055_s26, 512 }
 0x1e8   :  { %p12469_p8 = scmp.ne.s32.totalorder %s14055_s26, %s12468_s2  ;;  %p12472_p9 = scmp.lt.u32.totalorder %s12468_s2, %s14055_s26 }
 0x1ea   :  { %p12474_p10 = pnand %p12472_p9, %p12469_p8 }
 0x1ec   :  { %12477 = shalt.err (!%p12474_p10)
}
 0x1ed   :  { %s12478_s7 = scalar_lea.vmem %s329_s28, 512  ;;  %p12483_p12 = scmp.lt.s32.totalorder %s329_s28, %s329_s28 }
 0x1ee   :  { %p12479_p11 = scmp.ne.s32.totalorder %s329_s28, %s12478_s7  ;;  %p12484_p13 = scmp.lt.s32.totalorder %s12478_s7, %s12478_s7 }
 0x1f0   :  { %p12485_p0 = por %p12484_p13, %p12483_p12 }
 0x1f2   :  { %p12486_p1 = pnand %p12485_p0, %p12479_p11 }
 0x1f4   :  { %12489 = shalt.err (!%p12486_p1)
}
 0x1f5   :  { %s14056_s8 = sld [smem:[#allocation70_spill]] }
 0x1f6   :  { %334 = dma.hbm_to_vmem [thread:$0]  %s14055_s26, 512, %s329_s28, [#allocation33], %s12603_s25, %s12603_s25, %s12604_s22  }
 0x1fb   :  { %s12490_s10 = scalar_lea.hbm %s14056_s8, 16 }
 0x1fc   :  { %p12491_p2 = scmp.ne.s32.totalorder %s14056_s8, %s12490_s10  ;;  %p12494_p3 = scmp.lt.u32.totalorder %s12490_s10, %s14056_s8 }
 0x1fe   :  { %p12496_p4 = pnand %p12494_p3, %p12491_p2 }
 0x200   :  { %12499 = shalt.err (!%p12496_p4)
}
 0x201   :  { %s12500_s9 = scalar_lea.vmem %s360_s24, 16  ;;  %s12504_s19 = scalar_lea.vmem %s360_s24, 32 }
 0x202   :  { %p12501_p5 = scmp.ne.s32.totalorder %s360_s24, %s12500_s9  ;;  %p12505_p6 = scmp.lt.s32.totalorder %s360_s24, %s360_s24 }
 0x203   :  { %p12506_p7 = scmp.lt.s32.totalorder %s12504_s19, %s12500_s9 }
 0x205   :  { %p12507_p8 = por %p12506_p7, %p12505_p6 }
 0x207   :  { %p12508_p9 = pnand %p12507_p8, %p12501_p5 }
 0x209   :  { %12511 = shalt.err (!%p12508_p9)
}
 0x20a   :  { %s14057_s11 = sld [smem:[#allocation73_spill]]  ;;  %s12629_s4 = smov [#allocation40]  }
 0x20b   :  { %362 = dma.hbm_to_vmem [thread:$0]  %s14056_s8, 16, %s360_s24, [#allocation36]  }
 0x20c   :  { %s385_s25 = sshll.u32 %s12629_s4, 4  ;;  %s386_s25 = int_to_ptr.vmem [resolvable:$true] %s385_s25 }
 0x210   :  { %s12512_s22 = scalar_lea.hbm %s14057_s11, 16 }
 0x211   :  { %p12513_p10 = scmp.ne.s32.totalorder %s14057_s11, %s12512_s22  ;;  %p12516_p11 = scmp.lt.u32.totalorder %s12512_s22, %s14057_s11 }
 0x213   :  { %p12518_p12 = pnand %p12516_p11, %p12513_p10 }
 0x215   :  { %12521 = shalt.err (!%p12518_p12)
}
 0x216   :  { %s12522_s30 = scalar_lea.vmem %s386_s25, 16  ;;  %s12526_s21 = scalar_lea.vmem %s386_s25, 32 }
 0x217   :  { %p12523_p13 = scmp.ne.s32.totalorder %s386_s25, %s12522_s30  ;;  %p12527_p0 = scmp.lt.s32.totalorder %s386_s25, %s386_s25 }
 0x218   :  { %p12528_p1 = scmp.lt.s32.totalorder %s12526_s21, %s12522_s30 }
 0x21a   :  { %p12529_p2 = por %p12528_p1, %p12527_p0 }
 0x21c   :  { %p12530_p3 = pnand %p12529_p2, %p12523_p13 }
 0x21e   :  { %12533 = shalt.err (!%p12530_p3)
}
 0x21f   :  { %388 = dma.hbm_to_vmem [thread:$0]  %s14057_s11, 16, %s386_s25, [#allocation39]  }
 0x220   :  { %12534 = dma.done.wait [#allocation4], 3072  }
 0x221   :  { %12535 = vsyncadd [#allocation4], 4294964224 }
 0x222   :  { %12536 = dma.done.wait [#allocation6], 32  }
 0x223   :  { %12537 = vsyncadd [#allocation6], 4294967264 }
 0x224   :  { %12538 = dma.done.wait [#allocation9], 1040  }
 0x225   :  { %12539 = vsyncadd [#allocation9], 4294966256 }
 0x226   :  { %12540 = dma.done.wait [#allocation12], 1552  }
 0x227   :  { %12541 = vsyncadd [#allocation12], 4294965744 }
 0x228   :  { %12542 = dma.done.wait [#allocation15], 32  }
 0x229   :  { %12543 = vsyncadd [#allocation15], 4294967264 }
 0x22a   :  { %12544 = dma.done.wait [#allocation18], 1792  }
 0x22b   :  { %12545 = vsyncadd [#allocation18], 4294965504 }
 0x22c   :  { %12546 = dma.done.wait [#allocation21], 9232  }
 0x22d   :  { %12547 = vsyncadd [#allocation21], 4294958064 }
 0x22e   :  { %12548 = dma.done.wait [#allocation24], 32  }
 0x22f   :  { %12549 = vsyncadd [#allocation24], 4294967264 }
 0x230   :  { %12550 = dma.done.wait [#allocation27], 1408  }
 0x231   :  { %12551 = vsyncadd [#allocation27], 4294965888 }
 0x232   :  { %12552 = dma.done.wait [#allocation30], 32  }
 0x233   :  { %12553 = vsyncadd [#allocation30], 4294967264 }
 0x234   :  { %12554 = dma.done.wait [#allocation33], 528  }
 0x235   :  { %12555 = vsyncadd [#allocation33], 4294966768 }
 0x236   :  { %12556 = dma.done.wait [#allocation36], 208  }
 0x237   :  { %12557 = vsyncadd [#allocation36], 4294967088 }
 0x238   :  { %12558 = dma.done.wait [#allocation39], 112  }
 0x239   :  { %12559 = vsyncadd [#allocation39], 4294967184  ;;  %s14058_s17 = sld [smem:[#allocation54_spill]]  ;;  %s14059_s16 = sld [smem:[#allocation55_spill]]  ;;  %v490_v10 = vld [vmem:[#allocation3] sm:$0xff]  ;;  %v491_v38 = vld [vmem:[#allocation3 + $0x8] sm:$0xff] }
 0x23a   :  { %9498 = vmatprep.mubr.f32.mxu0 %v490_v10  ;;  %v492_v39 = vld [vmem:[#allocation3 + $0x10] sm:$0xff]  ;;  %v493_v40 = vld [vmem:[#allocation3 + $0x18] sm:$0xff]  ;;  %v494_v41 = vld [vmem:[#allocation3 + $0x20] sm:$0xff]  ;;  %vm620_vm0 = vcmask 523264   ;;  %s14060_s13 = sld [smem:[#allocation57_spill]]  ;;  %vm12631_vm1 = vmmov 0  }
 0x23b   :  { %v495_v42 = vld [vmem:[#allocation3 + $0x28] sm:$0xff]  ;;  %v496_v43 = vld [vmem:[#allocation3 + $0x30] sm:$0xff]  ;;  %v497_v44 = vld [vmem:[#allocation3 + $0x38] sm:$0xff]  ;;  %vm3467_vm2 = vcmask 261120   ;;  %s14061_s15 = sld [smem:[#allocation64_spill]]  ;;  %vm4726_vm3 = vcmask 130048  }
 0x23c   :  { %v978_v45 = vld [vmem:[#allocation3 + $0x40] sm:$0xff]  ;;  %v979_v46 = vld [vmem:[#allocation3 + $0x48] sm:$0xff]  ;;  %v980_v47 = vld [vmem:[#allocation3 + $0x50] sm:$0xff]  ;;  %s14062_s18 = sld [smem:[#allocation67_spill]]  ;;  %vm5883_vm4 = vcmask 64512   ;;  %s14063_s0 = sld [smem:[#allocation71_spill]] }
 0x23d   :  { %v981_v48 = vld [vmem:[#allocation3 + $0x58] sm:$0xff]  ;;  %v982_v49 = vld [vmem:[#allocation3 + $0x60] sm:$0xff]  ;;  %v983_v50 = vld [vmem:[#allocation3 + $0x68] sm:$0xff]  ;;  %s14064_s20 = sld [smem:[#allocation68_spill]]  ;;  %vm6806_vm5 = vcmask 257024   ;;  %s14065_s12 = sld [smem:[#allocation72_spill]] }
 0x23e   :  { %v984_v51 = vld [vmem:[#allocation3 + $0x70] sm:$0xff]  ;;  %v985_v52 = vld [vmem:[#allocation3 + $0x78] sm:$0xff]  ;;  %v1482_v53 = vld [vmem:[#allocation3 + $0x80] sm:$0xff]  ;;  %s14066_s6 = sld [smem:[#allocation69_spill]]  ;;  %vm7009_vm6 = vcmask 1043456   ;;  %vm7005_vm7 = vcmask 31744  }
 0x23f   :  { %v474_v1 = vld [vmem:[%s14058_s17] sm:$0xff]  ;;  %v475_v2 = vld [vmem:[%s14058_s17 + $0x8] sm:$0xff]  ;;  %v476_v3 = vld [vmem:[%s14058_s17 + $0x10] sm:$0xff]  ;;  %vm7932_vm8 = vcmask 123904   ;;  %s14068_s23 = sld [smem:[#allocation75_spill]]  ;;  %vm8216_vm9 = vcmask 1024  }
 0x240   :  { %v12995_v4 = vpack.c.bf16 %v475_v2, %v474_v1  ;;  %v477_v5 = vld [vmem:[%s14058_s17 + $0x18] sm:$0xff]  ;;  %v478_v7 = vld [vmem:[%s14058_s17 + $0x20] sm:$0xff]  ;;  %v479_v8 = vld [vmem:[%s14058_s17 + $0x28] sm:$0xff] }
 0x241   :  { %v12998_v6 = vpack.c.bf16 %v477_v5, %v476_v3  ;;  %v13005_v9 = vpack.c.bf16 %v479_v8, %v478_v7  ;;  %v480_v11 = vld [vmem:[%s14058_s17 + $0x30] sm:$0xff]  ;;  %v481_v12 = vld [vmem:[%s14058_s17 + $0x38] sm:$0xff]  ;;  %v482_v14 = vld [vmem:[%s14058_s17 + $0x40] sm:$0xff] }
 0x242   :  { %10880 = vmatprep.subr.bf16.mxu0 %v12995_v4  ;;  %v13011_v13 = vpack.c.bf16 %v481_v12, %v480_v11  ;;  %v483_v15 = vld [vmem:[%s14058_s17 + $0x48] sm:$0xff]  ;;  %v484_v17 = vld [vmem:[%s14058_s17 + $0x50] sm:$0xff]  ;;  %v8274_v18 = vld [vmem:[%s14059_s16 + $0x40] sm:$0xff] }
 0x243   :  { %10882 = vmatpush3.bf16.msra.mxu0 %v12995_v4  ;;  %v13017_v16 = vpack.c.bf16 %v483_v15, %v482_v14  ;;  %v8275_v19 = vld [vmem:[%s14059_s16 + $0x48] sm:$0xff]  ;;  %v485_v20 = vld [vmem:[%s14058_s17 + $0x58] sm:$0xff]  ;;  %v8276_v22 = vld [vmem:[%s14059_s16 + $0x50] sm:$0xff] }
 0x244   :  { %10884 = vmatprep.subr.bf16.mxu0 %v12998_v6  ;;  %v10911_v21 = vpack.c.bf16 %v8275_v19, %v8274_v18  ;;  %v8277_v23 = vld [vmem:[%s14059_s16 + $0x58] sm:$0xff]  ;;  %v8278_v25 = vld [vmem:[%s14059_s16 + $0x60] sm:$0xff]  ;;  %v8279_v26 = vld [vmem:[%s14059_s16 + $0x68] sm:$0xff]  ;;  %v13029_v27 = vpack.c.bf16 %v485_v20, %v484_v17 }
 0x245   :  { %v10915_v24 = vpack.c.bf16 %v8277_v23, %v8276_v22  ;;  %v486_v28 = vld [vmem:[%s14058_s17 + $0x60] sm:$0xff]  ;;  %v487_v29 = vld [vmem:[%s14058_s17 + $0x68] sm:$0xff]  ;;  %v10919_v30 = vpack.c.bf16 %v8279_v26, %v8278_v25  ;;  %v8280_v31 = vld [vmem:[%s14059_s16 + $0x70] sm:$0xff] }
 0x246   :  { %10912 = vmatprep.subr.bf16.mxu1 %v10911_v21  ;;  %v8281_v32 = vld [vmem:[%s14059_s16 + $0x78] sm:$0xff]  ;;  %v13037_v33 = vpack.c.bf16 %v487_v29, %v486_v28  ;;  %v488_v34 = vld [vmem:[%s14058_s17 + $0x70] sm:$0xff]  ;;  %v1486_v57 = vld [vmem:[#allocation3 + $0xa0] sm:$0xff] }
 0x247   :  { %10886 = vmatpush3.bf16.msra.mxu0 %v12998_v6  ;;  %10914 = vmatpush3.bf16.msra.mxu1 %v10911_v21  ;;  %v489_v35 = vld [vmem:[%s14058_s17 + $0x78] sm:$0xff]  ;;  %v10923_v36 = vpack.c.bf16 %v8281_v32, %v8280_v31  ;;  %v1483_v54 = vld [vmem:[#allocation3 + $0x88] sm:$0xff]  ;;  %v603_v61 = vld [vmem:[%s14059_s16] sm:$0xff] }
 0x248   :  { %10888 = vmatprep.subr.bf16.mxu0 %v13005_v9  ;;  %10916 = vmatprep.subr.bf16.mxu1 %v10915_v24  ;;  %v13043_v37 = vpack.c.bf16 %v489_v35, %v488_v34  ;;  %v1484_v55 = vld [vmem:[#allocation3 + $0x90] sm:$0xff]  ;;  %v1485_v56 = vld [vmem:[#allocation3 + $0x98] sm:$0xff]  ;;  %v1487_v58 = vld [vmem:[#allocation3 + $0xa8] sm:$0xff] }
 0x249   :  { %v1488_v59 = vld [vmem:[#allocation3 + $0xb0] sm:$0xff]  ;;  %v1489_v60 = vld [vmem:[#allocation3 + $0xb8] sm:$0xff]  ;;  %v604_v62 = vld [vmem:[%s14059_s16 + $0x8] sm:$0xff] }
 0x24a   :  { %v10927_v63 = vpack.c.bf16 %v604_v62, %v603_v61  ;;  %v605_v0 = vld [vmem:[%s14059_s16 + $0x10] sm:$0xff]  ;;  %v606_v1 = vld [vmem:[%s14059_s16 + $0x18] sm:$0xff]  ;;  %v607_v5 = vld [vmem:[%s14059_s16 + $0x20] sm:$0xff] }
 0x24b   :  { %10890 = vmatpush3.bf16.msra.mxu0 %v13005_v9  ;;  %10918 = vmatpush3.bf16.msra.mxu1 %v10915_v24  ;;  %v609_v10 = vld [vmem:[%s14059_s16 + $0x30] sm:$0xff]  ;;  %v610_v11 = vld [vmem:[%s14059_s16 + $0x38] sm:$0xff]  ;;  %v8298_v15 = vld [vmem:[%s14059_s16 + $0x80] sm:$0xff] }
 0x24c   :  { %10892 = vmatprep.subr.bf16.mxu0 %v13011_v13  ;;  %10920 = vmatprep.subr.bf16.mxu1 %v10919_v30  ;;  %v10939_v14 = vpack.c.bf16 %v610_v11, %v609_v10  ;;  %v8300_v20 = vld [vmem:[%s14059_s16 + $0x90] sm:$0xff]  ;;  %v8301_v21 = vld [vmem:[%s14059_s16 + $0x98] sm:$0xff]  ;;  %v8302_v23 = vld [vmem:[%s14059_s16 + $0xa0] sm:$0xff] }
 0x24d   :  { %v10947_v22 = vpack.c.bf16 %v8301_v21, %v8300_v20  ;;  %v8303_v24 = vld [vmem:[%s14059_s16 + $0xa8] sm:$0xff]  ;;  %v8304_v26 = vld [vmem:[%s14059_s16 + $0xb0] sm:$0xff]  ;;  %v8314_v29 = vld [vmem:[%s14059_s16 + $0xc0] sm:$0xff] }
 0x24e   :  { %v10951_v25 = vpack.c.bf16 %v8303_v24, %v8302_v23  ;;  %v8316_v32 = vld [vmem:[%s14059_s16 + $0xd0] sm:$0xff]  ;;  %v8346_v61 = vld [vmem:[%s14059_s16 + $0x140] sm:$0xff]  ;;  %v8347_v62 = vld [vmem:[%s14059_s16 + $0x148] sm:$0xff] }
 0x24f   :  { %10894 = vmatpush3.bf16.msra.mxu0 %v13011_v13  ;;  %10922 = vmatpush3.bf16.msra.mxu1 %v10919_v30  ;;  %v8315_v30 = vld [vmem:[%s14059_s16 + $0xc8] sm:$0xff]  ;;  %v8352_v10 = vld [vmem:[%s14059_s16 + $0x170] sm:$0xff]  ;;  %v8353_v11 = vld [vmem:[%s14059_s16 + $0x178] sm:$0xff] }
 0x250   :  { %10896 = vmatprep.subr.bf16.mxu0 %v13017_v16  ;;  %10924 = vmatprep.subr.bf16.mxu1 %v10923_v36  ;;  %v10991_v31 = vpack.c.bf16 %v8315_v30, %v8314_v29  ;;  %v8364_v20 = vld [vmem:[%s14059_s16 + $0x190] sm:$0xff]  ;;  %v8365_v21 = vld [vmem:[%s14059_s16 + $0x198] sm:$0xff]  ;;  %v8366_v23 = vld [vmem:[%s14059_s16 + $0x1a0] sm:$0xff] }
 0x251   :  { %v8367_v24 = vld [vmem:[%s14059_s16 + $0x1a8] sm:$0xff]  ;;  %v8378_v29 = vld [vmem:[%s14059_s16 + $0x1c0] sm:$0xff] }
 0x252   :  { %v8379_v30 = vld [vmem:[%s14059_s16 + $0x1c8] sm:$0xff] }
 0x253   :  { %10898 = vmatpush3.bf16.msra.mxu0 %v13017_v16  ;;  %10926 = vmatpush3.bf16.msra.mxu1 %v10923_v36 }
 0x254   :  { %10900 = vmatprep.subr.bf16.mxu0 %v13029_v27  ;;  %10928 = vmatprep.subr.bf16.mxu1 %v10927_v63 }
 0x257   :  { %10902 = vmatpush3.bf16.msra.mxu0 %v13029_v27 }
 0x258   :  { %10904 = vmatprep.subr.bf16.mxu0 %v13037_v33 }
 0x25b   :  { %10906 = vmatpush3.bf16.msra.mxu0 %v13037_v33 }
 0x25c   :  { %10908 = vmatprep.subr.bf16.mxu0 %v13043_v37 }
 0x25f   :  { %10910 = vmatpush3.bf16.msra.mxu0 %v13043_v37 }
 0x260   :  { %10960 = vmatprep.subr.bf16.mxu0 %v12995_v4 }
 0x262   :  { %9499 = vmatmul.mubr.f32.vlgmr.msra.gmra.mrb[0].mxu0 %v491_v38  ;;  %v8319_v38 = vld [vmem:[%s14059_s16 + $0xe8] sm:$0xff] }
 0x263   :  { %9501 = vmatprep.mubr.f32.mxu0 %v492_v39  ;;  %10962 = vmatpush3.bf16.msra.mxu0 %v12995_v4 }
 0x264   :  { %10964 = vmatprep.subr.bf16.mxu0 %v12998_v6 }
 0x266   :  { %9502 = vmatmul.mubr.f32.gmra.mrb[2].mxu0 %v493_v40 }
 0x267   :  { %9504 = vmatprep.mubr.f32.mxu0 %v494_v41  ;;  %10966 = vmatpush3.bf16.msra.mxu0 %v12998_v6 }
 0x268   :  { %10968 = vmatprep.subr.bf16.mxu0 %v13005_v9 }
 0x26a   :  { %9505 = vmatmul.mubr.f32.gmra.mrb[4].mxu0 %v495_v42  ;;  %v8320_v42 = vld [vmem:[%s14059_s16 + $0xf0] sm:$0xff] }
 0x26b   :  { %9507 = vmatprep.mubr.f32.mxu0 %v496_v43  ;;  %10970 = vmatpush3.bf16.msra.mxu0 %v13005_v9  ;;  %v8321_v43 = vld [vmem:[%s14059_s16 + $0xf8] sm:$0xff] }
 0x26c   :  { %10972 = vmatprep.subr.bf16.mxu0 %v13011_v13 }
 0x26e   :  { %9508 = vmatmul.mubr.f32.gmra.mrb[6].mxu0 %v497_v44 }
 0x26f   :  { %10974 = vmatpush3.bf16.msra.mxu0 %v13011_v13  ;;  %9626 = vmatprep.mubr.f32.mxu0 %v978_v45  ;;  %v11003_v45 = vpack.c.bf16 %v8321_v43, %v8320_v42  ;;  %v8395_v42 = vld [vmem:[%s14059_s16 + $0x208] sm:$0xff] }
 0x270   :  { %10976 = vmatprep.subr.bf16.mxu0 %v13017_v16 }
 0x273   :  { %10978 = vmatpush3.bf16.msra.mxu0 %v13017_v16 }
 0x274   :  { %10980 = vmatprep.subr.bf16.mxu0 %v13029_v27 }
 0x277   :  { %10982 = vmatpush3.bf16.msra.mxu0 %v13029_v27 }
 0x278   :  { %10984 = vmatprep.subr.bf16.mxu0 %v13037_v33 }
 0x27b   :  { %10986 = vmatpush3.bf16.msra.mxu0 %v13037_v33 }
 0x27c   :  { %10988 = vmatprep.subr.bf16.mxu0 %v13043_v37 }
 0x27f   :  { %10990 = vmatpush3.bf16.msra.mxu0 %v13043_v37 }
 0x280   :  { %11040 = vmatprep.subr.bf16.mxu0 %v12995_v4 }
 0x282   :  { %9627 = vmatmul.mubr.f32.vlgmr.msra.gmra.mrb[8].mxu0 %v979_v46 }
 0x283   :  { %9629 = vmatprep.mubr.f32.mxu0 %v980_v47  ;;  %11042 = vmatpush3.bf16.msra.mxu0 %v12995_v4  ;;  %v10931_v4 = vpack.c.bf16 %v606_v1, %v605_v0  ;;  %v8330_v47 = vld [vmem:[%s14059_s16 + $0x100] sm:$0xff]  ;;  %v8348_v0 = vld [vmem:[%s14059_s16 + $0x150] sm:$0xff]  ;;  %v8349_v1 = vld [vmem:[%s14059_s16 + $0x158] sm:$0xff] }
 0x284   :  { %11044 = vmatprep.subr.bf16.mxu0 %v12998_v6 }
 0x286   :  { %9630 = vmatmul.mubr.f32.gmra.mrb[10].mxu0 %v981_v48  ;;  %v8331_v48 = vld [vmem:[%s14059_s16 + $0x108] sm:$0xff] }
 0x287   :  { %9632 = vmatprep.mubr.f32.mxu0 %v982_v49  ;;  %11046 = vmatpush3.bf16.msra.mxu0 %v12998_v6  ;;  %v608_v6 = vld [vmem:[%s14059_s16 + $0x28] sm:$0xff] }
 0x288   :  { %11048 = vmatprep.subr.bf16.mxu0 %v13005_v9 }
 0x28a   :  { %9633 = vmatmul.mubr.f32.gmra.mrb[12].mxu0 %v983_v50  ;;  %v11007_v50 = vpack.c.bf16 %v8331_v48, %v8330_v47  ;;  %v8398_v47 = vld [vmem:[%s14059_s16 + $0x220] sm:$0xff]  ;;  %v8399_v48 = vld [vmem:[%s14059_s16 + $0x228] sm:$0xff] }
 0x28b   :  { %9635 = vmatprep.mubr.f32.mxu0 %v984_v51  ;;  %11050 = vmatpush3.bf16.msra.mxu0 %v13005_v9  ;;  %v10935_v9 = vpack.c.bf16 %v608_v6, %v607_v5  ;;  %v8350_v5 = vld [vmem:[%s14059_s16 + $0x160] sm:$0xff]  ;;  %v8351_v6 = vld [vmem:[%s14059_s16 + $0x168] sm:$0xff] }
 0x28c   :  { %11052 = vmatprep.subr.bf16.mxu0 %v13011_v13 }
 0x28e   :  { %9636 = vmatmul.mubr.f32.gmra.mrb[14].mxu0 %v985_v52  ;;  %v8332_v52 = vld [vmem:[%s14059_s16 + $0x110] sm:$0xff] }
 0x28f   :  { %11054 = vmatpush3.bf16.msra.mxu0 %v13011_v13  ;;  %9754 = vmatprep.mubr.f32.mxu0 %v1482_v53  ;;  %v8333_v53 = vld [vmem:[%s14059_s16 + $0x118] sm:$0xff] }
 0x290   :  { %11056 = vmatprep.subr.bf16.mxu0 %v13017_v16 }
 0x293   :  { %11058 = vmatpush3.bf16.msra.mxu0 %v13017_v16  ;;  %v8299_v16 = vld [vmem:[%s14059_s16 + $0x88] sm:$0xff] }
 0x294   :  { %11060 = vmatprep.subr.bf16.mxu0 %v13029_v27  ;;  %v10943_v19 = vpack.c.bf16 %v8299_v16, %v8298_v15  ;;  %v8362_v15 = vld [vmem:[%s14059_s16 + $0x180] sm:$0xff]  ;;  %v8363_v16 = vld [vmem:[%s14059_s16 + $0x188] sm:$0xff] }
 0x297   :  { %11062 = vmatpush3.bf16.msra.mxu0 %v13029_v27  ;;  %v8305_v27 = vld [vmem:[%s14059_s16 + $0xb8] sm:$0xff] }
 0x298   :  { %11064 = vmatprep.subr.bf16.mxu0 %v13037_v33  ;;  %v10955_v28 = vpack.c.bf16 %v8305_v27, %v8304_v26  ;;  %v8368_v26 = vld [vmem:[%s14059_s16 + $0x1b0] sm:$0xff]  ;;  %v8369_v27 = vld [vmem:[%s14059_s16 + $0x1b8] sm:$0xff] }
 0x29b   :  { %11066 = vmatpush3.bf16.msra.mxu0 %v13037_v33  ;;  %v8317_v33 = vld [vmem:[%s14059_s16 + $0xd8] sm:$0xff] }
 0x29c   :  { %11068 = vmatprep.subr.bf16.mxu0 %v13043_v37  ;;  %v10995_v35 = vpack.c.bf16 %v8317_v33, %v8316_v32  ;;  %v8380_v32 = vld [vmem:[%s14059_s16 + $0x1d0] sm:$0xff]  ;;  %v8381_v33 = vld [vmem:[%s14059_s16 + $0x1d8] sm:$0xff] }
 0x29f   :  { %11070 = vmatpush3.bf16.msra.mxu0 %v13043_v37  ;;  %v8318_v37 = vld [vmem:[%s14059_s16 + $0xe0] sm:$0xff] }
 0x2a0   :  { %v10999_v40 = vpack.c.bf16 %v8319_v38, %v8318_v37  ;;  %v8384_v38 = vld [vmem:[%s14059_s16 + $0x1f0] sm:$0xff] }
 0x2a2   :  { %9755 = vmatmul.mubr.f32.vlgmr.msra.gmra.mrb[16].mxu0 %v1483_v54  ;;  %v11011_v54 = vpack.c.bf16 %v8333_v53, %v8332_v52  ;;  %v2008_v53 = vld [vmem:[#allocation11] sm:$0xff] }
 0x2a3   :  { %9757 = vmatprep.mubr.f32.mxu0 %v1484_v55  ;;  %v8334_v55 = vld [vmem:[%s14059_s16 + $0x120] sm:$0xff] }
 0x2a6   :  { %9758 = vmatmul.mubr.f32.gmra.mrb[18].mxu0 %v1485_v56  ;;  %v8335_v56 = vld [vmem:[%s14059_s16 + $0x128] sm:$0xff] }
 0x2a7   :  { %9760 = vmatprep.mubr.f32.mxu0 %v1486_v57  ;;  %v11015_v57 = vpack.c.bf16 %v8335_v56, %v8334_v55  ;;  %v8410_v55 = vld [vmem:[#allocation5] ss:$0 sm:$0xff] }
 0x2aa   :  { %9761 = vmatmul.mubr.f32.gmra.mrb[20].mxu0 %v1487_v58  ;;  %v8336_v58 = vld [vmem:[%s14059_s16 + $0x130] sm:$0xff] }
 0x2ab   :  { %9763 = vmatprep.mubr.f32.mxu0 %v1488_v59  ;;  %v8337_v59 = vld [vmem:[%s14059_s16 + $0x138] sm:$0xff] }
 0x2ae   :  { %9764 = vmatmul.mubr.f32.gmra.mrb[22].mxu0 %v1489_v60  ;;  %v11019_v60 = vpack.c.bf16 %v8337_v59, %v8336_v58 }
 0x2af   :  { %9866 = vmatprep.mubr.msk.f32.mxu0 %vm620_vm0, %v2008_v53  ;;  %v2114_v53 = vld [vmem:[%s14060_s13 + $0x28] sm:$0xff] }
 0x335   :  { %v13084_v2 = vpop.f32.mrb[0].mxu0 }
 0x336   :  { %v564_v3 = vpop.f32.mrb[1].mxu0 }
 0x337   :  { %9526 = vmatprep.mubr.msk.f32.mxu1 %vm620_vm0, %v564_v3 }
 0x338   :  { %9527 = vmatmul.mubr.msk.f32.vlgmr.msra.gmra.mrb[0].mxu1 %vm620_vm0, %v13084_v2 }
 0x339   :  { %v13091_v7 = vpop.f32.mrb[2].mxu0  ;;  %10930 = vmatpush3.bf16.msra.mxu1 %v10927_v63  ;;  %v11023_v63 = vpack.c.bf16 %v8347_v62, %v8346_v61 }
 0x33a   :  { %v574_v8 = vpop.f32.mrb[3].mxu0  ;;  %10932 = vmatprep.subr.bf16.mxu1 %v10931_v4 }
 0x33b   :  { %9529 = vmatprep.mubr.msk.f32.mxu1 %vm620_vm0, %v574_v8 }
 0x33c   :  { %9530 = vmatmul.mubr.msk.f32.gmra.mrb[2].mxu1 %vm620_vm0, %v13091_v7 }
 0x33d   :  { %v13098_v12 = vpop.f32.mrb[4].mxu0  ;;  %10934 = vmatpush3.bf16.msra.mxu1 %v10931_v4 }
 0x33e   :  { %v584_v13 = vpop.f32.mrb[5].mxu0  ;;  %10936 = vmatprep.subr.bf16.mxu1 %v10935_v9 }
 0x33f   :  { %9532 = vmatprep.mubr.msk.f32.mxu1 %vm620_vm0, %v584_v13 }
 0x340   :  { %9533 = vmatmul.mubr.msk.f32.gmra.mrb[4].mxu1 %vm620_vm0, %v13098_v12 }
 0x341   :  { %v13105_v17 = vpop.f32.mrb[6].mxu0  ;;  %10938 = vmatpush3.bf16.msra.mxu1 %v10935_v9 }
 0x342   :  { %v594_v18 = vpop.f32.mrb[7].mxu0  ;;  %10940 = vmatprep.subr.bf16.mxu1 %v10939_v14 }
 0x343   :  { %9535 = vmatprep.mubr.msk.f32.mxu1 %vm620_vm0, %v594_v18 }
 0x344   :  { %9536 = vmatmul.mubr.msk.f32.gmra.mrb[6].mxu1 %vm620_vm0, %v13105_v17 }
 0x345   :  { %10942 = vmatpush3.bf16.msra.mxu1 %v10939_v14  ;;  %9554 = vmatprep.mubr.msk.f32.mxu1 %vm620_vm0, %v564_v3 }
 0x346   :  { %10944 = vmatprep.subr.bf16.mxu1 %v10943_v19 }
 0x348   :  { %9555 = vmatmul.mubr.msk.f32.vlgmr.msra.gmra.mrb[0].mxu1 %vm620_vm0, %v13084_v2 }
 0x349   :  { %9557 = vmatprep.mubr.msk.f32.mxu1 %vm620_vm0, %v574_v8  ;;  %10946 = vmatpush3.bf16.msra.mxu1 %v10943_v19 }
 0x34a   :  { %10948 = vmatprep.subr.bf16.mxu1 %v10947_v22 }
 0x34c   :  { %9558 = vmatmul.mubr.msk.f32.gmra.mrb[2].mxu1 %vm620_vm0, %v13091_v7 }
 0x34d   :  { %9560 = vmatprep.mubr.msk.f32.mxu1 %vm620_vm0, %v584_v13  ;;  %10950 = vmatpush3.bf16.msra.mxu1 %v10947_v22  ;;  %v11075_v22 = vpack.c.bf16 %v8365_v21, %v8364_v20 }
 0x34e   :  { %10952 = vmatprep.subr.bf16.mxu1 %v10951_v25 }
 0x350   :  { %9561 = vmatmul.mubr.msk.f32.gmra.mrb[4].mxu1 %vm620_vm0, %v13098_v12 }
 0x351   :  { %9563 = vmatprep.mubr.msk.f32.mxu1 %vm620_vm0, %v594_v18  ;;  %10954 = vmatpush3.bf16.msra.mxu1 %v10951_v25  ;;  %v11079_v25 = vpack.c.bf16 %v8367_v24, %v8366_v23  ;;  %v2009_v23 = vld [vmem:[#allocation11 + $0x8] sm:$0xff] }
 0x352   :  { %10956 = vmatprep.subr.bf16.mxu1 %v10955_v28  ;;  %v2408_v24 = vld [vmem:[#allocation11 + $0x28] sm:$0xff] }
 0x354   :  { %9564 = vmatmul.mubr.msk.f32.gmra.mrb[6].mxu1 %vm620_vm0, %v13105_v17 }
 0x355   :  { %10958 = vmatpush3.bf16.msra.mxu1 %v10955_v28  ;;  %9582 = vmatprep.mubr.msk.f32.mxu1 %vm620_vm0, %v564_v3  ;;  %v13133_v34 = vpop.f32.mrb[8].mxu0  ;;  %v11027_v3 = vpack.c.bf16 %v8349_v1, %v8348_v0  ;;  %v11083_v28 = vpack.c.bf16 %v8369_v27, %v8368_v26  ;;  %v2409_v26 = vld [vmem:[#allocation11 + $0x30] sm:$0xff] }
 0x356   :  { %10992 = vmatprep.subr.bf16.mxu1 %v10991_v31  ;;  %v13135_v36 = vpop.f32.mrb[9].mxu0  ;;  %v8417_v27 = vld [vmem:[%s14060_s13 + $0x50] sm:$0xff] }
 0x358   :  { %9583 = vmatmul.mubr.msk.f32.vlgmr.msra.gmra.mrb[0].mxu1 %vm620_vm0, %v13084_v2 }
 0x359   :  { %9585 = vmatprep.mubr.msk.f32.mxu1 %vm620_vm0, %v574_v8  ;;  %10994 = vmatpush3.bf16.msra.mxu1 %v10991_v31  ;;  %v13142_v39 = vpop.f32.mrb[10].mxu0  ;;  %v11031_v8 = vpack.c.bf16 %v8351_v6, %v8350_v5  ;;  %v11087_v31 = vpack.c.bf16 %v8379_v30, %v8378_v29  ;;  %v2011_v29 = vld [vmem:[#allocation11 + $0x18] sm:$0xff] }
 0x35a   :  { %10996 = vmatprep.subr.bf16.mxu1 %v10995_v35  ;;  %v13144_v41 = vpop.f32.mrb[11].mxu0  ;;  %v2410_v30 = vld [vmem:[#allocation11 + $0x38] sm:$0xff] }
 0x35c   :  { %9586 = vmatmul.mubr.msk.f32.gmra.mrb[2].mxu1 %vm620_vm0, %v13091_v7 }
 0x35d   :  { %9588 = vmatprep.mubr.msk.f32.mxu1 %vm620_vm0, %v584_v13  ;;  %10998 = vmatpush3.bf16.msra.mxu1 %v10995_v35  ;;  %v13151_v44 = vpop.f32.mrb[12].mxu0  ;;  %v11035_v13 = vpack.c.bf16 %v8353_v11, %v8352_v10  ;;  %v8382_v35 = vld [vmem:[%s14059_s16 + $0x1e0] sm:$0xff] }
 0x35e   :  { %11000 = vmatprep.subr.bf16.mxu1 %v10999_v40  ;;  %v13153_v46 = vpop.f32.mrb[13].mxu0 }
 0x360   :  { %9589 = vmatmul.mubr.msk.f32.gmra.mrb[4].mxu1 %vm620_vm0, %v13098_v12 }
 0x361   :  { %9591 = vmatprep.mubr.msk.f32.mxu1 %vm620_vm0, %v594_v18  ;;  %11002 = vmatpush3.bf16.msra.mxu1 %v10999_v40  ;;  %v13160_v49 = vpop.f32.mrb[14].mxu0  ;;  %v11071_v18 = vpack.c.bf16 %v8363_v16, %v8362_v15 }
 0x362   :  { %11004 = vmatprep.subr.bf16.mxu1 %v11003_v45  ;;  %v13162_v51 = vpop.f32.mrb[15].mxu0 }
 0x364   :  { %9592 = vmatmul.mubr.msk.f32.gmra.mrb[6].mxu1 %vm620_vm0, %v13105_v17 }
 0x365   :  { %11006 = vmatpush3.bf16.msra.mxu1 %v11003_v45  ;;  %9654 = vmatprep.mubr.msk.f32.mxu1 %vm620_vm0, %v13135_v36  ;;  %v8397_v45 = vld [vmem:[%s14059_s16 + $0x218] sm:$0xff] }
 0x366   :  { %11008 = vmatprep.subr.bf16.mxu1 %v11007_v50 }
 0x368   :  { %9655 = vmatmul.mubr.msk.f32.vlgmr.msra.gmra.mrb[0].mxu1 %vm620_vm0, %v13133_v34 }
 0x369   :  { %11010 = vmatpush3.bf16.msra.mxu1 %v11007_v50  ;;  %9657 = vmatprep.mubr.msk.f32.mxu1 %vm620_vm0, %v13144_v41  ;;  %v8400_v50 = vld [vmem:[%s14059_s16 + $0x230] sm:$0xff] }
 0x36a   :  { %11012 = vmatprep.subr.bf16.mxu1 %v11011_v54 }
 0x36c   :  { %9658 = vmatmul.mubr.msk.f32.gmra.mrb[2].mxu1 %vm620_vm0, %v13142_v39 }
 0x36d   :  { %11014 = vmatpush3.bf16.msra.mxu1 %v11011_v54  ;;  %9660 = vmatprep.mubr.msk.f32.mxu1 %vm620_vm0, %v13153_v46  ;;  %v2407_v54 = vld [vmem:[#allocation11 + $0x20] sm:$0xff] }
 0x36e   :  { %11016 = vmatprep.subr.bf16.mxu1 %v11015_v57 }
 0x370   :  { %9661 = vmatmul.mubr.msk.f32.gmra.mrb[4].mxu1 %vm620_vm0, %v13151_v44 }
 0x371   :  { %11018 = vmatpush3.bf16.msra.mxu1 %v11015_v57  ;;  %9663 = vmatprep.mubr.msk.f32.mxu1 %vm620_vm0, %v13162_v51 }
 0x372   :  { %11020 = vmatprep.subr.bf16.mxu1 %v11019_v60 }
 0x374   :  { %9664 = vmatmul.mubr.msk.f32.gmra.mrb[6].mxu1 %vm620_vm0, %v13160_v49 }
 0x375   :  { %11022 = vmatpush3.bf16.msra.mxu1 %v11019_v60  ;;  %9682 = vmatprep.mubr.msk.f32.mxu1 %vm620_vm0, %v13135_v36  ;;  %v13194_v2 = vpop.f32.mrb[16].mxu0 }
 0x376   :  { %11024 = vmatprep.subr.bf16.mxu1 %v11023_v63  ;;  %v13196_v4 = vpop.f32.mrb[17].mxu0 }
 0x378   :  { %9683 = vmatmul.mubr.msk.f32.vlgmr.msra.gmra.mrb[0].mxu1 %vm620_vm0, %v13133_v34 }
 0x379   :  { %9685 = vmatprep.mubr.msk.f32.mxu1 %vm620_vm0, %v13144_v41  ;;  %11026 = vmatpush3.bf16.msra.mxu1 %v11023_v63  ;;  %v13204_v7 = vpop.f32.mrb[18].mxu0 }
 0x37a   :  { %11028 = vmatprep.subr.bf16.mxu1 %v11027_v3  ;;  %v13206_v9 = vpop.f32.mrb[19].mxu0 }
 0x37c   :  { %9686 = vmatmul.mubr.msk.f32.gmra.mrb[2].mxu1 %vm620_vm0, %v13142_v39 }
 0x37d   :  { %9688 = vmatprep.mubr.msk.f32.mxu1 %vm620_vm0, %v13153_v46  ;;  %11030 = vmatpush3.bf16.msra.mxu1 %v11027_v3  ;;  %v13214_v12 = vpop.f32.mrb[20].mxu0 }
 0x37e   :  { %11032 = vmatprep.subr.bf16.mxu1 %v11031_v8  ;;  %v13216_v14 = vpop.f32.mrb[21].mxu0 }
 0x380   :  { %9689 = vmatmul.mubr.msk.f32.gmra.mrb[4].mxu1 %vm620_vm0, %v13151_v44 }
 0x381   :  { %9691 = vmatprep.mubr.msk.f32.mxu1 %vm620_vm0, %v13162_v51  ;;  %11034 = vmatpush3.bf16.msra.mxu1 %v11031_v8  ;;  %v13224_v17 = vpop.f32.mrb[22].mxu0 }
 0x382   :  { %11036 = vmatprep.subr.bf16.mxu1 %v11035_v13  ;;  %v13226_v19 = vpop.f32.mrb[23].mxu0 }
 0x384   :  { %9692 = vmatmul.mubr.msk.f32.gmra.mrb[6].mxu1 %vm620_vm0, %v13160_v49 }
 0x385   :  { %11038 = vmatpush3.bf16.msra.mxu1 %v11035_v13  ;;  %9710 = vmatprep.mubr.msk.f32.mxu1 %vm620_vm0, %v13135_v36  ;;  %v8383_v36 = vld [vmem:[%s14059_s16 + $0x1e8] sm:$0xff] }
 0x386   :  { %11072 = vmatprep.subr.bf16.mxu1 %v11071_v18  ;;  %v11095_v37 = vpack.c.bf16 %v8383_v36, %v8382_v35  ;;  %v8421_v36 = vld [vmem:[%s14060_s13 + $0x70] sm:$0xff] }
 0x388   :  { %9711 = vmatmul.mubr.msk.f32.vlgmr.msra.gmra.mrb[0].mxu1 %vm620_vm0, %v13133_v34  ;;  %v11091_v34 = vpack.c.bf16 %v8381_v33, %v8380_v32  ;;  %v8420_v32 = vld [vmem:[%s14060_s13 + $0x68] sm:$0xff] }
 0x389   :  { %9713 = vmatprep.mubr.msk.f32.mxu1 %vm620_vm0, %v13144_v41  ;;  %11074 = vmatpush3.bf16.msra.mxu1 %v11071_v18  ;;  %v8394_v41 = vld [vmem:[%s14059_s16 + $0x200] sm:$0xff] }
 0x38a   :  { %11076 = vmatprep.subr.bf16.mxu1 %v11075_v22  ;;  %v11103_v43 = vpack.c.bf16 %v8395_v42, %v8394_v41  ;;  %v8415_v18 = vld [vmem:[%s14060_s13 + $0x40] sm:$0xff] }
 0x38b   :  { %v2815_v33 = vld [vmem:[#allocation11 + $0x40] sm:$0xff]  ;;  %v2818_v41 = vld [vmem:[#allocation11 + $0x58] sm:$0xff] }
 0x38c   :  { %9714 = vmatmul.mubr.msk.f32.gmra.mrb[2].mxu1 %vm620_vm0, %v13142_v39  ;;  %v8385_v39 = vld [vmem:[%s14059_s16 + $0x1f8] sm:$0xff]  ;;  %v2109_v42 = vld [vmem:[%s14060_s13] sm:$0xff] }
 0x38d   :  { %9716 = vmatprep.mubr.msk.f32.mxu1 %vm620_vm0, %v13153_v46  ;;  %11078 = vmatpush3.bf16.msra.mxu1 %v11075_v22  ;;  %v11099_v40 = vpack.c.bf16 %v8385_v39, %v8384_v38  ;;  %v2816_v39 = vld [vmem:[#allocation11 + $0x48] sm:$0xff] }
 0x38e   :  { %11080 = vmatprep.subr.bf16.mxu1 %v11079_v25 }
 0x390   :  { %9717 = vmatmul.mubr.msk.f32.gmra.mrb[4].mxu1 %vm620_vm0, %v13151_v44  ;;  %v8396_v44 = vld [vmem:[%s14059_s16 + $0x210] sm:$0xff] }
 0x391   :  { %9719 = vmatprep.mubr.msk.f32.mxu1 %vm620_vm0, %v13162_v51  ;;  %11082 = vmatpush3.bf16.msra.mxu1 %v11079_v25  ;;  %v11107_v46 = vpack.c.bf16 %v8397_v45, %v8396_v44  ;;  %v8401_v51 = vld [vmem:[%s14059_s16 + $0x238] sm:$0xff]  ;;  %v2111_v45 = vld [vmem:[%s14060_s13 + $0x10] sm:$0xff] }
 0x392   :  { %11084 = vmatprep.subr.bf16.mxu1 %v11083_v28  ;;  %v11115_v52 = vpack.c.bf16 %v8401_v51, %v8400_v50  ;;  %v2010_v25 = vld [vmem:[#allocation11 + $0x10] sm:$0xff] }
 0x394   :  { %9720 = vmatmul.mubr.msk.f32.gmra.mrb[6].mxu1 %vm620_vm0, %v13160_v49  ;;  %v11111_v49 = vpack.c.bf16 %v8399_v48, %v8398_v47 }
 0x395   :  { %11086 = vmatpush3.bf16.msra.mxu1 %v11083_v28  ;;  %9782 = vmatprep.mubr.msk.f32.mxu1 %vm620_vm0, %v13196_v4  ;;  %v8418_v28 = vld [vmem:[%s14060_s13 + $0x58] sm:$0xff] }
 0x396   :  { %11088 = vmatprep.subr.bf16.mxu1 %v11087_v31 }
 0x398   :  { %9783 = vmatmul.mubr.msk.f32.vlgmr.msra.gmra.mrb[0].mxu1 %vm620_vm0, %v13194_v2 }
 0x399   :  { %11090 = vmatpush3.bf16.msra.mxu1 %v11087_v31  ;;  %9785 = vmatprep.mubr.msk.f32.mxu1 %vm620_vm0, %v13206_v9  ;;  %v8419_v31 = vld [vmem:[%s14060_s13 + $0x60] sm:$0xff] }
 0x39a   :  { %11092 = vmatprep.subr.bf16.mxu1 %v11091_v34  ;;  %v11143_v35 = vpack.c.bf16 %v8420_v32, %v8419_v31  ;;  %v8463_v32 = vld [vmem:[%s14060_s13 + $0x120] sm:$0xff] }
 0x39c   :  { %9786 = vmatmul.mubr.msk.f32.gmra.mrb[2].mxu1 %vm620_vm0, %v13204_v7 }
 0x39d   :  { %11094 = vmatpush3.bf16.msra.mxu1 %v11091_v34  ;;  %9788 = vmatprep.mubr.msk.f32.mxu1 %vm620_vm0, %v13216_v14  ;;  %v11139_v34 = vpack.c.bf16 %v8418_v28, %v8417_v27  ;;  %v8460_v27 = vld [vmem:[%s14060_s13 + $0x108] sm:$0xff] }
 0x39e   :  { %11096 = vmatprep.subr.bf16.mxu1 %v11095_v37 }
 0x3a0   :  { %9789 = vmatmul.mubr.msk.f32.gmra.mrb[4].mxu1 %vm620_vm0, %v13214_v12 }
 0x3a1   :  { %11098 = vmatpush3.bf16.msra.mxu1 %v11095_v37  ;;  %9791 = vmatprep.mubr.msk.f32.mxu1 %vm620_vm0, %v13226_v19  ;;  %v8422_v37 = vld [vmem:[%s14060_s13 + $0x78] sm:$0xff] }
 0x3a2   :  { %11100 = vmatprep.subr.bf16.mxu1 %v11099_v40  ;;  %v11147_v38 = vpack.c.bf16 %v8422_v37, %v8421_v36  ;;  %v8466_v36 = vld [vmem:[%s14060_s13 + $0x138] sm:$0xff] }
 0x3a4   :  { %9792 = vmatmul.mubr.msk.f32.gmra.mrb[6].mxu1 %vm620_vm0, %v13224_v17 }
 0x3a5   :  { %11102 = vmatpush3.bf16.msra.mxu1 %v11099_v40  ;;  %9810 = vmatprep.mubr.msk.f32.mxu1 %vm620_vm0, %v13196_v4  ;;  %v2817_v40 = vld [vmem:[#allocation11 + $0x50] sm:$0xff] }
 0x3a6   :  { %11104 = vmatprep.subr.bf16.mxu1 %v11103_v43 }
 0x3a8   :  { %9811 = vmatmul.mubr.msk.f32.vlgmr.msra.gmra.mrb[0].mxu1 %vm620_vm0, %v13194_v2 }
 0x3a9   :  { %9813 = vmatprep.mubr.msk.f32.mxu1 %vm620_vm0, %v13206_v9  ;;  %11106 = vmatpush3.bf16.msra.mxu1 %v11103_v43  ;;  %v2110_v43 = vld [vmem:[%s14060_s13 + $0x8] sm:$0xff] }
 0x3aa   :  { %11108 = vmatprep.subr.bf16.mxu1 %v11107_v46  ;;  %v11151_v44 = vpack.c.bf16 %v2110_v43, %v2109_v42  ;;  %v8474_v42 = vld [vmem:[%s14060_s13 + $0x158] sm:$0xff] }
 0x3ac   :  { %9814 = vmatmul.mubr.msk.f32.gmra.mrb[2].mxu1 %vm620_vm0, %v13204_v7 }
 0x3ad   :  { %9816 = vmatprep.mubr.msk.f32.mxu1 %vm620_vm0, %v13216_v14  ;;  %11110 = vmatpush3.bf16.msra.mxu1 %v11107_v46  ;;  %v2112_v46 = vld [vmem:[%s14060_s13 + $0x18] sm:$0xff] }
 0x3ae   :  { %11112 = vmatprep.subr.bf16.mxu1 %v11111_v49  ;;  %v11155_v50 = vpack.c.bf16 %v2112_v46, %v2111_v45  ;;  %v8476_v45 = vld [vmem:[%s14060_s13 + $0x168] sm:$0xff] }
 0x3b0   :  { %9817 = vmatmul.mubr.msk.f32.gmra.mrb[4].mxu1 %vm620_vm0, %v13214_v12 }
 0x3b1   :  { %9819 = vmatprep.mubr.msk.f32.mxu1 %vm620_vm0, %v13226_v19  ;;  %11114 = vmatpush3.bf16.msra.mxu1 %v11111_v49 }
 0x3b2   :  { %11116 = vmatprep.subr.bf16.mxu1 %v11115_v52 }
 0x3b4   :  { %9820 = vmatmul.mubr.msk.f32.gmra.mrb[6].mxu1 %vm620_vm0, %v13224_v17 }
 0x3b5   :  { %11118 = vmatpush3.bf16.msra.mxu1 %v11115_v52  ;;  %9838 = vmatprep.mubr.msk.f32.mxu1 %vm620_vm0, %v13196_v4  ;;  %v2113_v52 = vld [vmem:[%s14060_s13 + $0x20] sm:$0xff] }
 0x3b8   :  { %9839 = vmatmul.mubr.msk.f32.vlgmr.msra.gmra.mrb[0].mxu1 %vm620_vm0, %v13194_v2 }
 0x3b9   :  { %9841 = vmatprep.mubr.msk.f32.mxu1 %vm620_vm0, %v13206_v9 }
 0x3bc   :  { %9842 = vmatmul.mubr.msk.f32.gmra.mrb[2].mxu1 %vm620_vm0, %v13204_v7 }
 0x3bd   :  { %9844 = vmatprep.mubr.msk.f32.mxu1 %vm620_vm0, %v13216_v14 }
 0x3c0   :  { %9845 = vmatmul.mubr.msk.f32.gmra.mrb[4].mxu1 %vm620_vm0, %v13214_v12 }
 0x3c1   :  { %9847 = vmatprep.mubr.msk.f32.mxu1 %vm620_vm0, %v13226_v19  ;;  %v8416_v19 = vld [vmem:[%s14060_s13 + $0x48] sm:$0xff] }
 0x3c2   :  { %v11135_v22 = vpack.c.bf16 %v8416_v19, %v8415_v18  ;;  %v8450_v18 = vld [vmem:[%s14060_s13 + $0xd8] sm:$0xff] }
 0x3c4   :  { %9848 = vmatmul.mubr.msk.f32.gmra.mrb[6].mxu1 %vm620_vm0, %v13224_v17 }
 0x3c5   :  { %9954 = vmatprep.mubr.msk.f32.mxu1 %vm620_vm0, %v2407_v54 }
 0x48b   :  { %v9840_v56 = vpop.f32.mrb[0].mxu1 }
 0x48c   :  { %v1993_v57 = vadd.f32 %v9840_v56, %v8410_v55  ;;  %v1938_v58 = vpop.f32.mrb[1].mxu1 }
 0x48d   :  { %v1992_v59 = vadd.f32 %v8410_v55, %v1938_v58 }
 0x48e   :  { %v2001_v60 = vmax.f32 %v1993_v57, 0.0  ;;  %v11159_v57 = vpack.c.bf16 %v2114_v53, %v2113_v52  ;;  %v8487_v52 = vld [vmem:[%s14060_s13 + $0x180] sm:$0xff]  ;;  %v8488_v53 = vld [vmem:[%s14060_s13 + $0x188] sm:$0xff] }
 0x48f   :  { %v2000_v61 = vmax.f32 %v1992_v59, 0.0  ;;  %v9843_v62 = vpop.f32.mrb[2].mxu1  ;;  %v2115_v59 = vld [vmem:[%s14060_s13 + $0x30] sm:$0xff] }
 0x490   :  { %v1995_v63 = vadd.f32 %v9843_v62, %v8410_v55  ;;  %v1948_v0 = vpop.f32.mrb[3].mxu1  ;;  %v8431_v62 = vld [vmem:[%s14060_s13 + $0x80] sm:$0xff] }
 0x491   :  { %v11119_v1 = vpack.c.bf16 %v2001_v60, %v2000_v61  ;;  %v1994_v2 = vadd.f32 %v8410_v55, %v1948_v0  ;;  %v2116_v60 = vld [vmem:[%s14060_s13 + $0x38] sm:$0xff] }
 0x492   :  { %v2003_v3 = vmax.f32 %v1995_v63, 0.0  ;;  %v11163_v61 = vpack.c.bf16 %v2116_v60, %v2115_v59  ;;  %v8432_v63 = vld [vmem:[%s14060_s13 + $0x88] sm:$0xff]  ;;  %v8491_v60 = vld [vmem:[%s14060_s13 + $0x1a0] sm:$0xff] }
 0x493   :  { %v2002_v4 = vmax.f32 %v1994_v2, 0.0  ;;  %v9846_v5 = vpop.f32.mrb[4].mxu1  ;;  %11120 = vmatprep.subr.bf16.mxu0 %v11119_v1  ;;  %11184 = vmatprep.subr.bf16.mxu1 %v11119_v1  ;;  %v11167_v0 = vpack.c.bf16 %v8432_v63, %v8431_v62  ;;  %v8434_v2 = vld [vmem:[%s14060_s13 + $0x98] sm:$0xff]  ;;  %v8493_v62 = vld [vmem:[%s14060_s13 + $0x1b0] sm:$0xff] }
 0x494   :  { %v1997_v6 = vadd.f32 %v9846_v5, %v8410_v55  ;;  %v1958_v7 = vpop.f32.mrb[5].mxu1  ;;  %11122 = vmatpush3.bf16.msra.mxu0 %v11119_v1  ;;  %11186 = vmatpush3.bf16.msra.mxu1 %v11119_v1  ;;  %v8494_v63 = vld [vmem:[%s14060_s13 + $0x1b8] sm:$0xff] }
 0x495   :  { %v11123_v8 = vpack.c.bf16 %v2003_v3, %v2002_v4  ;;  %v1996_v9 = vadd.f32 %v8410_v55, %v1958_v7  ;;  %v8436_v7 = vld [vmem:[%s14060_s13 + $0xa8] sm:$0xff] }
 0x496   :  { %v2005_v10 = vmax.f32 %v1997_v6, 0.0  ;;  %v8435_v6 = vld [vmem:[%s14060_s13 + $0xa0] sm:$0xff] }
 0x497   :  { %v2004_v11 = vmax.f32 %v1996_v9, 0.0  ;;  %v9849_v12 = vpop.f32.mrb[6].mxu1  ;;  %11124 = vmatprep.subr.bf16.mxu0 %v11123_v8  ;;  %11188 = vmatprep.subr.bf16.mxu1 %v11123_v8  ;;  %v11175_v9 = vpack.c.bf16 %v8436_v7, %v8435_v6  ;;  %v8503_v6 = vld [vmem:[%s14060_s13 + $0x1e0] sm:$0xff]  ;;  %v8504_v7 = vld [vmem:[%s14060_s13 + $0x1e8] sm:$0xff] }
 0x498   :  { %v1999_v13 = vadd.f32 %v9849_v12, %v8410_v55  ;;  %v1968_v14 = vpop.f32.mrb[7].mxu1  ;;  %11126 = vmatpush3.bf16.msra.mxu0 %v11123_v8  ;;  %11190 = vmatpush3.bf16.msra.mxu1 %v11123_v8  ;;  %v8438_v12 = vld [vmem:[%s14060_s13 + $0xb8] sm:$0xff] }
 0x499   :  { %v11127_v15 = vpack.c.bf16 %v2005_v10, %v2004_v11  ;;  %v1998_v16 = vadd.f32 %v8410_v55, %v1968_v14  ;;  %v8437_v11 = vld [vmem:[%s14060_s13 + $0xb0] sm:$0xff]  ;;  %v8447_v14 = vld [vmem:[%s14060_s13 + $0xc0] sm:$0xff] }
 0x49a   :  { %v2007_v17 = vmax.f32 %v1999_v13, 0.0  ;;  %v11179_v13 = vpack.c.bf16 %v8438_v12, %v8437_v11  ;;  %v8505_v11 = vld [vmem:[%s14060_s13 + $0x1f0] sm:$0xff]  ;;  %v8506_v12 = vld [vmem:[%s14060_s13 + $0x1f8] sm:$0xff] }
 0x49b   :  { %v2006_v20 = vmax.f32 %v1998_v16, 0.0  ;;  %11128 = vmatprep.subr.bf16.mxu0 %v11127_v15  ;;  %11192 = vmatprep.subr.bf16.mxu1 %v11127_v15 }
 0x49c   :  { %11130 = vmatpush3.bf16.msra.mxu0 %v11127_v15  ;;  %11194 = vmatpush3.bf16.msra.mxu1 %v11127_v15 }
 0x49d   :  { %v11131_v21 = vpack.c.bf16 %v2007_v17, %v2006_v20  ;;  %v8449_v17 = vld [vmem:[%s14060_s13 + $0xd0] sm:$0xff]  ;;  %v8451_v20 = vld [vmem:[%s14060_s13 + $0xe0] sm:$0xff] }
 0x49e   :  { %v11203_v19 = vpack.c.bf16 %v8450_v18, %v8449_v17  ;;  %v8513_v17 = vld [vmem:[%s14060_s13 + $0x210] sm:$0xff]  ;;  %v8514_v18 = vld [vmem:[%s14060_s13 + $0x218] sm:$0xff] }
 0x49f   :  { %11132 = vmatprep.subr.bf16.mxu0 %v11131_v21  ;;  %11196 = vmatprep.subr.bf16.mxu1 %v11131_v21 }
 0x4a0   :  { %11134 = vmatpush3.bf16.msra.mxu0 %v11131_v21  ;;  %11198 = vmatpush3.bf16.msra.mxu1 %v11131_v21 }
 0x4a1   :  { %11248 = vmatprep.subr.bf16.mxu1 %v11119_v1  ;;  %11136 = vmatprep.subr.bf16.mxu0 %v11135_v22 }
 0x4a3   :  { %9867 = vmatmul.mubr.msk.f32.vlgmr.msra.gmra.mrb[24].mxu0 %vm620_vm0, %v2009_v23  ;;  %9955 = vmatmul.mubr.msk.f32.vlgmr.msra.gmra.mrb[8].mxu1 %vm620_vm0, %v2408_v24  ;;  %v8453_v23 = vld [vmem:[%s14060_s13 + $0xf0] sm:$0xff]  ;;  %v8454_v24 = vld [vmem:[%s14060_s13 + $0xf8] sm:$0xff] }
 0x4a4   :  { %11250 = vmatpush3.bf16.msra.mxu1 %v11119_v1  ;;  %9869 = vmatprep.mubr.msk.f32.mxu0 %vm620_vm0, %v2010_v25  ;;  %v8433_v1 = vld [vmem:[%s14060_s13 + $0x90] sm:$0xff]  ;;  %v11211_v25 = vpack.c.bf16 %v8454_v24, %v8453_v23  ;;  %v8518_v24 = vld [vmem:[%s14060_s13 + $0x238] sm:$0xff] }
 0x4a5   :  { %11252 = vmatprep.subr.bf16.mxu1 %v11123_v8  ;;  %9957 = vmatprep.mubr.msk.f32.mxu1 %vm620_vm0, %v2409_v26  ;;  %v11171_v4 = vpack.c.bf16 %v8434_v2, %v8433_v1  ;;  %v8459_v26 = vld [vmem:[%s14060_s13 + $0x100] sm:$0xff]  ;;  %v8501_v2 = vld [vmem:[%s14060_s13 + $0x1d0] sm:$0xff] }
 0x4a6   :  { %11138 = vmatpush3.bf16.msra.mxu0 %v11135_v22  ;;  %v11215_v28 = vpack.c.bf16 %v8460_v27, %v8459_v26  ;;  %v8517_v23 = vld [vmem:[%s14060_s13 + $0x230] sm:$0xff] }
 0x4a7   :  { %9870 = vmatmul.mubr.msk.f32.gmra.mrb[26].mxu0 %vm620_vm0, %v2011_v29  ;;  %9958 = vmatmul.mubr.msk.f32.gmra.mrb[10].mxu1 %vm620_vm0, %v2410_v30  ;;  %v8461_v29 = vld [vmem:[%s14060_s13 + $0x110] sm:$0xff]  ;;  %v8462_v30 = vld [vmem:[%s14060_s13 + $0x118] sm:$0xff] }
 0x4a8   :  { %11254 = vmatpush3.bf16.msra.mxu1 %v11123_v8  ;;  %10042 = vmatprep.mubr.msk.f32.mxu1 %vm620_vm0, %v2815_v33  ;;  %v11219_v31 = vpack.c.bf16 %v8462_v30, %v8461_v29  ;;  %v8464_v33 = vld [vmem:[%s14060_s13 + $0x128] sm:$0xff]  ;;  %v3268_v27 = vld [vmem:[#allocation17 + $0x8] sm:$0xff]  ;;  %v12630_v29 = vmov 0.0|0.0  }
 0x4a9   :  { %11256 = vmatprep.subr.bf16.mxu1 %v11127_v15  ;;  %11140 = vmatprep.subr.bf16.mxu0 %v11139_v34  ;;  %v3267_v26 = vld [vmem:[#allocation17] sm:$0xff]  ;;  %v3270_v30 = vld [vmem:[#allocation17 + $0x18] sm:$0xff] }
 0x4aa   :  { %11142 = vmatpush3.bf16.msra.mxu0 %v11139_v34  ;;  %v11223_v34 = vpack.c.bf16 %v8464_v33, %v8463_v32  ;;  %v3273_v32 = vld [vmem:[#allocation17 + $0x30] sm:$0xff]  ;;  %v3274_v33 = vld [vmem:[#allocation17 + $0x38] sm:$0xff] }
 0x4ab   :  { %11144 = vmatprep.subr.bf16.mxu0 %v11143_v35 }
 0x4ac   :  { %11258 = vmatpush3.bf16.msra.mxu1 %v11127_v15  ;;  %v8448_v15 = vld [vmem:[%s14060_s13 + $0xc8] sm:$0xff] }
 0x4ad   :  { %11260 = vmatprep.subr.bf16.mxu1 %v11131_v21  ;;  %v11199_v16 = vpack.c.bf16 %v8448_v15, %v8447_v14  ;;  %v8511_v14 = vld [vmem:[%s14060_s13 + $0x200] sm:$0xff]  ;;  %v8512_v15 = vld [vmem:[%s14060_s13 + $0x208] sm:$0xff] }
 0x4ae   :  { %11146 = vmatpush3.bf16.msra.mxu0 %v11143_v35  ;;  %v8465_v35 = vld [vmem:[%s14060_s13 + $0x130] sm:$0xff] }
 0x4af   :  { %11148 = vmatprep.subr.bf16.mxu0 %v11147_v38  ;;  %v11227_v37 = vpack.c.bf16 %v8466_v36, %v8465_v35  ;;  %v12632_v35 = vmov 0.0   ;;  %v8523_v36 = vld [vmem:[#allocation13] ss:$0 sm:$0xff] }
 0x4b0   :  { %11262 = vmatpush3.bf16.msra.mxu1 %v11131_v21  ;;  %v8452_v21 = vld [vmem:[%s14060_s13 + $0xe8] sm:$0xff] }
 0x4b1   :  { %v11207_v22 = vpack.c.bf16 %v8452_v21, %v8451_v20  ;;  %v8515_v20 = vld [vmem:[%s14060_s13 + $0x220] sm:$0xff]  ;;  %v8516_v21 = vld [vmem:[%s14060_s13 + $0x228] sm:$0xff]  ;;  %11311 = vmatprep.subr.bf16.mxu1 %v12630_v29 }
 0x4b2   :  { %11150 = vmatpush3.bf16.msra.mxu0 %v11147_v38  ;;  %v8471_v38 = vld [vmem:[%s14060_s13 + $0x140] sm:$0xff] }
 0x4b3   :  { %10043 = vmatmul.mubr.msk.f32.vlgmr.msra.gmra.mrb[12].mxu1 %vm620_vm0, %v2816_v39  ;;  %11152 = vmatprep.subr.bf16.mxu0 %v11151_v44  ;;  %v8472_v39 = vld [vmem:[%s14060_s13 + $0x148] sm:$0xff] }
 0x4b4   :  { %10045 = vmatprep.mubr.msk.f32.mxu1 %vm620_vm0, %v2817_v40  ;;  %v11231_v40 = vpack.c.bf16 %v8472_v39, %v8471_v38 }
 0x4b7   :  { %10046 = vmatmul.mubr.msk.f32.gmra.mrb[14].mxu1 %vm620_vm0, %v2818_v41  ;;  %v8473_v41 = vld [vmem:[%s14060_s13 + $0x150] sm:$0xff] }
 0x4b8   :  { %v11235_v43 = vpack.c.bf16 %v8474_v42, %v8473_v41  ;;  %10130 = vmatprep.mubr.msk.f32.mxu1 %vm12631_vm1, %v12632_v35 }
 0x576   :  { %v13340_v47 = vpop.f32.mrb[24].mxu0  ;;  %v13342_v48 = vpop.f32.mrb[8].mxu1 }
 0x577   :  { %v2090_v49 = vpop.f32.mrb[25].mxu0  ;;  %v13344_v51 = vpop.f32.mrb[9].mxu1 }
 0x578   :  { %9888 = vmatprep.mubr.msk.f32.mxu0 %vm620_vm0, %v2090_v49 }
 0x579   :  { %9889 = vmatmul.mubr.msk.f32.vlgmr.msra.gmra.mrb[28].mxu0 %vm620_vm0, %v13340_v47 }
 0x57a   :  { %11154 = vmatpush3.bf16.msra.mxu0 %v11151_v44  ;;  %v9871_v54 = vpop.f32.mrb[26].mxu0  ;;  %v13351_v55 = vpop.f32.mrb[10].mxu1  ;;  %v8475_v44 = vld [vmem:[%s14060_s13 + $0x160] sm:$0xff] }
 0x57b   :  { %v2100_v56 = vpop.f32.mrb[27].mxu0  ;;  %11156 = vmatprep.subr.bf16.mxu0 %v11155_v50  ;;  %v13353_v58 = vpop.f32.mrb[11].mxu1  ;;  %v11239_v46 = vpack.c.bf16 %v8476_v45, %v8475_v44 }
 0x57c   :  { %9891 = vmatprep.mubr.msk.f32.mxu0 %vm620_vm0, %v2100_v56 }
 0x57d   :  { %9892 = vmatmul.mubr.msk.f32.gmra.mrb[30].mxu0 %vm620_vm0, %v9871_v54 }
 0x57e   :  { %11158 = vmatpush3.bf16.msra.mxu0 %v11155_v50  ;;  %9910 = vmatprep.mubr.msk.f32.mxu0 %vm620_vm0, %v2090_v49 }
 0x57f   :  { %11160 = vmatprep.subr.bf16.mxu0 %v11159_v57 }
 0x582   :  { %11162 = vmatpush3.bf16.msra.mxu0 %v11159_v57  ;;  %v8490_v57 = vld [vmem:[%s14060_s13 + $0x198] sm:$0xff] }
 0x583   :  { %11164 = vmatprep.subr.bf16.mxu0 %v11163_v61 }
 0x586   :  { %11166 = vmatpush3.bf16.msra.mxu0 %v11163_v61  ;;  %v13364_v3 = vpop.f32.mrb[12].mxu1  ;;  %v8492_v61 = vld [vmem:[%s14060_s13 + $0x1a8] sm:$0xff] }
 0x587   :  { %11168 = vmatprep.subr.bf16.mxu0 %v11167_v0  ;;  %v13366_v5 = vpop.f32.mrb[13].mxu1 }
 0x589   :  { %9911 = vmatmul.mubr.msk.f32.vlgmr.msra.gmra.mrb[28].mxu0 %vm620_vm0, %v13340_v47 }
 0x58a   :  { %9913 = vmatprep.mubr.msk.f32.mxu0 %vm620_vm0, %v2100_v56  ;;  %11170 = vmatpush3.bf16.msra.mxu0 %v11167_v0  ;;  %v13373_v8 = vpop.f32.mrb[14].mxu1  ;;  %v8499_v0 = vld [vmem:[%s14060_s13 + $0x1c0] sm:$0xff] }
 0x58b   :  { %11172 = vmatprep.subr.bf16.mxu0 %v11171_v4  ;;  %v13375_v10 = vpop.f32.mrb[15].mxu1 }
 0x58d   :  { %9914 = vmatmul.mubr.msk.f32.gmra.mrb[30].mxu0 %vm620_vm0, %v9871_v54 }
 0x58e   :  { %11174 = vmatpush3.bf16.msra.mxu0 %v11171_v4  ;;  %9932 = vmatprep.mubr.msk.f32.mxu0 %vm620_vm0, %v2090_v49  ;;  %v8478_v49 = vld [vmem:[%s14060_s13 + $0x178] sm:$0xff] }
 0x58f   :  { %11176 = vmatprep.subr.bf16.mxu0 %v11175_v9  ;;  %v8502_v4 = vld [vmem:[%s14060_s13 + $0x1d8] sm:$0xff] }
 0x592   :  { %11178 = vmatpush3.bf16.msra.mxu0 %v11175_v9  ;;  %v11287_v9 = vpack.c.bf16 %v8504_v7, %v8503_v6 }
 0x593   :  { %11180 = vmatprep.subr.bf16.mxu0 %v11179_v13 }
 0x596   :  { %11182 = vmatpush3.bf16.msra.mxu0 %v11179_v13  ;;  %v11291_v13 = vpack.c.bf16 %v8506_v12, %v8505_v11 }
 0x597   :  { %11200 = vmatprep.subr.bf16.mxu0 %v11199_v16 }
 0x599   :  { %9933 = vmatmul.mubr.msk.f32.vlgmr.msra.gmra.mrb[28].mxu0 %vm620_vm0, %v13340_v47  ;;  %v8477_v47 = vld [vmem:[%s14060_s13 + $0x170] sm:$0xff] }
 0x59a   :  { %9935 = vmatprep.mubr.msk.f32.mxu0 %vm620_vm0, %v2100_v56  ;;  %11202 = vmatpush3.bf16.msra.mxu0 %v11199_v16  ;;  %v11243_v50 = vpack.c.bf16 %v8478_v49, %v8477_v47  ;;  %v8489_v56 = vld [vmem:[%s14060_s13 + $0x190] sm:$0xff]  ;;  %v11295_v16 = vpack.c.bf16 %v8512_v15, %v8511_v14 }
 0x59b   :  { %11204 = vmatprep.subr.bf16.mxu0 %v11203_v19  ;;  %v11267_v59 = vpack.c.bf16 %v8490_v57, %v8489_v56 }
 0x59d   :  { %9936 = vmatmul.mubr.msk.f32.gmra.mrb[30].mxu0 %vm620_vm0, %v9871_v54  ;;  %v11263_v54 = vpack.c.bf16 %v8488_v53, %v8487_v52 }
 0x59e   :  { %11206 = vmatpush3.bf16.msra.mxu0 %v11203_v19  ;;  %9976 = vmatprep.mubr.msk.f32.mxu0 %vm620_vm0, %v13344_v51  ;;  %v11299_v19 = vpack.c.bf16 %v8514_v18, %v8513_v17 }
 0x59f   :  { %11208 = vmatprep.subr.bf16.mxu0 %v11207_v22 }
 0x5a2   :  { %11210 = vmatpush3.bf16.msra.mxu0 %v11207_v22  ;;  %v11303_v22 = vpack.c.bf16 %v8516_v21, %v8515_v20  ;;  %v3809_v20 = vld [vmem:[#allocation19 + $0x10] sm:$0xff] }
 0x5a3   :  { %11212 = vmatprep.subr.bf16.mxu0 %v11211_v25 }
 0x5a6   :  { %11214 = vmatpush3.bf16.msra.mxu0 %v11211_v25  ;;  %v11307_v25 = vpack.c.bf16 %v8518_v24, %v8517_v23  ;;  %v3426_v24 = vlaneseq }
 0x5a7   :  { %11216 = vmatprep.subr.bf16.mxu0 %v11215_v28 }
 0x5a9   :  { %9977 = vmatmul.mubr.msk.f32.vlgmr.msra.gmra.mrb[28].mxu0 %vm620_vm0, %v13342_v48 }
 0x5aa   :  { %11218 = vmatpush3.bf16.msra.mxu0 %v11215_v28  ;;  %9979 = vmatprep.mubr.msk.f32.mxu0 %vm620_vm0, %v13353_v58  ;;  %v13481_v28 = vpack.c.bf16 %v3268_v27, %v3267_v26  ;;  %v3427_v27 = vshrl.u32 %v3426_v24, 7  ;;  %v3556_v24 = vld [vmem:[#allocation20 + $0x38] sm:$0xff] }
 0x5ab   :  { %11220 = vmatprep.subr.bf16.mxu0 %v11219_v31 }
 0x5ac   :  { %11313 = vmatpush3.bf16.msra.mxu1 %v13481_v28 }
 0x5ad   :  { %9980 = vmatmul.mubr.msk.f32.gmra.mrb[30].mxu0 %vm620_vm0, %v13351_v55  ;;  %11314 = vmatprep.subr.bf16.mxu1 %v12630_v29 }
 0x5ae   :  { %11222 = vmatpush3.bf16.msra.mxu0 %v11219_v31  ;;  %9998 = vmatprep.mubr.msk.f32.mxu0 %vm620_vm0, %v13344_v51  ;;  %v3272_v31 = vld [vmem:[#allocation17 + $0x28] sm:$0xff] }
 0x5af   :  { %11224 = vmatprep.subr.bf16.mxu0 %v11223_v34 }
 0x5b2   :  { %11226 = vmatpush3.bf16.msra.mxu0 %v11223_v34  ;;  %v11321_v34 = vpack.c.bf16 %v3274_v33, %v3273_v32  ;;  %v8526_v32 = vld [vmem:[#allocation14] ss:$0 sm:$0xff] }
 0x5b3   :  { %11228 = vmatprep.subr.bf16.mxu0 %v11227_v37 }
 0x5b6   :  { %11230 = vmatpush3.bf16.msra.mxu0 %v11227_v37 }
 0x5b7   :  { %11232 = vmatprep.subr.bf16.mxu0 %v11231_v40 }
 0x5b9   :  { %9999 = vmatmul.mubr.msk.f32.vlgmr.msra.gmra.mrb[28].mxu0 %vm620_vm0, %v13342_v48 }
 0x5ba   :  { %10001 = vmatprep.mubr.msk.f32.mxu0 %vm620_vm0, %v13353_v58  ;;  %11234 = vmatpush3.bf16.msra.mxu0 %v11231_v40 }
 0x5bb   :  { %11236 = vmatprep.subr.bf16.mxu0 %v11235_v43 }
 0x5bd   :  { %10002 = vmatmul.mubr.msk.f32.gmra.mrb[30].mxu0 %vm620_vm0, %v13351_v55 }
 0x5be   :  { %11238 = vmatpush3.bf16.msra.mxu0 %v11235_v43  ;;  %10020 = vmatprep.mubr.msk.f32.mxu0 %vm620_vm0, %v13344_v51  ;;  %v11271_v51 = vpack.c.bf16 %v8492_v61, %v8491_v60 }
 0x5bf   :  { %11240 = vmatprep.subr.bf16.mxu0 %v11239_v46 }
 0x5c2   :  { %11242 = vmatpush3.bf16.msra.mxu0 %v11239_v46 }
 0x5c3   :  { %11244 = vmatprep.subr.bf16.mxu0 %v11243_v50 }
 0x5c6   :  { %11246 = vmatpush3.bf16.msra.mxu0 %v11243_v50 }
 0x5c7   :  { %11264 = vmatprep.subr.bf16.mxu0 %v11263_v54 }
 0x5c9   :  { %10021 = vmatmul.mubr.msk.f32.vlgmr.msra.gmra.mrb[28].mxu0 %vm620_vm0, %v13342_v48  ;;  %v11275_v48 = vpack.c.bf16 %v8494_v63, %v8493_v62 }
 0x5ca   :  { %10023 = vmatprep.mubr.msk.f32.mxu0 %vm620_vm0, %v13353_v58  ;;  %11266 = vmatpush3.bf16.msra.mxu0 %v11263_v54  ;;  %v8500_v58 = vld [vmem:[%s14060_s13 + $0x1c8] sm:$0xff] }
 0x5cb   :  { %11268 = vmatprep.subr.bf16.mxu0 %v11267_v59  ;;  %v11279_v1 = vpack.c.bf16 %v8500_v58, %v8499_v0 }
 0x5cd   :  { %10024 = vmatmul.mubr.msk.f32.gmra.mrb[30].mxu0 %vm620_vm0, %v13351_v55  ;;  %v11283_v55 = vpack.c.bf16 %v8502_v4, %v8501_v2 }
 0x5ce   :  { %11270 = vmatpush3.bf16.msra.mxu0 %v11267_v59  ;;  %10064 = vmatprep.mubr.msk.f32.mxu0 %vm620_vm0, %v13366_v5 }
 0x5cf   :  { %11272 = vmatprep.subr.bf16.mxu0 %v11271_v51 }
 0x5d2   :  { %11274 = vmatpush3.bf16.msra.mxu0 %v11271_v51 }
 0x5d3   :  { %11276 = vmatprep.subr.bf16.mxu0 %v11275_v48 }
 0x5d6   :  { %11278 = vmatpush3.bf16.msra.mxu0 %v11275_v48 }
 0x5d7   :  { %11280 = vmatprep.subr.bf16.mxu0 %v11279_v1 }
 0x5d9   :  { %10065 = vmatmul.mubr.msk.f32.vlgmr.msra.gmra.mrb[28].mxu0 %vm620_vm0, %v13364_v3 }
 0x5da   :  { %11282 = vmatpush3.bf16.msra.mxu0 %v11279_v1  ;;  %10067 = vmatprep.mubr.msk.f32.mxu0 %vm620_vm0, %v13375_v10 }
 0x5db   :  { %11284 = vmatprep.subr.bf16.mxu0 %v11283_v55 }
 0x5dd   :  { %10068 = vmatmul.mubr.msk.f32.gmra.mrb[30].mxu0 %vm620_vm0, %v13373_v8 }
 0x5de   :  { %11286 = vmatpush3.bf16.msra.mxu0 %v11283_v55  ;;  %10086 = vmatprep.mubr.msk.f32.mxu0 %vm620_vm0, %v13366_v5 }
 0x5df   :  { %11288 = vmatprep.subr.bf16.mxu0 %v11287_v9 }
 0x5e2   :  { %11290 = vmatpush3.bf16.msra.mxu0 %v11287_v9 }
 0x5e3   :  { %11292 = vmatprep.subr.bf16.mxu0 %v11291_v13 }
 0x5e6   :  { %11294 = vmatpush3.bf16.msra.mxu0 %v11291_v13 }
 0x5e7   :  { %11296 = vmatprep.subr.bf16.mxu0 %v11295_v16 }
 0x5e9   :  { %10087 = vmatmul.mubr.msk.f32.vlgmr.msra.gmra.mrb[28].mxu0 %vm620_vm0, %v13364_v3 }
 0x5ea   :  { %10089 = vmatprep.mubr.msk.f32.mxu0 %vm620_vm0, %v13375_v10  ;;  %11298 = vmatpush3.bf16.msra.mxu0 %v11295_v16 }
 0x5eb   :  { %11300 = vmatprep.subr.bf16.mxu0 %v11299_v19 }
 0x5ed   :  { %10090 = vmatmul.mubr.msk.f32.gmra.mrb[30].mxu0 %vm620_vm0, %v13373_v8 }
 0x5ee   :  { %11302 = vmatpush3.bf16.msra.mxu0 %v11299_v19  ;;  %10108 = vmatprep.mubr.msk.f32.mxu0 %vm620_vm0, %v13366_v5  ;;  %v3269_v5 = vld [vmem:[#allocation17 + $0x10] sm:$0xff]  ;;  %v3465_v19 = vld [vmem:[#allocation19] sm:$0xff] }
 0x5ef   :  { %11304 = vmatprep.subr.bf16.mxu0 %v11303_v22 }
 0x5f2   :  { %11306 = vmatpush3.bf16.msra.mxu0 %v11303_v22 }
 0x5f3   :  { %11308 = vmatprep.subr.bf16.mxu0 %v11307_v25 }
 0x5f6   :  { %11310 = vmatpush3.bf16.msra.mxu0 %v11307_v25 }
 0x5f9   :  { %10109 = vmatmul.mubr.msk.f32.vlgmr.msra.gmra.mrb[28].mxu0 %vm620_vm0, %v13364_v3  ;;  %v11315_v3 = vpack.c.bf16 %v3270_v30, %v3269_v5 }
 0x5fa   :  { %10111 = vmatprep.mubr.msk.f32.mxu0 %vm620_vm0, %v13375_v10  ;;  %v3271_v10 = vld [vmem:[#allocation17 + $0x20] sm:$0xff] }
 0x5fb   :  { %11316 = vmatpush3.bf16.msra.mxu1 %v11315_v3 }
 0x5fc   :  { %11317 = vmatprep.subr.bf16.mxu1 %v12630_v29 }
 0x5fd   :  { %10112 = vmatmul.mubr.msk.f32.gmra.mrb[30].mxu0 %vm620_vm0, %v13373_v8  ;;  %v11318_v8 = vpack.c.bf16 %v3272_v31, %v3271_v10 }
 0x5fe   :  { %10228 = vmatprep.mubr.msk.f32.mxu0 %vm3467_vm2, %v3809_v20  ;;  %v3553_v20 = vld [vmem:[#allocation20 + $0x20] sm:$0xff] }
 0x5ff   :  { %11319 = vmatpush3.bf16.msra.mxu1 %v11318_v8 }
 0x600   :  { %11320 = vmatprep.subr.bf16.mxu1 %v12630_v29 }
 0x603   :  { %11322 = vmatpush3.bf16.msra.mxu1 %v11321_v34 }
 0x604   :  { %11323 = vmatprep.subr.bf16.mxu1 %v12630_v29 }
 0x6cc   :  { %v10110_v37 = vpop.f32.mrb[28].mxu0 }
 0x6cd   :  { %v3230_v38 = vadd.f32 %v10110_v37, %v8523_v36  ;;  %v3199_v39 = vpop.f32.mrb[29].mxu0 }
 0x6ce   :  { %v3229_v40 = vadd.f32 %v8523_v36, %v3199_v39 }
 0x6cf   :  { %v13491_v41 = vmax.f32 %v3230_v38, 0.0 }
 0x6d0   :  { %v13493_v42 = vmax.f32 %v3229_v40, 0.0  ;;  %v10113_v43 = vpop.f32.mrb[30].mxu0 }
 0x6d1   :  { %v3251_v44 = vmul.f32 %v13491_v41, %v13491_v41  ;;  %v3232_v45 = vadd.f32 %v10113_v43, %v8523_v36  ;;  %v3209_v46 = vpop.f32.mrb[31].mxu0  ;;  %v3238_v47 = vsel %vm620_vm0, %v13491_v41, 0.0 }
 0x6d2   :  { %v3237_v49 = vsel %vm620_vm0, %v13493_v42, 0.0  ;;  %v3250_v50 = vmul.f32 %v13493_v42, %v13493_v42  ;;  %v3231_v52 = vadd.f32 %v8523_v36, %v3209_v46 }
 0x6d3   :  { %v3255_v53 = vsel %vm620_vm0, %v3251_v44, 0.0  ;;  %v13505_v56 = vmax.f32 %v3232_v45, 0.0  ;;  %v3239_v59 = vadd.f32 %v3238_v47, %v3237_v49  ;;  %v8527_v45 = vld [vmem:[#allocation16] ss:$0 sm:$0xff] }
 0x6d4   :  { %v3254_v54 = vsel %vm620_vm0, %v3250_v50, 0.0  ;;  %v13507_v57 = vmax.f32 %v3231_v52, 0.0 }
 0x6d5   :  { %v3256_v51 = vadd.f32 %v3255_v53, %v3254_v54  ;;  %v3242_v63 = vsel %vm620_vm0, %v13505_v56, 0.0  ;;  %v3253_v48 = vmul.f32 %v13505_v56, %v13505_v56 }
 0x6d6   :  { %v3240_v60 = vsel %vm620_vm0, %v13507_v57, 0.0  ;;  %v3252_v61 = vmul.f32 %v13507_v57, %v13507_v57 }
 0x6d7   :  { %v3241_v62 = vadd.f32 %v3240_v60, %v3239_v59  ;;  %v3259_v4 = vsel %vm620_vm0, %v3253_v48, 0.0  ;;  %v3558_v59 = vld [vmem:[#allocation20 + $0x40] sm:$0xff]  ;;  %v4157_v48 = vld [vmem:[#allocation19 + $0x20] sm:$0xff] }
 0x6d8   :  { %v3257_v0 = vsel %vm620_vm0, %v3252_v61, 0.0  ;;  %v3560_v61 = vld [vmem:[#allocation20 + $0x50] sm:$0xff] }
 0x6d9   :  { %v3243_v58 = vadd.f32 %v3242_v63, %v3241_v62  ;;  %v3258_v1 = vadd.f32 %v3257_v0, %v3256_v51  ;;  %v3561_v51 = vld [vmem:[#allocation20 + $0x58] sm:$0xff]  ;;  %v3810_v63 = vld [vmem:[#allocation19 + $0x18] sm:$0xff] }
 0x6da   :  { %v3466_v62 = vld [vmem:[#allocation19 + $0x8] sm:$0xff]  ;;  %v11347_v0 = vpack.c.bf16 %v3561_v51, %v3560_v61  ;;  %v3989_v61 = vld [vmem:[#allocation20 + $0x120] sm:$0xff]  ;;  %v3990_v51 = vld [vmem:[#allocation20 + $0x128] sm:$0xff] }
 0x6db   :  { %v3244_v2 = vrot.slane %v3243_v58, 4  ;;  %v3260_v6 = vadd.f32 %v3259_v4, %v3258_v1  ;;  %v3563_v1 = vld [vmem:[#allocation20 + $0x68] sm:$0xff]  ;;  %v3564_v4 = vld [vmem:[#allocation20 + $0x70] sm:$0xff] }
 0x6dd   :  { %v3245_v55 = vadd.f32 %v3244_v2, %v3243_v58  ;;  %v3261_v11 = vrot.slane %v3260_v6, 4  ;;  %v3562_v58 = vld [vmem:[#allocation20 + $0x60] sm:$0xff] }
 0x6de   :  { %v11351_v2 = vpack.c.bf16 %v3563_v1, %v3562_v58  ;;  %v4071_v58 = vld [vmem:[#allocation20 + $0x140] sm:$0xff]  ;;  %v4072_v1 = vld [vmem:[#allocation20 + $0x148] sm:$0xff] }
 0x6df   :  { %v3246_v7 = vrot.slane %v3245_v55, 2  ;;  %v3262_v14 = vadd.f32 %v3261_v11, %v3260_v6  ;;  %v4158_v6 = vld [vmem:[#allocation19 + $0x28] sm:$0xff]  ;;  %v3550_v11 = vld [vmem:[#allocation20 + $0x8] sm:$0xff] }
 0x6e1   :  { %v3247_v9 = vadd.f32 %v3246_v7, %v3245_v55  ;;  %v3263_v15 = vrot.slane %v3262_v14, 2  ;;  %v3565_v55 = vld [vmem:[#allocation20 + $0x78] sm:$0xff] }
 0x6e2   :  { %v11355_v7 = vpack.c.bf16 %v3565_v55, %v3564_v4  ;;  %v4073_v4 = vld [vmem:[#allocation20 + $0x150] sm:$0xff]  ;;  %v4074_v55 = vld [vmem:[#allocation20 + $0x158] sm:$0xff] }
 0x6e3   :  { %v3248_v12 = vrot.slane %v3247_v9, 1  ;;  %v3264_v16 = vadd.f32 %v3263_v15, %v3262_v14  ;;  %v3552_v14 = vld [vmem:[#allocation20 + $0x18] sm:$0xff] }
 0x6e5   :  { %v3249_v13 = vadd.f32 %v3248_v12, %v3247_v9  ;;  %v3265_v17 = vrot.slane %v3264_v16, 1  ;;  %v3549_v9 = vld [vmem:[#allocation20] sm:$0xff] }
 0x6e6   :  { %v11359_v12 = vpack.c.bf16 %v3550_v11, %v3549_v9  ;;  %v4076_v9 = vld [vmem:[#allocation20 + $0x168] sm:$0xff] }
 0x6e7   :  { %10131 = vmatmul.mubr.msk.f32.vlgmr.msra.gmra.mrb[16].mxu1 %vm620_vm0, %v3249_v13  ;;  %v3266_v18 = vadd.f32 %v3265_v17, %v3264_v16  ;;  %v3551_v13 = vld [vmem:[#allocation20 + $0x10] sm:$0xff] }
 0x6e8   :  { %11325 = vmatpush3.bf16.msra.mxu1 %v13481_v28  ;;  %10149 = vmatprep.mubr.msk.f32.mxu1 %vm12631_vm1, %v12632_v35 }
 0x6e9   :  { %11326 = vmatprep.subr.bf16.mxu1 %v12630_v29 }
 0x6ec   :  { %11328 = vmatpush3.bf16.msra.mxu1 %v11315_v3  ;;  %v13529_v3 = vsub.s32 0, %v3427_v27 }
 0x6ed   :  { %11329 = vmatprep.subr.bf16.mxu1 %v12630_v29 }
 0x6f0   :  { %11331 = vmatpush3.bf16.msra.mxu1 %v11318_v8 }
 0x6f1   :  { %11332 = vmatprep.subr.bf16.mxu1 %v12630_v29 }
 0x6f4   :  { %11334 = vmatpush3.bf16.msra.mxu1 %v11321_v34 }
 0x6f7   :  { %10150 = vmatmul.mubr.msk.f32.vlgmr.msra.gmra.mrb[18].mxu1 %vm620_vm0, %v3266_v18  ;;  %v11363_v18 = vpack.c.bf16 %v3552_v14, %v3551_v13  ;;  %v4078_v13 = vld [vmem:[#allocation20 + $0x178] sm:$0xff] }
 0x6f8   :  { %10160 = vmatprep.mubr.msk.f32.mxu1 %vm3467_vm2, %v3465_v19 }
 0x7ba   :  { %v3344_v21 = vpop.f32.mrb[16].mxu1 }
 0x7bb   :  { %v10132_v22 = vpop.f32.mrb[17].mxu1  ;;  %v3348_v23 = vmul.f32 0.001953125, %v3344_v21  ;;  %v3554_v21 = vld [vmem:[#allocation20 + $0x28] sm:$0xff] }
 0x7bc   :  { %v11367_v22 = vpack.c.bf16 %v3554_v21, %v3553_v20  ;;  %v4243_v20 = vld [vmem:[#allocation20 + $0x190] sm:$0xff]  ;;  %v4244_v21 = vld [vmem:[#allocation20 + $0x198] sm:$0xff] }
 0x7bd   :  { %v3423_v26 = vmul.f32 %v3348_v23, %v3348_v23  ;;  %v3429_v31 = vrot.slane %v3348_v23, %v13529_v3  ;;  %v3555_v23 = vld [vmem:[#allocation20 + $0x30] sm:$0xff] }
 0x7bf   :  { %v3430_v8 = vsub.f32 %v13493_v42, %v3429_v31  ;;  %v3431_v33 = vsub.f32 %v13491_v41, %v3429_v31  ;;  %v3432_v34 = vsub.f32 %v13507_v57, %v3429_v31  ;;  %v3433_v36 = vsub.f32 %v13505_v56, %v3429_v31  ;;  %v3559_v56 = vld [vmem:[#allocation20 + $0x48] sm:$0xff]  ;;  %v3726_v31 = vld [vmem:[#allocation20 + $0x98] sm:$0xff] }
 0x7c0   :  { %v11343_v60 = vpack.c.bf16 %v3559_v56, %v3558_v59  ;;  %v3987_v59 = vld [vmem:[#allocation20 + $0x110] sm:$0xff]  ;;  %v3988_v56 = vld [vmem:[#allocation20 + $0x118] sm:$0xff] }
 0x7c1   :  { %v3440_v38 = vmul.f32 %v8526_v32, %v3430_v8  ;;  %v3441_v39 = vmul.f32 %v8526_v32, %v3431_v33  ;;  %v3442_v40 = vmul.f32 %v8526_v32, %v3432_v34  ;;  %v3443_v43 = vmul.f32 %v8526_v32, %v3433_v36  ;;  %v3727_v32 = vld [vmem:[#allocation20 + $0xa0] sm:$0xff]  ;;  %v3728_v33 = vld [vmem:[#allocation20 + $0xa8] sm:$0xff]  ;;  %v3729_v36 = vld [vmem:[#allocation20 + $0xb0] sm:$0xff] }
 0x7c2   :  { %v11383_v34 = vpack.c.bf16 %v3728_v33, %v3727_v32  ;;  %v4336_v32 = vld [vmem:[#allocation20 + $0x1d8] sm:$0xff]  ;;  %v4337_v33 = vld [vmem:[#allocation20 + $0x1e0] sm:$0xff] }
 0x7ca   :  { %v3418_v25 = vpop.f32.mrb[18].mxu1 }
 0x7cb   :  { %v3422_v28 = vmul.f32 0.001953125, %v3418_v25  ;;  %v10151_v5 = vpop.f32.mrb[19].mxu1 }
 0x7cc   :  { %v3724_v5 = vld [vmem:[#allocation20 + $0x88] sm:$0xff] }
 0x7cd   :  { %v3424_v30 = vsub.f32 %v3422_v28, %v3423_v26  ;;  %v11371_v26 = vpack.c.bf16 %v3556_v24, %v3555_v23  ;;  %v3723_v28 = vld [vmem:[#allocation20 + $0x80] sm:$0xff]  ;;  %v4246_v24 = vld [vmem:[#allocation20 + $0x1a8] sm:$0xff] }
 0x7ce   :  { %v4245_v23 = vld [vmem:[#allocation20 + $0x1a0] sm:$0xff] }
 0x7cf   :  { %v3444_v10 = vadd.f32 0.8, %v3424_v30  ;;  %v11375_v30 = vpack.c.bf16 %v3724_v5, %v3723_v28  ;;  %v4248_v28 = vld [vmem:[#allocation20 + $0x1b8] sm:$0xff] }
 0x7d1   :  { %11970 = vrsqrt.f32 %v3444_v10  ;;  %v3725_v10 = vld [vmem:[#allocation20 + $0x90] sm:$0xff] }
 0x7d2   :  { %v11379_v8 = vpack.c.bf16 %v3726_v31, %v3725_v10  ;;  %v4334_v10 = vld [vmem:[#allocation20 + $0x1c8] sm:$0xff] }
 0x7db   :  { %v11971_v37 = vpop.eup %11970 }
 0x7dc   :  { %v3449_v44 = vrot.slane %v11971_v37, %v13529_v3  ;;  %v3730_v37 = vld [vmem:[#allocation20 + $0xb8] sm:$0xff] }
 0x7de   :  { %v3450_v46 = vmul.f32 %v3449_v44, %v3440_v38  ;;  %v3451_v47 = vmul.f32 %v3449_v44, %v3441_v39  ;;  %v3452_v49 = vmul.f32 %v3449_v44, %v3442_v40  ;;  %v3453_v50 = vmul.f32 %v3449_v44, %v3443_v43  ;;  %v3893_v39 = vld [vmem:[#allocation20 + $0xc0] sm:$0xff]  ;;  %v3894_v40 = vld [vmem:[#allocation20 + $0xc8] sm:$0xff]  ;;  %v3895_v44 = vld [vmem:[#allocation20 + $0xd0] sm:$0xff] }
 0x7df   :  { %v11387_v38 = vpack.c.bf16 %v3730_v37, %v3729_v36  ;;  %v11399_v43 = vpack.c.bf16 %v3894_v40, %v3893_v39  ;;  %v4339_v37 = vld [vmem:[#allocation20 + $0x1f0] sm:$0xff]  ;;  %v4419_v40 = vld [vmem:[#allocation20 + $0x200] sm:$0xff] }
 0x7e0   :  { %v3461_v42 = vadd.f32 %v8527_v45, %v3450_v46  ;;  %v3462_v52 = vadd.f32 %v8527_v45, %v3451_v47  ;;  %v3463_v53 = vadd.f32 %v8527_v45, %v3452_v49  ;;  %v3464_v41 = vadd.f32 %v8527_v45, %v3453_v50  ;;  %v3896_v45 = vld [vmem:[#allocation20 + $0xd8] sm:$0xff]  ;;  %v3897_v47 = vld [vmem:[#allocation20 + $0xe0] sm:$0xff]  ;;  %v3898_v49 = vld [vmem:[#allocation20 + $0xe8] sm:$0xff] }
 0x7e1   :  { %v11403_v46 = vpack.c.bf16 %v3896_v45, %v3895_v44  ;;  %v11407_v50 = vpack.c.bf16 %v3898_v49, %v3897_v47  ;;  %v4421_v45 = vld [vmem:[#allocation20 + $0x210] sm:$0xff]  ;;  %v4423_v49 = vld [vmem:[#allocation20 + $0x220] sm:$0xff] }
 0x7e2   :  { %v11335_v54 = vpack.c.bf16 %v3462_v52, %v3461_v42  ;;  %v11339_v57 = vpack.c.bf16 %v3464_v41, %v3463_v53  ;;  %v3899_v42 = vld [vmem:[#allocation20 + $0xf0] sm:$0xff]  ;;  %v3900_v52 = vld [vmem:[#allocation20 + $0xf8] sm:$0xff]  ;;  %v3985_v41 = vld [vmem:[#allocation20 + $0x100] sm:$0xff] }
 0x7e3   :  { %v11411_v53 = vpack.c.bf16 %v3900_v52, %v3899_v42  ;;  %v4425_v52 = vld [vmem:[#allocation20 + $0x230] sm:$0xff] }
 0x7e4   :  { %11336 = vmatprep.subr.bf16.mxu1 %v11335_v54  ;;  %11392 = vmatprep.subr.bf16.mxu0 %v11335_v54 }
 0x7e5   :  { %11338 = vmatpush3.bf16.msra.mxu1 %v11335_v54  ;;  %11394 = vmatpush3.bf16.msra.mxu0 %v11335_v54 }
 0x7e6   :  { %11340 = vmatprep.subr.bf16.mxu1 %v11339_v57  ;;  %11396 = vmatprep.subr.bf16.mxu0 %v11339_v57 }
 0x7e9   :  { %11342 = vmatpush3.bf16.msra.mxu1 %v11339_v57  ;;  %11398 = vmatpush3.bf16.msra.mxu0 %v11339_v57 }
 0x7ea   :  { %11448 = vmatprep.subr.bf16.mxu0 %v11335_v54  ;;  %11344 = vmatprep.subr.bf16.mxu1 %v11343_v60 }
 0x7ec   :  { %10161 = vmatmul.mubr.msk.f32.vlgmr.msra.gmra.mrb[20].mxu1 %vm3467_vm2, %v3466_v62  ;;  %10229 = vmatmul.mubr.msk.f32.vlgmr.msra.gmra.mrb[32].mxu0 %vm3467_vm2, %v3810_v63  ;;  %v11423_v62 = vpack.c.bf16 %v3990_v51, %v3989_v61  ;;  %v3991_v63 = vld [vmem:[#allocation20 + $0x130] sm:$0xff]  ;;  %v4539_v61 = vld [vmem:[#allocation26 + $0x20] sm:$0xff] }
 0x7ed   :  { %11450 = vmatpush3.bf16.msra.mxu0 %v11335_v54  ;;  %10296 = vmatprep.mubr.msk.f32.mxu0 %vm3467_vm2, %v4157_v48  ;;  %v3986_v54 = vld [vmem:[#allocation20 + $0x108] sm:$0xff]  ;;  %v3992_v48 = vld [vmem:[#allocation20 + $0x138] sm:$0xff] }
 0x7ee   :  { %11452 = vmatprep.subr.bf16.mxu0 %v11339_v57  ;;  %11346 = vmatpush3.bf16.msra.mxu1 %v11343_v60  ;;  %v11419_v60 = vpack.c.bf16 %v3988_v56, %v3987_v59  ;;  %v4537_v59 = vld [vmem:[#allocation26 + $0x10] sm:$0xff]  ;;  %v4538_v56 = vld [vmem:[#allocation26 + $0x18] sm:$0xff]  ;;  %v4540_v51 = vld [vmem:[#allocation26 + $0x28] sm:$0xff] }
 0x7ef   :  { %11348 = vmatprep.subr.bf16.mxu1 %v11347_v0 }
 0x7f1   :  { %11454 = vmatpush3.bf16.msra.mxu0 %v11339_v57  ;;  %v11415_v57 = vpack.c.bf16 %v3986_v54, %v3985_v41  ;;  %v4535_v54 = vld [vmem:[#allocation26] sm:$0xff] }
 0x7f2   :  { %11350 = vmatpush3.bf16.msra.mxu1 %v11347_v0  ;;  %11503 = vmatprep.subr.bf16.mxu0 %v12630_v29  ;;  %v11427_v0 = vpack.c.bf16 %v3992_v48, %v3991_v63  ;;  %v4542_v63 = vld [vmem:[#allocation26 + $0x38] sm:$0xff] }
 0x7f3   :  { %11352 = vmatprep.subr.bf16.mxu1 %v11351_v2 }
 0x7f4   :  { %10297 = vmatmul.mubr.msk.f32.vlgmr.msra.gmra.mrb[34].mxu0 %vm3467_vm2, %v4158_v6  ;;  %v11435_v6 = vpack.c.bf16 %v4074_v55, %v4073_v4 }
 0x7f5   :  { %10372 = vmatprep.mubr.msk.f32.mxu0 %vm12631_vm1, %v12632_v35 }
 0x7f6   :  { %11354 = vmatpush3.bf16.msra.mxu1 %v11351_v2  ;;  %v11431_v2 = vpack.c.bf16 %v4072_v1, %v4071_v58 }
 0x7f7   :  { %11356 = vmatprep.subr.bf16.mxu1 %v11355_v7 }
 0x7fa   :  { %11358 = vmatpush3.bf16.msra.mxu1 %v11355_v7  ;;  %v4075_v7 = vld [vmem:[#allocation20 + $0x160] sm:$0xff] }
 0x7fb   :  { %11360 = vmatprep.subr.bf16.mxu1 %v11359_v12  ;;  %v11439_v11 = vpack.c.bf16 %v4076_v9, %v4075_v7 }
 0x8bf   :  { %v10162_v15 = vpop.f32.mrb[20].mxu1  ;;  %v13544_v16 = vpop.f32.mrb[32].mxu0 }
 0x8c0   :  { %v3540_v17 = vpop.f32.mrb[21].mxu1  ;;  %v13546_v19 = vpop.f32.mrb[33].mxu0 }
 0x8c1   :  { %10179 = vmatprep.mubr.msk.f32.mxu1 %vm620_vm0, %v3540_v17 }
 0x8c2   :  { %10180 = vmatmul.mubr.msk.f32.vlgmr.msra.gmra.mrb[22].mxu1 %vm620_vm0, %v10162_v15 }
 0x8c3   :  { %11362 = vmatpush3.bf16.msra.mxu1 %v11359_v12  ;;  %10198 = vmatprep.mubr.msk.f32.mxu1 %vm620_vm0, %v3540_v17  ;;  %v4077_v12 = vld [vmem:[#allocation20 + $0x170] sm:$0xff] }
 0x8c4   :  { %11364 = vmatprep.subr.bf16.mxu1 %v11363_v18  ;;  %v11443_v14 = vpack.c.bf16 %v4078_v13, %v4077_v12 }
 0x8c7   :  { %11366 = vmatpush3.bf16.msra.mxu1 %v11363_v18  ;;  %v13551_v25 = vpop.f32.mrb[34].mxu0 }
 0x8c8   :  { %11368 = vmatprep.subr.bf16.mxu1 %v11367_v22  ;;  %v13553_v27 = vpop.f32.mrb[35].mxu0 }
 0x8cb   :  { %11370 = vmatpush3.bf16.msra.mxu1 %v11367_v22  ;;  %v11459_v22 = vpack.c.bf16 %v4244_v21, %v4243_v20 }
 0x8cc   :  { %11372 = vmatprep.subr.bf16.mxu1 %v11371_v26 }
 0x8cf   :  { %11374 = vmatpush3.bf16.msra.mxu1 %v11371_v26  ;;  %v4247_v26 = vld [vmem:[#allocation20 + $0x1b0] sm:$0xff] }
 0x8d0   :  { %11376 = vmatprep.subr.bf16.mxu1 %v11375_v30  ;;  %v11467_v5 = vpack.c.bf16 %v4248_v28, %v4247_v26 }
 0x8d2   :  { %10199 = vmatmul.mubr.msk.f32.vlgmr.msra.gmra.mrb[22].mxu1 %vm620_vm0, %v10162_v15 }
 0x8d3   :  { %11378 = vmatpush3.bf16.msra.mxu1 %v11375_v30  ;;  %10217 = vmatprep.mubr.msk.f32.mxu1 %vm620_vm0, %v3540_v17  ;;  %v4242_v17 = vld [vmem:[#allocation20 + $0x188] sm:$0xff]  ;;  %v4333_v30 = vld [vmem:[#allocation20 + $0x1c0] sm:$0xff] }
 0x8d4   :  { %11380 = vmatprep.subr.bf16.mxu1 %v11379_v8  ;;  %v11471_v31 = vpack.c.bf16 %v4334_v10, %v4333_v30 }
 0x8d7   :  { %11382 = vmatpush3.bf16.msra.mxu1 %v11379_v8  ;;  %v4335_v8 = vld [vmem:[#allocation20 + $0x1d0] sm:$0xff] }
 0x8d8   :  { %11384 = vmatprep.subr.bf16.mxu1 %v11383_v34 }
 0x8db   :  { %11386 = vmatpush3.bf16.msra.mxu1 %v11383_v34  ;;  %v4338_v34 = vld [vmem:[#allocation20 + $0x1e8] sm:$0xff] }
 0x8dc   :  { %11388 = vmatprep.subr.bf16.mxu1 %v11387_v38  ;;  %v11479_v36 = vpack.c.bf16 %v4338_v34, %v4337_v33 }
 0x8df   :  { %11390 = vmatpush3.bf16.msra.mxu1 %v11387_v38  ;;  %v4340_v38 = vld [vmem:[#allocation20 + $0x1f8] sm:$0xff] }
 0x8e0   :  { %11400 = vmatprep.subr.bf16.mxu1 %v11399_v43  ;;  %v11483_v39 = vpack.c.bf16 %v4340_v38, %v4339_v37 }
 0x8e2   :  { %10218 = vmatmul.mubr.msk.f32.vlgmr.msra.gmra.mrb[22].mxu1 %vm620_vm0, %v10162_v15  ;;  %v4241_v15 = vld [vmem:[#allocation20 + $0x180] sm:$0xff] }
 0x8e3   :  { %11402 = vmatpush3.bf16.msra.mxu1 %v11399_v43  ;;  %10247 = vmatprep.mubr.msk.f32.mxu1 %vm620_vm0, %v13546_v19  ;;  %v11455_v18 = vpack.c.bf16 %v4242_v17, %v4241_v15  ;;  %v4420_v43 = vld [vmem:[#allocation20 + $0x208] sm:$0xff] }
 0x8e4   :  { %11404 = vmatprep.subr.bf16.mxu1 %v11403_v46  ;;  %v11487_v44 = vpack.c.bf16 %v4420_v43, %v4419_v40 }
 0x8e7   :  { %11406 = vmatpush3.bf16.msra.mxu1 %v11403_v46  ;;  %v4422_v46 = vld [vmem:[#allocation20 + $0x218] sm:$0xff] }
 0x8e8   :  { %11408 = vmatprep.subr.bf16.mxu1 %v11407_v50  ;;  %v11491_v47 = vpack.c.bf16 %v4422_v46, %v4421_v45 }
 0x8eb   :  { %11410 = vmatpush3.bf16.msra.mxu1 %v11407_v50  ;;  %v4424_v50 = vld [vmem:[#allocation20 + $0x228] sm:$0xff] }
 0x8ec   :  { %11412 = vmatprep.subr.bf16.mxu1 %v11411_v53  ;;  %v11495_v42 = vpack.c.bf16 %v4424_v50, %v4423_v49  ;;  %v8556_v50 = vld [vmem:[#allocation25] ss:$0 sm:$0xff] }
 0x8ef   :  { %11414 = vmatpush3.bf16.msra.mxu1 %v11411_v53  ;;  %v4426_v53 = vld [vmem:[#allocation20 + $0x238] sm:$0xff] }
 0x8f0   :  { %11416 = vmatprep.subr.bf16.mxu1 %v11415_v57  ;;  %v11499_v41 = vpack.c.bf16 %v4426_v53, %v4425_v52 }
 0x8f2   :  { %10248 = vmatmul.mubr.msk.f32.vlgmr.msra.gmra.mrb[22].mxu1 %vm620_vm0, %v13544_v16 }
 0x8f3   :  { %11418 = vmatpush3.bf16.msra.mxu1 %v11415_v57  ;;  %10266 = vmatprep.mubr.msk.f32.mxu1 %vm620_vm0, %v13546_v19 }
 0x8f4   :  { %11420 = vmatprep.subr.bf16.mxu1 %v11419_v60 }
 0x8f7   :  { %11422 = vmatpush3.bf16.msra.mxu1 %v11419_v60  ;;  %v11507_v60 = vpack.c.bf16 %v4538_v56, %v4537_v59  ;;  %v4725_v59 = vld [vmem:[#allocation28] sm:$0xff] }
 0x8f8   :  { %11424 = vmatprep.subr.bf16.mxu1 %v11423_v62 }
 0x8fb   :  { %11426 = vmatpush3.bf16.msra.mxu1 %v11423_v62  ;;  %v11510_v62 = vpack.c.bf16 %v4540_v51, %v4539_v61  ;;  %v8561_v61 = vld [vmem:[%s14061_s15 + $0x58] sm:$0xff] }
 0x8fc   :  { %11428 = vmatprep.subr.bf16.mxu1 %v11427_v0 }
 0x8ff   :  { %11430 = vmatpush3.bf16.msra.mxu1 %v11427_v0  ;;  %v8552_v0 = vld [vmem:[#allocation22] ss:$0 sm:$0xff] }
 0x900   :  { %11432 = vmatprep.subr.bf16.mxu1 %v11431_v2 }
 0x902   :  { %10267 = vmatmul.mubr.msk.f32.vlgmr.msra.gmra.mrb[22].mxu1 %vm620_vm0, %v13544_v16 }
 0x903   :  { %11434 = vmatpush3.bf16.msra.mxu1 %v11431_v2  ;;  %10285 = vmatprep.mubr.msk.f32.mxu1 %vm620_vm0, %v13546_v19  ;;  %v11463_v19 = vpack.c.bf16 %v4246_v24, %v4245_v23 }
 0x904   :  { %11436 = vmatprep.subr.bf16.mxu1 %v11435_v6 }
 0x907   :  { %11438 = vmatpush3.bf16.msra.mxu1 %v11435_v6 }
 0x908   :  { %11440 = vmatprep.subr.bf16.mxu1 %v11439_v11 }
 0x90b   :  { %11442 = vmatpush3.bf16.msra.mxu1 %v11439_v11 }
 0x90c   :  { %11444 = vmatprep.subr.bf16.mxu1 %v11443_v14 }
 0x90f   :  { %11446 = vmatpush3.bf16.msra.mxu1 %v11443_v14 }
 0x910   :  { %11456 = vmatprep.subr.bf16.mxu1 %v11455_v18 }
 0x912   :  { %10286 = vmatmul.mubr.msk.f32.vlgmr.msra.gmra.mrb[22].mxu1 %vm620_vm0, %v13544_v16  ;;  %v11475_v16 = vpack.c.bf16 %v4336_v32, %v4335_v8 }
 0x913   :  { %11458 = vmatpush3.bf16.msra.mxu1 %v11455_v18  ;;  %10315 = vmatprep.mubr.msk.f32.mxu1 %vm620_vm0, %v13553_v27 }
 0x914   :  { %11460 = vmatprep.subr.bf16.mxu1 %v11459_v22 }
 0x917   :  { %11462 = vmatpush3.bf16.msra.mxu1 %v11459_v22 }
 0x918   :  { %11464 = vmatprep.subr.bf16.mxu1 %v11463_v19 }
 0x91b   :  { %11466 = vmatpush3.bf16.msra.mxu1 %v11463_v19 }
 0x91c   :  { %11468 = vmatprep.subr.bf16.mxu1 %v11467_v5 }
 0x91f   :  { %11470 = vmatpush3.bf16.msra.mxu1 %v11467_v5 }
 0x920   :  { %11472 = vmatprep.subr.bf16.mxu1 %v11471_v31 }
 0x922   :  { %10316 = vmatmul.mubr.msk.f32.vlgmr.msra.gmra.mrb[22].mxu1 %vm620_vm0, %v13551_v25 }
 0x923   :  { %11474 = vmatpush3.bf16.msra.mxu1 %v11471_v31  ;;  %10334 = vmatprep.mubr.msk.f32.mxu1 %vm620_vm0, %v13553_v27 }
 0x924   :  { %11476 = vmatprep.subr.bf16.mxu1 %v11475_v16 }
 0x927   :  { %11478 = vmatpush3.bf16.msra.mxu1 %v11475_v16 }
 0x928   :  { %11480 = vmatprep.subr.bf16.mxu1 %v11479_v36 }
 0x92b   :  { %11482 = vmatpush3.bf16.msra.mxu1 %v11479_v36 }
 0x92c   :  { %11484 = vmatprep.subr.bf16.mxu1 %v11483_v39 }
 0x92f   :  { %11486 = vmatpush3.bf16.msra.mxu1 %v11483_v39 }
 0x930   :  { %11488 = vmatprep.subr.bf16.mxu1 %v11487_v44 }
 0x932   :  { %10335 = vmatmul.mubr.msk.f32.vlgmr.msra.gmra.mrb[22].mxu1 %vm620_vm0, %v13551_v25 }
 0x933   :  { %11490 = vmatpush3.bf16.msra.mxu1 %v11487_v44  ;;  %10353 = vmatprep.mubr.msk.f32.mxu1 %vm620_vm0, %v13553_v27  ;;  %v4536_v27 = vld [vmem:[#allocation26 + $0x8] sm:$0xff]  ;;  %v8555_v44 = vld [vmem:[#allocation23] ss:$0 sm:$0xff] }
 0x934   :  { %11492 = vmatprep.subr.bf16.mxu1 %v11491_v47  ;;  %v11504_v57 = vpack.c.bf16 %v4536_v27, %v4535_v54  ;;  %v8558_v54 = vld [vmem:[%s14061_s15 + $0x40] sm:$0xff]  ;;  %v8559_v27 = vld [vmem:[%s14061_s15 + $0x48] sm:$0xff] }
 0x935   :  { %v11531_v56 = vpack.c.bf16 %v8559_v27, %v8558_v54  ;;  %v8593_v54 = vld [vmem:[%s14061_s15 + $0x130] sm:$0xff] }
 0x936   :  { %11505 = vmatpush3.bf16.msra.mxu0 %v11504_v57 }
 0x937   :  { %11494 = vmatpush3.bf16.msra.mxu1 %v11491_v47  ;;  %11506 = vmatprep.subr.bf16.mxu0 %v12630_v29 }
 0x938   :  { %11496 = vmatprep.subr.bf16.mxu1 %v11495_v42 }
 0x93a   :  { %11508 = vmatpush3.bf16.msra.mxu0 %v11507_v60 }
 0x93b   :  { %11498 = vmatpush3.bf16.msra.mxu1 %v11495_v42  ;;  %11509 = vmatprep.subr.bf16.mxu0 %v12630_v29 }
 0x93c   :  { %11500 = vmatprep.subr.bf16.mxu1 %v11499_v41 }
 0x93e   :  { %11511 = vmatpush3.bf16.msra.mxu0 %v11510_v62 }
 0x93f   :  { %11502 = vmatpush3.bf16.msra.mxu1 %v11499_v41  ;;  %11512 = vmatprep.subr.bf16.mxu0 %v12630_v29 }
 0x940   :  { %11581 = vmatprep.subr.bf16.mxu1 %v12630_v29 }
 0x942   :  { %10354 = vmatmul.mubr.msk.f32.vlgmr.msra.gmra.mrb[22].mxu1 %vm620_vm0, %v13551_v25  ;;  %v4541_v25 = vld [vmem:[#allocation26 + $0x30] sm:$0xff] }
 0x943   :  { %10500 = vmatprep.mubr.msk.f32.mxu1 %vm12631_vm1, %v12632_v35  ;;  %v11513_v48 = vpack.c.bf16 %v4542_v63, %v4541_v25  ;;  %v8563_v25 = vld [vmem:[%s14061_s15 + $0x68] sm:$0xff] }
 0x945   :  { %11514 = vmatpush3.bf16.msra.mxu0 %v11513_v48 }
 0x946   :  { %11515 = vmatprep.subr.bf16.mxu0 %v12630_v29 }
 0xa15   :  { %v10355_v58 = vpop.f32.mrb[22].mxu1 }
 0xa16   :  { %v4512_v1 = vadd.f32 %v10355_v58, %v8552_v0  ;;  %v4493_v2 = vpop.f32.mrb[23].mxu1 }
 0xa17   :  { %v4511_v4 = vadd.f32 %v8552_v0, %v4493_v2  ;;  %v8565_v0 = vld [vmem:[%s14061_s15 + $0x78] sm:$0xff]  ;;  %v4801_v2 = vld [vmem:[%s14061_s15 + $0x8] sm:$0xff] }
 0xa18   :  { %v4514_v55 = vmax.f32 %v4512_v1, 0.0  ;;  %v4800_v1 = vld [vmem:[%s14061_s15] sm:$0xff] }
 0xa19   :  { %v4513_v6 = vmax.f32 %v4511_v4, 0.0  ;;  %v11543_v4 = vpack.c.bf16 %v4801_v2, %v4800_v1 }
 0xa1a   :  { %v4516_v7 = vsel %vm620_vm0, %v4514_v55, 0.0  ;;  %v4525_v9 = vmul.f32 %v4514_v55, %v4514_v55 }
 0xa1b   :  { %v4515_v11 = vsel %vm620_vm0, %v4513_v6, 0.0  ;;  %v4524_v12 = vmul.f32 %v4513_v6, %v4513_v6 }
 0xa1c   :  { %v4517_v13 = vadd.f32 %v4516_v7, %v4515_v11  ;;  %v4527_v14 = vsel %vm620_vm0, %v4525_v9, 0.0 }
 0xa1d   :  { %v4526_v15 = vsel %vm620_vm0, %v4524_v12, 0.0  ;;  %v4804_v12 = vld [vmem:[%s14061_s15 + $0x20] sm:$0xff] }
 0xa1e   :  { %v4518_v17 = vrot.slane %v4517_v13, 4  ;;  %v4528_v20 = vadd.f32 %v4527_v14, %v4526_v15  ;;  %v4806_v15 = vld [vmem:[%s14061_s15 + $0x30] sm:$0xff] }
 0xa20   :  { %v4519_v18 = vadd.f32 %v4518_v17, %v4517_v13  ;;  %v4529_v23 = vrot.slane %v4528_v20, 4  ;;  %v4805_v13 = vld [vmem:[%s14061_s15 + $0x28] sm:$0xff]  ;;  %v4807_v17 = vld [vmem:[%s14061_s15 + $0x38] sm:$0xff] }
 0xa21   :  { %v11549_v14 = vpack.c.bf16 %v4805_v13, %v4804_v12  ;;  %v5359_v13 = vld [vmem:[#allocation28 + $0x10] sm:$0xff] }
 0xa22   :  { %v4520_v21 = vrot.slane %v4519_v18, 2  ;;  %v4530_v19 = vadd.f32 %v4529_v23, %v4528_v20  ;;  %v8568_v20 = vld [vmem:[%s14061_s15 + $0x80] sm:$0xff]  ;;  %v8570_v23 = vld [vmem:[%s14061_s15 + $0x90] sm:$0xff] }
 0xa24   :  { %v4521_v22 = vadd.f32 %v4520_v21, %v4519_v18  ;;  %v4531_v28 = vrot.slane %v4530_v19, 2  ;;  %v11552_v18 = vpack.c.bf16 %v4807_v17, %v4806_v15  ;;  %v8569_v21 = vld [vmem:[%s14061_s15 + $0x88] sm:$0xff] }
 0xa25   :  { %v8601_v17 = vld [vmem:[%s14061_s15 + $0x168] sm:$0xff] }
 0xa26   :  { %v4522_v24 = vrot.slane %v4521_v22, 1  ;;  %v4532_v5 = vadd.f32 %v4531_v28, %v4530_v19  ;;  %v8573_v28 = vld [vmem:[%s14061_s15 + $0xa8] sm:$0xff] }
 0xa28   :  { %v4523_v26 = vadd.f32 %v4522_v24, %v4521_v22  ;;  %v4533_v30 = vrot.slane %v4532_v5, 1  ;;  %v11555_v22 = vpack.c.bf16 %v8569_v21, %v8568_v20  ;;  %v8571_v24 = vld [vmem:[%s14061_s15 + $0x98] sm:$0xff]  ;;  %v8602_v21 = vld [vmem:[%s14061_s15 + $0x170] sm:$0xff] }
 0xa29   :  { %v11558_v19 = vpack.c.bf16 %v8571_v24, %v8570_v23  ;;  %v8609_v20 = vld [vmem:[%s14061_s15 + $0x198] sm:$0xff]  ;;  %v8610_v24 = vld [vmem:[%s14061_s15 + $0x1a0] sm:$0xff] }
 0xa2a   :  { %10373 = vmatmul.mubr.msk.f32.vlgmr.msra.gmra.mrb[36].mxu0 %vm620_vm0, %v4523_v26  ;;  %v4534_v10 = vadd.f32 %v4533_v30, %v4532_v5  ;;  %v8572_v26 = vld [vmem:[%s14061_s15 + $0xa0] sm:$0xff]  ;;  %v8574_v30 = vld [vmem:[%s14061_s15 + $0xb0] sm:$0xff]  ;;  %v8603_v23 = vld [vmem:[%s14061_s15 + $0x178] sm:$0xff] }
 0xa2b   :  { %11517 = vmatpush3.bf16.msra.mxu0 %v11504_v57  ;;  %10391 = vmatprep.mubr.msk.f32.mxu0 %vm12631_vm1, %v12632_v35  ;;  %v11561_v5 = vpack.c.bf16 %v8573_v28, %v8572_v26  ;;  %v11603_v26 = vpack.c.bf16 %v8603_v23, %v8602_v21 }
 0xa2c   :  { %11518 = vmatprep.subr.bf16.mxu0 %v12630_v29 }
 0xa2f   :  { %11520 = vmatpush3.bf16.msra.mxu0 %v11507_v60  ;;  %v8560_v60 = vld [vmem:[%s14061_s15 + $0x50] sm:$0xff] }
 0xa30   :  { %11521 = vmatprep.subr.bf16.mxu0 %v12630_v29  ;;  %v11534_v51 = vpack.c.bf16 %v8561_v61, %v8560_v60 }
 0xa33   :  { %11523 = vmatpush3.bf16.msra.mxu0 %v11510_v62  ;;  %v8562_v62 = vld [vmem:[%s14061_s15 + $0x60] sm:$0xff] }
 0xa34   :  { %11524 = vmatprep.subr.bf16.mxu0 %v12630_v29  ;;  %v11537_v63 = vpack.c.bf16 %v8563_v25, %v8562_v62 }
 0xa37   :  { %11526 = vmatpush3.bf16.msra.mxu0 %v11513_v48  ;;  %v8564_v48 = vld [vmem:[%s14061_s15 + $0x70] sm:$0xff] }
 0xa38   :  { %11527 = vmatprep.subr.bf16.mxu0 %v12630_v29  ;;  %v11540_v58 = vpack.c.bf16 %v8565_v0, %v8564_v48  ;;  %v8597_v48 = vld [vmem:[%s14061_s15 + $0x148] sm:$0xff] }
 0xa3a   :  { %10392 = vmatmul.mubr.msk.f32.vlgmr.msra.gmra.mrb[38].mxu0 %vm620_vm0, %v4534_v10  ;;  %v8575_v10 = vld [vmem:[%s14061_s15 + $0xb8] sm:$0xff] }
 0xa3b   :  { %10398 = vmatprep.mubr.msk.f32.mxu0 %vm12631_vm1, %v12632_v35 }
 0xafd   :  { %v4612_v31 = vpop.f32.mrb[36].mxu0 }
 0xafe   :  { %v10374_v8 = vpop.f32.mrb[37].mxu0  ;;  %v4616_v32 = vmul.f32 0.0078125, %v4612_v31  ;;  %v11564_v31 = vpack.c.bf16 %v8575_v10, %v8574_v30  ;;  %v8616_v30 = vld [vmem:[%s14061_s15 + $0x1c8] sm:$0xff] }
 0xaff   :  { %v5041_v8 = vld [vmem:[#allocation28 + $0x8] sm:$0xff] }
 0xb00   :  { %v4691_v33 = vmul.f32 %v4616_v32, %v4616_v32  ;;  %v4697_v39 = vrot.slane %v4616_v32, %v13529_v3  ;;  %v8578_v32 = vld [vmem:[%s14061_s15 + $0xc0] sm:$0xff] }
 0xb02   :  { %v4698_v40 = vsub.f32 %v4513_v6, %v4697_v39  ;;  %v4699_v43 = vsub.f32 %v4514_v55, %v4697_v39  ;;  %v4802_v55 = vld [vmem:[%s14061_s15 + $0x10] sm:$0xff]  ;;  %v4803_v6 = vld [vmem:[%s14061_s15 + $0x18] sm:$0xff] }
 0xb03   :  { %v11546_v11 = vpack.c.bf16 %v4803_v6, %v4802_v55  ;;  %v8599_v55 = vld [vmem:[%s14061_s15 + $0x158] sm:$0xff]  ;;  %v8606_v6 = vld [vmem:[%s14061_s15 + $0x180] sm:$0xff] }
 0xb04   :  { %v4706_v46 = vmul.f32 %v8555_v44, %v4698_v40  ;;  %v4707_v47 = vmul.f32 %v8555_v44, %v4699_v43  ;;  %v8589_v40 = vld [vmem:[%s14061_s15 + $0x110] sm:$0xff]  ;;  %v8590_v43 = vld [vmem:[%s14061_s15 + $0x118] sm:$0xff] }
 0xb0d   :  { %v4686_v16 = vpop.f32.mrb[38].mxu0 }
 0xb0e   :  { %v4690_v34 = vmul.f32 0.0078125, %v4686_v16  ;;  %v10393_v36 = vpop.f32.mrb[39].mxu0  ;;  %v8579_v16 = vld [vmem:[%s14061_s15 + $0xc8] sm:$0xff] }
 0xb0f   :  { %v8588_v36 = vld [vmem:[%s14061_s15 + $0x108] sm:$0xff] }
 0xb10   :  { %v4692_v37 = vsub.f32 %v4690_v34, %v4691_v33  ;;  %v8587_v33 = vld [vmem:[%s14061_s15 + $0x100] sm:$0xff]  ;;  %v11570_v34 = vpack.c.bf16 %v8579_v16, %v8578_v32 }
 0xb11   :  { %v11582_v39 = vpack.c.bf16 %v8588_v36, %v8587_v33  ;;  %v8619_v16 = vld [vmem:[%s14061_s15 + $0x1e0] sm:$0xff]  ;;  %v8620_v33 = vld [vmem:[%s14061_s15 + $0x1e8] sm:$0xff]  ;;  %v8612_v36 = vld [vmem:[%s14061_s15 + $0x1b0] sm:$0xff] }
 0xb12   :  { %v4708_v38 = vadd.f32 0.8, %v4692_v37  ;;  %v8580_v37 = vld [vmem:[%s14061_s15 + $0xd0] sm:$0xff] }
 0xb13   :  { %11583 = vmatpush3.bf16.msra.mxu1 %v11582_v39  ;;  %v8621_v39 = vld [vmem:[%s14061_s15 + $0x1f0] sm:$0xff] }
 0xb14   :  { %11972 = vrsqrt.f32 %v4708_v38  ;;  %v8581_v38 = vld [vmem:[%s14061_s15 + $0xd8] sm:$0xff]  ;;  %11584 = vmatprep.subr.bf16.mxu1 %v12630_v29 }
 0xb15   :  { %v11573_v44 = vpack.c.bf16 %v8581_v38, %v8580_v37  ;;  %v8613_v37 = vld [vmem:[%s14061_s15 + $0x1b8] sm:$0xff] }
 0xb16   :  { %v11618_v38 = vpack.c.bf16 %v8613_v37, %v8612_v36  ;;  %v5957_v37 = vld [vmem:[%s14062_s18] sm:$0xff] }
 0xb1e   :  { %v11973_v45 = vpop.eup %11972 }
 0xb1f   :  { %v4713_v49 = vrot.slane %v11973_v45, %v13529_v3  ;;  %v11585_v45 = vpack.c.bf16 %v8590_v43, %v8589_v40  ;;  %v8622_v40 = vld [vmem:[%s14061_s15 + $0x1f8] sm:$0xff] }
 0xb20   :  { %v11630_v43 = vpack.c.bf16 %v8622_v40, %v8621_v39  ;;  %v5959_v40 = vld [vmem:[%s14062_s18 + $0x10] sm:$0xff] }
 0xb21   :  { %v4714_v42 = vmul.f32 %v4713_v49, %v4706_v46  ;;  %v4715_v52 = vmul.f32 %v4713_v49, %v4707_v47  ;;  %v8582_v46 = vld [vmem:[%s14061_s15 + $0xe0] sm:$0xff]  ;;  %v8583_v47 = vld [vmem:[%s14061_s15 + $0xe8] sm:$0xff]  ;;  %11586 = vmatpush3.bf16.msra.mxu1 %v11585_v45 }
 0xb22   :  { %v8591_v49 = vld [vmem:[%s14061_s15 + $0x120] sm:$0xff]  ;;  %11587 = vmatprep.subr.bf16.mxu1 %v12630_v29  ;;  %v8625_v45 = vld [vmem:[%s14061_s15 + $0x208] sm:$0xff] }
 0xb23   :  { %v4723_v53 = vadd.f32 %v8556_v50, %v4714_v42  ;;  %v4724_v41 = vadd.f32 %v8556_v50, %v4715_v52  ;;  %v8592_v50 = vld [vmem:[%s14061_s15 + $0x128] sm:$0xff]  ;;  %v11576_v42 = vpack.c.bf16 %v8583_v47, %v8582_v46 }
 0xb24   :  { %v11588_v52 = vpack.c.bf16 %v8592_v50, %v8591_v49 }
 0xb25   :  { %v13607_v57 = vpack.c.bf16 %v4724_v41, %v4723_v53  ;;  %v8584_v53 = vld [vmem:[%s14061_s15 + $0xf0] sm:$0xff]  ;;  %v8585_v41 = vld [vmem:[%s14061_s15 + $0xf8] sm:$0xff] }
 0xb26   :  { %11589 = vmatpush3.bf16.msra.mxu1 %v11588_v52  ;;  %v11579_v27 = vpack.c.bf16 %v8585_v41, %v8584_v53  ;;  %v8626_v41 = vld [vmem:[%s14061_s15 + $0x210] sm:$0xff] }
 0xb27   :  { %11529 = vmatpush3.bf16.msra.mxu0 %v13607_v57  ;;  %11590 = vmatprep.subr.bf16.mxu1 %v12630_v29 }
 0xb28   :  { %11530 = vmatprep.subr.bf16.mxu0 %v12630_v29 }
 0xb2a   :  { %10399 = vmatmul.mubr.msk.f32.vlgmr.msra.gmra.mrb[40].mxu0 %vm4726_vm3, %v4725_v59  ;;  %v8594_v59 = vld [vmem:[%s14061_s15 + $0x138] sm:$0xff] }
 0xb2b   :  { %11532 = vmatpush3.bf16.msra.mxu0 %v11531_v56  ;;  %10417 = vmatprep.mubr.msk.f32.mxu0 %vm12631_vm1, %v12632_v35  ;;  %v11591_v56 = vpack.c.bf16 %v8594_v59, %v8593_v54  ;;  %v8627_v54 = vld [vmem:[%s14061_s15 + $0x218] sm:$0xff] }
 0xb2c   :  { %11533 = vmatprep.subr.bf16.mxu0 %v12630_v29 }
 0xb2d   :  { %11592 = vmatpush3.bf16.msra.mxu1 %v11591_v56  ;;  %v11636_v56 = vpack.c.bf16 %v8627_v54, %v8626_v41 }
 0xb2e   :  { %11605 = vmatprep.subr.bf16.mxu1 %v12630_v29 }
 0xb2f   :  { %11535 = vmatpush3.bf16.msra.mxu0 %v11534_v51 }
 0xb30   :  { %11536 = vmatprep.subr.bf16.mxu0 %v12630_v29 }
 0xb33   :  { %11538 = vmatpush3.bf16.msra.mxu0 %v11537_v63  ;;  %v8596_v63 = vld [vmem:[%s14061_s15 + $0x140] sm:$0xff] }
 0xb34   :  { %11539 = vmatprep.subr.bf16.mxu0 %v12630_v29  ;;  %v11594_v2 = vpack.c.bf16 %v8597_v48, %v8596_v63 }
 0xb37   :  { %11541 = vmatpush3.bf16.msra.mxu0 %v11540_v58 }
 0xb38   :  { %11542 = vmatprep.subr.bf16.mxu0 %v12630_v29 }
 0xbfd   :  { %v4796_v7 = vpop.f32.mrb[40].mxu0 }
 0xbfe   :  { %v10400_v9 = vpop.f32.mrb[41].mxu0  ;;  %10418 = vmatmul.mubr.msk.f32.vlgmr.msra.gmra.mrb[42].mxu0 %vm620_vm0, %v4796_v7 }
 0xbff   :  { %11544 = vmatpush3.bf16.msra.mxu0 %v11543_v4  ;;  %10436 = vmatprep.mubr.msk.f32.mxu0 %vm12631_vm1, %v12632_v35  ;;  %v8598_v4 = vld [vmem:[%s14061_s15 + $0x150] sm:$0xff] }
 0xc00   :  { %11545 = vmatprep.subr.bf16.mxu0 %v12630_v29  ;;  %v11597_v12 = vpack.c.bf16 %v8599_v55, %v8598_v4  ;;  %v5702_v55 = vld [vmem:[#allocation34 + $0x10] sm:$0xff] }
 0xc03   :  { %11547 = vmatpush3.bf16.msra.mxu0 %v11546_v11 }
 0xc04   :  { %11548 = vmatprep.subr.bf16.mxu0 %v12630_v29 }
 0xc07   :  { %11550 = vmatpush3.bf16.msra.mxu0 %v11549_v14  ;;  %v8600_v14 = vld [vmem:[%s14061_s15 + $0x160] sm:$0xff] }
 0xc08   :  { %11551 = vmatprep.subr.bf16.mxu0 %v12630_v29 }
 0xc0b   :  { %11553 = vmatpush3.bf16.msra.mxu0 %v11552_v18  ;;  %v8608_v18 = vld [vmem:[%s14061_s15 + $0x190] sm:$0xff] }
 0xc0c   :  { %11554 = vmatprep.subr.bf16.mxu0 %v12630_v29 }
 0xc0e   :  { %10437 = vmatmul.mubr.msk.f32.vlgmr.msra.gmra.mrb[44].mxu0 %vm620_vm0, %v4796_v7 }
 0xc0f   :  { %11556 = vmatpush3.bf16.msra.mxu0 %v11555_v22  ;;  %10455 = vmatprep.mubr.msk.f32.mxu0 %vm12631_vm1, %v12632_v35  ;;  %v11612_v22 = vpack.c.bf16 %v8609_v20, %v8608_v18  ;;  %v8633_v18 = vld [vmem:[#allocation29] ss:$0 sm:$0xff] }
 0xc10   :  { %11557 = vmatprep.subr.bf16.mxu0 %v12630_v29 }
 0xc13   :  { %11559 = vmatpush3.bf16.msra.mxu0 %v11558_v19  ;;  %v8611_v19 = vld [vmem:[%s14061_s15 + $0x1a8] sm:$0xff] }
 0xc14   :  { %11560 = vmatprep.subr.bf16.mxu0 %v12630_v29  ;;  %v11615_v28 = vpack.c.bf16 %v8611_v19, %v8610_v24 }
 0xc17   :  { %11562 = vmatpush3.bf16.msra.mxu0 %v11561_v5  ;;  %v8615_v5 = vld [vmem:[%s14061_s15 + $0x1c0] sm:$0xff] }
 0xc18   :  { %11563 = vmatprep.subr.bf16.mxu0 %v12630_v29  ;;  %v11621_v10 = vpack.c.bf16 %v8616_v30, %v8615_v5 }
 0xc1b   :  { %11565 = vmatpush3.bf16.msra.mxu0 %v11564_v31  ;;  %v8617_v31 = vld [vmem:[%s14061_s15 + $0x1d0] sm:$0xff] }
 0xc1c   :  { %11566 = vmatprep.subr.bf16.mxu0 %v12630_v29 }
 0xc1e   :  { %10456 = vmatmul.mubr.msk.f32.vlgmr.msra.gmra.mrb[46].mxu0 %vm620_vm0, %v4796_v7  ;;  %v8607_v7 = vld [vmem:[%s14061_s15 + $0x188] sm:$0xff] }
 0xc1f   :  { %11568 = vmatpush3.bf16.msra.mxu0 %v13607_v57  ;;  %10462 = vmatprep.mubr.msk.f32.mxu0 %vm12631_vm1, %v12632_v35  ;;  %v11609_v15 = vpack.c.bf16 %v8607_v7, %v8606_v6  ;;  %v5703_v6 = vld [vmem:[#allocation34 + $0x18] sm:$0xff] }
 0xc20   :  { %11569 = vmatprep.subr.bf16.mxu0 %v12630_v29  ;;  %v11648_v7 = vpack.c.bf16 %v5703_v6, %v5702_v55  ;;  %v8645_v55 = vld [vmem:[%s14062_s18 + $0x40] sm:$0xff]  ;;  %v8646_v6 = vld [vmem:[%s14062_s18 + $0x48] sm:$0xff] }
 0xc22   :  { %10463 = vmatmul.mubr.msk.f32.vlgmr.msra.gmra.mrb[48].mxu0 %vm4726_vm3, %v5041_v8  ;;  %v8618_v8 = vld [vmem:[%s14061_s15 + $0x1d8] sm:$0xff] }
 0xc23   :  { %10481 = vmatprep.mubr.msk.f32.mxu0 %vm12631_vm1, %v12632_v35  ;;  %11571 = vmatpush3.bf16.msra.mxu0 %v11570_v34  ;;  %v11624_v32 = vpack.c.bf16 %v8618_v8, %v8617_v31  ;;  %v11627_v34 = vpack.c.bf16 %v8620_v33, %v8619_v16 }
 0xc24   :  { %11572 = vmatprep.subr.bf16.mxu0 %v12630_v29 }
 0xc27   :  { %11574 = vmatpush3.bf16.msra.mxu0 %v11573_v44  ;;  %v8624_v44 = vld [vmem:[%s14061_s15 + $0x200] sm:$0xff] }
 0xc28   :  { %11575 = vmatprep.subr.bf16.mxu0 %v12630_v29  ;;  %v11633_v52 = vpack.c.bf16 %v8625_v45, %v8624_v44 }
 0xc2b   :  { %11577 = vmatpush3.bf16.msra.mxu0 %v11576_v42 }
 0xc2c   :  { %11578 = vmatprep.subr.bf16.mxu0 %v12630_v29 }
 0xc2f   :  { %11580 = vmatpush3.bf16.msra.mxu0 %v11579_v27 }
 0xc30   :  { %11593 = vmatprep.subr.bf16.mxu0 %v12630_v29 }
 0xcd1   :  { %v4886_v60 = vpop.f32.mrb[42].mxu0 }
 0xcd2   :  { %v10419_v61 = vpop.f32.mrb[43].mxu0 }
 0xcd3   :  { %v8629_v61 = vld [vmem:[%s14061_s15 + $0x228] sm:$0xff] }
 0xce1   :  { %v4956_v51 = vpop.f32.mrb[44].mxu0 }
 0xce2   :  { %v4957_v62 = vadd.f32 %v4956_v51, %v4886_v60  ;;  %v10438_v25 = vpop.f32.mrb[45].mxu0  ;;  %v8628_v60 = vld [vmem:[%s14061_s15 + $0x220] sm:$0xff] }
 0xce3   :  { %v11639_v51 = vpack.c.bf16 %v8629_v61, %v8628_v60  ;;  %v8631_v25 = vld [vmem:[%s14061_s15 + $0x238] sm:$0xff] }
 0xcf1   :  { %v5035_v0 = vpop.f32.mrb[46].mxu0 }
 0xcf2   :  { %v13688_v58 = vadd.f32 %v5035_v0, %v4957_v62  ;;  %v10457_v1 = vpop.f32.mrb[47].mxu0  ;;  %v8630_v62 = vld [vmem:[%s14061_s15 + $0x230] sm:$0xff] }
 0xcf3   :  { %v11642_v63 = vpack.c.bf16 %v8631_v25, %v8630_v62  ;;  %v5700_v1 = vld [vmem:[#allocation34] sm:$0xff] }
 0xcf4   :  { %v8639_v62 = vld [vmem:[%s14062_s18 + $0x20] sm:$0xff]  ;;  %v8640_v25 = vld [vmem:[%s14062_s18 + $0x28] sm:$0xff] }
 0xcf5   :  { %v5111_v9 = vpop.f32.mrb[48].mxu0 }
 0xcf6   :  { %v10464_v11 = vpop.f32.mrb[49].mxu0  ;;  %10482 = vmatmul.mubr.msk.f32.vlgmr.msra.gmra.mrb[50].mxu0 %vm620_vm0, %v5111_v9  ;;  %10501 = vmatmul.mubr.msk.f32.vlgmr.msra.gmra.mrb[24].mxu1 %vm620_vm0, %v5111_v9 }
 0xcf7   :  { %11595 = vmatpush3.bf16.msra.mxu0 %v11594_v2  ;;  %11607 = vmatpush3.bf16.msra.mxu1 %v13607_v57  ;;  %v11600_v57 = vpack.c.bf16 %v8601_v17, %v8600_v14  ;;  %v5701_v2 = vld [vmem:[#allocation34 + $0x8] sm:$0xff] }
 0xcf8   :  { %11596 = vmatprep.subr.bf16.mxu0 %v12630_v29  ;;  %10526 = vmatprep.mubr.msk.f32.mxu1 %vm12631_vm1, %v12632_v35  ;;  %v11645_v4 = vpack.c.bf16 %v5701_v2, %v5700_v1  ;;  %v8641_v1 = vld [vmem:[%s14062_s18 + $0x30] sm:$0xff]  ;;  %v8642_v2 = vld [vmem:[%s14062_s18 + $0x38] sm:$0xff] }
 0xcf9   :  { %10519 = vmatprep.mubr.msk.f32.mxu0 %vm12631_vm1, %v12632_v35  ;;  %11608 = vmatprep.subr.bf16.mxu1 %v12630_v29 }
 0xcfa   :  { %10527 = vmatmul.mubr.msk.f32.vlgmr.msra.gmra.mrb[26].mxu1 %vm4726_vm3, %v5359_v13 }
 0xcfb   :  { %11598 = vmatpush3.bf16.msra.mxu0 %v11597_v12  ;;  %11610 = vmatpush3.bf16.msra.mxu1 %v11609_v15 }
 0xcfc   :  { %11599 = vmatprep.subr.bf16.mxu0 %v12630_v29  ;;  %11611 = vmatprep.subr.bf16.mxu1 %v12630_v29 }
 0xcfd   :  { %10545 = vmatprep.mubr.msk.f32.mxu1 %vm12631_vm1, %v12632_v35 }
 0xcff   :  { %11601 = vmatpush3.bf16.msra.mxu0 %v11600_v57  ;;  %11613 = vmatpush3.bf16.msra.mxu1 %v11612_v22 }
 0xd00   :  { %11602 = vmatprep.subr.bf16.mxu0 %v12630_v29  ;;  %11614 = vmatprep.subr.bf16.mxu1 %v12630_v29 }
 0xd03   :  { %11604 = vmatpush3.bf16.msra.mxu0 %v11603_v26  ;;  %11616 = vmatpush3.bf16.msra.mxu1 %v11615_v28 }
 0xd04   :  { %11620 = vmatprep.subr.bf16.mxu0 %v12630_v29  ;;  %11617 = vmatprep.subr.bf16.mxu1 %v12630_v29 }
 0xd06   :  { %10520 = vmatmul.mubr.msk.f32.vlgmr.msra.gmra.mrb[52].mxu0 %vm620_vm0, %v5111_v9 }
 0xd07   :  { %11622 = vmatpush3.bf16.msra.mxu0 %v11621_v10  ;;  %10564 = vmatprep.mubr.msk.f32.mxu0 %vm12631_vm1, %v12632_v35 }
 0xd08   :  { %11623 = vmatprep.subr.bf16.mxu0 %v12630_v29  ;;  %11619 = vmatpush3.bf16.msra.mxu1 %v11618_v38  ;;  %v5958_v38 = vld [vmem:[%s14062_s18 + $0x8] sm:$0xff] }
 0xd09   :  { %11632 = vmatprep.subr.bf16.mxu1 %v12630_v29  ;;  %v11663_v39 = vpack.c.bf16 %v5958_v38, %v5957_v37  ;;  %v8664_v37 = vld [vmem:[%s14062_s18 + $0xb8] sm:$0xff]  ;;  %v8667_v38 = vld [vmem:[%s14062_s18 + $0xc0] sm:$0xff] }
 0xd0b   :  { %11625 = vmatpush3.bf16.msra.mxu0 %v11624_v32 }
 0xd0c   :  { %11626 = vmatprep.subr.bf16.mxu0 %v12630_v29 }
 0xd0f   :  { %11628 = vmatpush3.bf16.msra.mxu0 %v11627_v34 }
 0xd10   :  { %11629 = vmatprep.subr.bf16.mxu0 %v12630_v29 }
 0xd13   :  { %11631 = vmatpush3.bf16.msra.mxu0 %v11630_v43  ;;  %v5960_v43 = vld [vmem:[%s14062_s18 + $0x18] sm:$0xff] }
 0xd14   :  { %11644 = vmatprep.subr.bf16.mxu0 %v12630_v29  ;;  %v11666_v44 = vpack.c.bf16 %v5960_v43, %v5959_v40 }
 0xdc9   :  { %v5193_v46 = vpop.f32.mrb[50].mxu0  ;;  %v5273_v47 = vpop.f32.mrb[24].mxu1 }
 0xdca   :  { %v5197_v49 = vadd.f32 %v5193_v46, %v13688_v58  ;;  %v10483_v50 = vpop.f32.mrb[51].mxu0  ;;  %v10502_v42 = vpop.f32.mrb[25].mxu1 }
 0xdcc   :  { %v5277_v53 = vadd.f32 %v5273_v47, %v5197_v49 }
 0xdcd   :  { %v5429_v27 = vpop.f32.mrb[26].mxu1 }
 0xdce   :  { %v10528_v59 = vpop.f32.mrb[27].mxu1  ;;  %10546 = vmatmul.mubr.msk.f32.vlgmr.msra.gmra.mrb[28].mxu1 %vm620_vm0, %v5429_v27  ;;  %10565 = vmatmul.mubr.msk.f32.vlgmr.msra.gmra.mrb[54].mxu0 %vm620_vm0, %v5429_v27 }
 0xdcf   :  { %11634 = vmatpush3.bf16.msra.mxu1 %v11633_v52  ;;  %10583 = vmatprep.mubr.msk.f32.mxu1 %vm12631_vm1, %v12632_v35  ;;  %v8636_v59 = vld [vmem:[#allocation31] ss:$0 sm:$0xff] }
 0xdd0   :  { %11635 = vmatprep.subr.bf16.mxu1 %v12630_v29  ;;  %10594 = vmatprep.mubr.msk.f32.mxu0 %vm12631_vm1, %v12632_v35 }
 0xdd1   :  { %11646 = vmatpush3.bf16.msra.mxu0 %v11645_v4 }
 0xdd2   :  { %11647 = vmatprep.subr.bf16.mxu0 %v12630_v29 }
 0xdd3   :  { %11637 = vmatpush3.bf16.msra.mxu1 %v11636_v56 }
 0xdd4   :  { %11638 = vmatprep.subr.bf16.mxu1 %v12630_v29 }
 0xdd5   :  { %11649 = vmatpush3.bf16.msra.mxu0 %v11648_v7 }
 0xdd6   :  { %10608 = vmatprep.subr.mxu0 %v12632_v35 }
 0xdd7   :  { %11640 = vmatpush3.bf16.msra.mxu1 %v11639_v51  ;;  %v8637_v51 = vld [vmem:[#allocation32] ss:$0 sm:$0xff] }
 0xdd8   :  { %11641 = vmatprep.subr.bf16.mxu1 %v12630_v29 }
 0xdd9   :  { %v5353_v48 = vpop.f32.mrb[52].mxu0 }
 0xdda   :  { %v5357_v0 = vadd.f32 %v5353_v48, %v5277_v53  ;;  %v10521_v58 = vpop.f32.mrb[53].mxu0 }
 0xddb   :  { %11643 = vmatpush3.bf16.msra.mxu1 %v11642_v63  ;;  %v11657_v58 = vpack.c.bf16 %v8640_v25, %v8639_v62 }
 0xddc   :  { %11650 = vmatprep.subr.bf16.mxu1 %v12630_v29 }
 0xdde   :  { %10584 = vmatmul.mubr.msk.f32.vlgmr.msra.gmra.mrb[30].mxu1 %vm620_vm0, %v5429_v27 }
 0xddf   :  { %10605 = vmatprep.mubr.msk.f32.mxu1 %vm12631_vm1, %v12632_v35  ;;  %11652 = vmatpush3.bf16.msra.mxu1 %v11645_v4  ;;  %v11660_v4 = vpack.c.bf16 %v8642_v2, %v8641_v1  ;;  %v8679_v2 = vld [vmem:[%s14062_s18 + $0x110] sm:$0xff] }
 0xde0   :  { %11653 = vmatprep.subr.bf16.mxu1 %v12630_v29 }
 0xde3   :  { %11655 = vmatpush3.bf16.msra.mxu1 %v11648_v7  ;;  %v11669_v7 = vpack.c.bf16 %v8646_v6, %v8645_v55 }
 0xde4   :  { %11662 = vmatprep.subr.bf16.mxu1 %v12630_v29 }
 0xea1   :  { %v5511_v9 = vpop.f32.mrb[28].mxu1  ;;  %v5591_v11 = vpop.f32.mrb[54].mxu0 }
 0xea2   :  { %v5515_v12 = vadd.f32 %v5511_v9, %v5357_v0  ;;  %v10547_v13 = vpop.f32.mrb[29].mxu1  ;;  %v10566_v14 = vpop.f32.mrb[55].mxu0  ;;  %v5882_v0 = vld [vmem:[#allocation35] sm:$0xf]  ;;  %v8647_v9 = vld [vmem:[%s14062_s18 + $0x50] sm:$0xff] }
 0xea3   :  { %v8652_v13 = vld [vmem:[%s14062_s18 + $0x68] sm:$0xff] }
 0xea4   :  { %v5595_v15 = vadd.f32 %v5591_v11, %v5515_v12  ;;  %v8648_v11 = vld [vmem:[%s14062_s18 + $0x58] sm:$0xff]  ;;  %v8651_v12 = vld [vmem:[%s14062_s18 + $0x60] sm:$0xff] }
 0xeb1   :  { %v5671_v17 = vpop.f32.mrb[30].mxu1 }
 0xeb2   :  { %v5675_v20 = vadd.f32 %v5671_v17, %v5595_v15  ;;  %v10585_v57 = vpop.f32.mrb[31].mxu1  ;;  %v11672_v17 = vpack.c.bf16 %v8648_v11, %v8647_v9 }
 0xeb3   :  { %v8656_v57 = vld [vmem:[%s14062_s18 + $0x80] sm:$0xff] }
 0xeb4   :  { %v5683_v21 = vadd.f32 %v8633_v18, %v5675_v20  ;;  %v6186_v18 = vld [vmem:[#allocation35 + $0x4] sm:$0xf]  ;;  %v11675_v20 = vpack.c.bf16 %v8652_v13, %v8651_v12 }
 0xeb5   :  { %v6822_v13 = vld [vmem:[%s14063_s0] sm:$0xff] }
 0xeb6   :  { %v5684_v22 = vmax.f32 %v5683_v21, 0.0  ;;  %v8657_v21 = vld [vmem:[%s14062_s18 + $0x88] sm:$0xff] }
 0xeb8   :  { %v5685_v23 = vsel %vm3467_vm2, %v5684_v22, 0.0  ;;  %v5692_v24 = vmul.f32 %v5684_v22, %v5684_v22 }
 0xeb9   :  { %v5686_v19 = vrot.slane %v5685_v23, 4 }
 0xeba   :  { %v5693_v26 = vsel %vm3467_vm2, %v5692_v24, 0.0  ;;  %v8654_v24 = vld [vmem:[%s14062_s18 + $0x78] sm:$0xff] }
 0xebb   :  { %v5687_v28 = vadd.f32 %v5686_v19, %v5685_v23  ;;  %v5694_v5 = vrot.slane %v5693_v26, 4  ;;  %v8653_v23 = vld [vmem:[%s14062_s18 + $0x70] sm:$0xff] }
 0xebc   :  { %v8658_v19 = vld [vmem:[%s14062_s18 + $0x90] sm:$0xff] }
 0xebd   :  { %v5688_v30 = vrot.slane %v5687_v28, 2  ;;  %v5695_v10 = vadd.f32 %v5694_v5, %v5693_v26  ;;  %v11678_v26 = vpack.c.bf16 %v8654_v24, %v8653_v23 }
 0xebf   :  { %v5689_v31 = vadd.f32 %v5688_v30, %v5687_v28  ;;  %v5696_v8 = vrot.slane %v5695_v10, 2  ;;  %v8659_v28 = vld [vmem:[%s14062_s18 + $0x98] sm:$0xff]  ;;  %v8661_v30 = vld [vmem:[%s14062_s18 + $0xa0] sm:$0xff] }
 0xec0   :  { %v11684_v5 = vpack.c.bf16 %v8659_v28, %v8658_v19  ;;  %v8682_v28 = vld [vmem:[%s14064_s20] ss:$0 sm:$0xff] }
 0xec1   :  { %v5690_v32 = vrot.slane %v5689_v31, 1  ;;  %v5697_v16 = vadd.f32 %v5696_v8, %v5695_v10  ;;  %v8662_v10 = vld [vmem:[%s14062_s18 + $0xa8] sm:$0xff] }
 0xec3   :  { %v5691_v33 = vadd.f32 %v5690_v32, %v5689_v31  ;;  %v5698_v34 = vrot.slane %v5697_v16, 1 }
 0xec5   :  { %10595 = vmatmul.mubr.msk.f32.vlgmr.msra.gmra.mrb[56].mxu0 %vm3467_vm2, %v5691_v33  ;;  %v5699_v36 = vadd.f32 %v5698_v34, %v5697_v16  ;;  %v11687_v34 = vpack.c.bf16 %v8662_v10, %v8661_v30 }
 0xec6   :  { %10610 = vmatprep.mubr.msk.f32.mxu0 %vm12631_vm1, %v12632_v35 }
 0xec7   :  { %10606 = vmatmul.mubr.msk.f32.vlgmr.msra.gmra.mrb[32].mxu1 %vm3467_vm2, %v5699_v36  ;;  %v8663_v36 = vld [vmem:[%s14062_s18 + $0xb0] sm:$0xff] }
 0xec8   :  { %10632 = vmatprep.mubr.msk.f32.mxu1 %vm12631_vm1, %v12632_v35  ;;  %11664 = vmatpush3.bf16.msra.mxu1 %v11663_v39  ;;  %v8668_v39 = vld [vmem:[%s14062_s18 + $0xc8] sm:$0xff] }
 0xec9   :  { %11665 = vmatprep.subr.bf16.mxu1 %v12630_v29 }
 0xecc   :  { %11667 = vmatpush3.bf16.msra.mxu1 %v11666_v44  ;;  %v11690_v44 = vpack.c.bf16 %v8664_v37, %v8663_v36 }
 0xecd   :  { %10646 = vmatprep.subr.mxu1 %v12632_v35 }
 0xf98   :  { %v5773_v45 = vpop.f32.mrb[56].mxu0 }
 0xf99   :  { %v5777_v46 = vmul.f32 0.03125, %v5773_v45  ;;  %v10596_v47 = vpop.f32.mrb[57].mxu0  ;;  %v6492_v45 = vld [vmem:[#allocation35 + $0x8] sm:$0xf] }
 0xf9a   :  { %v5847_v49 = vpop.f32.mrb[32].mxu1  ;;  %v8672_v47 = vld [vmem:[%s14062_s18 + $0xe0] sm:$0xff] }
 0xf9b   :  { %v5852_v50 = vmul.f32 %v5777_v46, %v5777_v46  ;;  %v5851_v42 = vmul.f32 0.03125, %v5847_v49  ;;  %v10607_v52 = vpop.f32.mrb[33].mxu1  ;;  %v5858_v54 = vrot.slane %v5777_v46, %v13529_v3  ;;  %v11693_v46 = vpack.c.bf16 %v8668_v39, %v8667_v38  ;;  %v8673_v49 = vld [vmem:[%s14062_s18 + $0xe8] sm:$0xff] }
 0xf9d   :  { %v5853_v53 = vsub.f32 %v5851_v42, %v5852_v50  ;;  %v5859_v27 = vsub.f32 %v5684_v22, %v5858_v54  ;;  %v11681_v22 = vpack.c.bf16 %v8657_v21, %v8656_v57  ;;  %v8670_v54 = vld [vmem:[%s14062_s18 + $0xd8] sm:$0xff] }
 0xf9f   :  { %v5867_v41 = vadd.f32 0.8, %v5853_v53  ;;  %v5866_v60 = vmul.f32 %v8636_v59, %v5859_v27  ;;  %v11699_v53 = vpack.c.bf16 %v8673_v49, %v8672_v47  ;;  %v8674_v59 = vld [vmem:[%s14062_s18 + $0xf0] sm:$0xff]  ;;  %v7083_v49 = vld [vmem:[%s14065_s12] sm:$0xff] }
 0xfa1   :  { %11974 = vrsqrt.f32 %v5867_v41  ;;  %v8669_v41 = vld [vmem:[%s14062_s18 + $0xd0] sm:$0xff] }
 0xfa2   :  { %v11696_v27 = vpack.c.bf16 %v8670_v54, %v8669_v41 }
 0xfab   :  { %v11975_v56 = vpop.eup %11974 }
 0xfac   :  { %v5872_v61 = vrot.slane %v11975_v56, %v13529_v3  ;;  %v8675_v56 = vld [vmem:[%s14062_s18 + $0xf8] sm:$0xff] }
 0xfae   :  { %v5873_v63 = vmul.f32 %v5872_v61, %v5866_v60  ;;  %v11702_v60 = vpack.c.bf16 %v8675_v56, %v8674_v59  ;;  %v8677_v61 = vld [vmem:[%s14062_s18 + $0x100] sm:$0xff] }
 0xfb0   :  { %v13782_v48 = vadd.f32 %v8637_v51, %v5873_v63  ;;  %v8678_v51 = vld [vmem:[%s14062_s18 + $0x108] sm:$0xff] }
 0xfb2   :  { %10609 = vmatpush3.msra.mxu0 %v13782_v48 }
 0xfb3   :  { %10611 = vmatmul.mubr.msk.f32.vlgmr.msra.gmra.mrb[58].mxu0 %vm5883_vm4, %v5882_v0  ;;  %11656 = vmatprep.subr.bf16.mxu0 %v12630_v29 }
 0xfb4   :  { %11658 = vmatpush3.bf16.msra.mxu0 %v11657_v58  ;;  %10621 = vmatprep.mubr.msk.f32.mxu0 %vm12631_vm1, %v12632_v35  ;;  %v11705_v58 = vpack.c.bf16 %v8678_v51, %v8677_v61 }
 0xfb5   :  { %11659 = vmatprep.subr.bf16.mxu0 %v12630_v29 }
 0xfb8   :  { %11661 = vmatpush3.bf16.msra.mxu0 %v11660_v4  ;;  %v8680_v4 = vld [vmem:[%s14062_s18 + $0x118] sm:$0xff] }
 0xfb9   :  { %11668 = vmatprep.subr.bf16.mxu0 %v12630_v29 }
0x1086   :  { %v5953_v14 = vpop.f32.mrb[58].mxu0 }
0x1087   :  { %v10612_v15 = vpop.f32.mrb[59].mxu0  ;;  %10622 = vmatmul.mubr.msk.f32.vlgmr.msra.gmra.mrb[60].mxu0 %vm3467_vm2, %v5953_v14  ;;  %10633 = vmatmul.mubr.msk.f32.vlgmr.msra.gmra.mrb[34].mxu1 %vm3467_vm2, %v5953_v14 }
0x1088   :  { %11670 = vmatpush3.bf16.msra.mxu0 %v11669_v7  ;;  %10647 = vmatpush3.msra.mxu1 %v13782_v48  ;;  %v11708_v7 = vpack.c.bf16 %v8680_v4, %v8679_v2  ;;  %v8686_v4 = vld [vmem:[#allocation37] ss:$0 sm:$0xff] }
0x1089   :  { %11671 = vmatprep.subr.bf16.mxu0 %v12630_v29  ;;  %10648 = vmatprep.mubr.msk.f32.mxu1 %vm12631_vm1, %v12632_v35 }
0x108a   :  { %10643 = vmatprep.mubr.msk.f32.mxu0 %vm12631_vm1, %v12632_v35  ;;  %11674 = vmatprep.subr.bf16.mxu1 %v12630_v29 }
0x108b   :  { %10649 = vmatmul.mubr.msk.f32.vlgmr.msra.gmra.mrb[36].mxu1 %vm5883_vm4, %v6186_v18  ;;  %v6825_v18 = vld [vmem:[%s14063_s0 + $0x18] sm:$0xff] }
0x108c   :  { %11673 = vmatpush3.bf16.msra.mxu0 %v11672_v17  ;;  %11676 = vmatpush3.bf16.msra.mxu1 %v11675_v20  ;;  %v6824_v17 = vld [vmem:[%s14063_s0 + $0x10] sm:$0xff] }
0x108d   :  { %11680 = vmatprep.subr.bf16.mxu0 %v12630_v29  ;;  %11677 = vmatprep.subr.bf16.mxu1 %v12630_v29  ;;  %v11714_v20 = vpack.c.bf16 %v6825_v18, %v6824_v17  ;;  %v8695_v17 = vld [vmem:[%s14065_s12 + $0x40] sm:$0xff]  ;;  %v8696_v18 = vld [vmem:[%s14065_s12 + $0x48] sm:$0xff] }
0x108e   :  { %10659 = vmatprep.mubr.msk.f32.mxu1 %vm12631_vm1, %v12632_v35 }
0x108f   :  { %10644 = vmatmul.mubr.msk.f32.vlgmr.msra.gmra.mrb[62].mxu0 %vm3467_vm2, %v5953_v14  ;;  %v6823_v14 = vld [vmem:[%s14063_s0 + $0x8] sm:$0xff] }
0x1090   :  { %11682 = vmatpush3.bf16.msra.mxu0 %v11681_v22  ;;  %10670 = vmatprep.mubr.msk.f32.mxu0 %vm12631_vm1, %v12632_v35  ;;  %v11711_v15 = vpack.c.bf16 %v6823_v14, %v6822_v13  ;;  %v8691_v13 = vld [vmem:[%s14065_s12 + $0x30] sm:$0xff]  ;;  %v8692_v14 = vld [vmem:[%s14065_s12 + $0x38] sm:$0xff] }
0x1091   :  { %11683 = vmatprep.subr.bf16.mxu0 %v12630_v29  ;;  %11679 = vmatpush3.bf16.msra.mxu1 %v11678_v26 }
0x1092   :  { %11686 = vmatprep.subr.bf16.mxu1 %v12630_v29 }
0x1094   :  { %11685 = vmatpush3.bf16.msra.mxu0 %v11684_v5 }
0x1095   :  { %10684 = vmatprep.subr.mxu0 %v12632_v35 }
0x115a   :  { %v6035_v31 = vpop.f32.mrb[60].mxu0  ;;  %v6105_v8 = vpop.f32.mrb[34].mxu1 }
0x115b   :  { %v6106_v32 = vadd.f32 %v6105_v8, %v6035_v31  ;;  %v10623_v16 = vpop.f32.mrb[61].mxu0  ;;  %v10634_v33 = vpop.f32.mrb[35].mxu1 }
0x115e   :  { %v6256_v40 = vpop.f32.mrb[36].mxu1 }
0x115f   :  { %v10650_v43 = vpop.f32.mrb[37].mxu1  ;;  %10660 = vmatmul.mubr.msk.f32.vlgmr.msra.gmra.mrb[38].mxu1 %vm3467_vm2, %v6256_v40  ;;  %10671 = vmatmul.mubr.msk.f32.vlgmr.msra.gmra.mrb[64].mxu0 %vm3467_vm2, %v6256_v40 }
0x1160   :  { %11688 = vmatpush3.bf16.msra.mxu1 %v11687_v34  ;;  %10685 = vmatpush3.msra.mxu0 %v13782_v48 }
0x1161   :  { %11689 = vmatprep.subr.bf16.mxu1 %v12630_v29  ;;  %10686 = vmatprep.mubr.msk.f32.mxu0 %vm12631_vm1, %v12632_v35 }
0x1162   :  { %v6180_v50 = vpop.f32.mrb[62].mxu0  ;;  %10681 = vmatprep.mubr.msk.f32.mxu1 %vm12631_vm1, %v12632_v35  ;;  %11692 = vmatprep.subr.bf16.mxu0 %v12630_v29 }
0x1163   :  { %v6184_v42 = vadd.f32 %v6180_v50, %v6106_v32  ;;  %v10645_v52 = vpop.f32.mrb[63].mxu0  ;;  %10687 = vmatmul.mubr.msk.f32.vlgmr.msra.gmra.mrb[66].mxu0 %vm5883_vm4, %v6492_v45  ;;  %v7084_v50 = vld [vmem:[%s14065_s12 + $0x8] sm:$0xff] }
0x1164   :  { %11691 = vmatpush3.bf16.msra.mxu1 %v11690_v44  ;;  %11694 = vmatpush3.bf16.msra.mxu0 %v11693_v46  ;;  %v7085_v52 = vld [vmem:[%s14065_s12 + $0x10] sm:$0xff] }
0x1165   :  { %11698 = vmatprep.subr.bf16.mxu1 %v12630_v29  ;;  %11695 = vmatprep.subr.bf16.mxu0 %v12630_v29 }
0x1166   :  { %10697 = vmatprep.mubr.msk.f32.mxu0 %vm12631_vm1, %v12632_v35 }
0x1167   :  { %10682 = vmatmul.mubr.msk.f32.vlgmr.msra.gmra.mrb[40].mxu1 %vm3467_vm2, %v6256_v40 }
0x1168   :  { %11700 = vmatpush3.bf16.msra.mxu1 %v11699_v53  ;;  %10708 = vmatprep.mubr.msk.f32.mxu1 %vm12631_vm1, %v12632_v35  ;;  %v7086_v53 = vld [vmem:[%s14065_s12 + $0x18] sm:$0xff] }
0x1169   :  { %11701 = vmatprep.subr.bf16.mxu1 %v12630_v29  ;;  %11697 = vmatpush3.bf16.msra.mxu0 %v11696_v27  ;;  %v11732_v41 = vpack.c.bf16 %v7086_v53, %v7085_v52 }
0x116a   :  { %11704 = vmatprep.subr.bf16.mxu0 %v12630_v29 }
0x116c   :  { %11703 = vmatpush3.bf16.msra.mxu1 %v11702_v60 }
0x116d   :  { %11710 = vmatprep.subr.bf16.mxu1 %v12630_v29 }
0x1232   :  { %v6334_v62 = vpop.f32.mrb[38].mxu1  ;;  %v6410_v25 = vpop.f32.mrb[64].mxu0 }
0x1233   :  { %v6338_v63 = vadd.f32 %v6334_v62, %v6184_v42  ;;  %v10661_v48 = vpop.f32.mrb[39].mxu1  ;;  %v10672_v0 = vpop.f32.mrb[65].mxu0  ;;  %v11729_v42 = vpack.c.bf16 %v7084_v50, %v7083_v49  ;;  %v8715_v49 = vld [vmem:[%s14065_s12 + $0xb8] sm:$0xff]  ;;  %v8719_v50 = vld [vmem:[%s14065_s12 + $0xc0] sm:$0xff] }
0x1234   :  { %v8685_v0 = vld [vmem:[%s14066_s6] ss:$0 sm:$0xff] }
0x1235   :  { %v6414_v1 = vadd.f32 %v6410_v25, %v6338_v63 }
0x1236   :  { %v6562_v55 = vpop.f32.mrb[66].mxu0 }
0x1237   :  { %v10688_v6 = vpop.f32.mrb[67].mxu0  ;;  %10698 = vmatmul.mubr.msk.f32.vlgmr.msra.gmra.mrb[68].mxu0 %vm3467_vm2, %v6562_v55  ;;  %10709 = vmatmul.mubr.msk.f32.vlgmr.msra.gmra.mrb[42].mxu1 %vm3467_vm2, %v6562_v55 }
0x1238   :  { %11706 = vmatpush3.bf16.msra.mxu0 %v11705_v58  ;;  %10719 = vmatprep.mubr.msk.f32.mxu0 %vm12631_vm1, %v12632_v35  ;;  %v8690_v6 = vld [vmem:[%s14065_s12 + $0x28] sm:$0xff] }
0x1239   :  { %11707 = vmatprep.subr.bf16.mxu0 %v12630_v29  ;;  %10730 = vmatprep.mubr.msk.f32.mxu1 %vm12631_vm1, %v12632_v35 }
0x123a   :  { %v6486_v9 = vpop.f32.mrb[40].mxu1  ;;  %11712 = vmatpush3.bf16.msra.mxu1 %v11711_v15 }
0x123b   :  { %v6490_v11 = vadd.f32 %v6486_v9, %v6414_v1  ;;  %v10683_v12 = vpop.f32.mrb[41].mxu1  ;;  %11713 = vmatprep.subr.bf16.mxu1 %v12630_v29 }
0x123c   :  { %11709 = vmatpush3.bf16.msra.mxu0 %v11708_v7 }
0x123d   :  { %11716 = vmatprep.subr.bf16.mxu0 %v12630_v29 }
0x123e   :  { %11715 = vmatpush3.bf16.msra.mxu1 %v11714_v20 }
0x123f   :  { %10720 = vmatmul.mubr.msk.f32.vlgmr.msra.gmra.mrb[70].mxu0 %vm3467_vm2, %v6562_v55  ;;  %10744 = vmatprep.subr.mxu1 %v12632_v35  ;;  %v8689_v55 = vld [vmem:[%s14065_s12 + $0x20] sm:$0xff] }
0x1240   :  { %10741 = vmatprep.mubr.msk.f32.mxu0 %vm12631_vm1, %v12632_v35  ;;  %11718 = vmatpush3.bf16.msra.mxu0 %v11711_v15  ;;  %v11723_v12 = vpack.c.bf16 %v8690_v6, %v8689_v55  ;;  %v11726_v15 = vpack.c.bf16 %v8692_v14, %v8691_v13  ;;  %v8731_v14 = vld [vmem:[%s14065_s12 + $0x110] sm:$0xff] }
0x1241   :  { %11719 = vmatprep.subr.bf16.mxu0 %v12630_v29 }
0x1244   :  { %11721 = vmatpush3.bf16.msra.mxu0 %v11714_v20  ;;  %v11735_v20 = vpack.c.bf16 %v8696_v18, %v8695_v17 }
0x1245   :  { %11728 = vmatprep.subr.bf16.mxu0 %v12630_v29 }
0x130a   :  { %v6640_v57 = vpop.f32.mrb[68].mxu0  ;;  %v6716_v21 = vpop.f32.mrb[42].mxu1 }
0x130b   :  { %v6644_v22 = vadd.f32 %v6640_v57, %v6490_v11  ;;  %v10699_v23 = vpop.f32.mrb[69].mxu0  ;;  %v10710_v24 = vpop.f32.mrb[43].mxu1  ;;  %v7004_v11 = vld [vmem:[#allocation38] sm:$0x3] }
0x130c   :  { %v8697_v57 = vld [vmem:[%s14065_s12 + $0x50] sm:$0xff]  ;;  %v8703_v23 = vld [vmem:[%s14065_s12 + $0x68] sm:$0xff] }
0x130d   :  { %v6720_v19 = vadd.f32 %v6716_v21, %v6644_v22  ;;  %v8698_v21 = vld [vmem:[%s14065_s12 + $0x58] sm:$0xff]  ;;  %v8702_v22 = vld [vmem:[%s14065_s12 + $0x60] sm:$0xff] }
0x1312   :  { %v6792_v26 = vpop.f32.mrb[70].mxu0 }
0x1313   :  { %v6796_v5 = vadd.f32 %v6792_v26, %v6720_v19  ;;  %v10721_v30 = vpop.f32.mrb[71].mxu0  ;;  %v11738_v26 = vpack.c.bf16 %v8698_v21, %v8697_v57 }
0x1314   :  { %v8707_v30 = vld [vmem:[%s14065_s12 + $0x80] sm:$0xff] }
0x1315   :  { %v6804_v10 = vadd.f32 %v8682_v28, %v6796_v5  ;;  %v7312_v28 = vld [vmem:[#allocation38 + $0x2] sm:$0x3]  ;;  %v11741_v5 = vpack.c.bf16 %v8703_v23, %v8702_v22  ;;  %v7948_v23 = vld [vmem:[%s12821_s5] sm:$0xff] }
0x1317   :  { %v6805_v31 = vmax.f32 %v6804_v10, 0.0  ;;  %v8708_v10 = vld [vmem:[%s14065_s12 + $0x88] sm:$0xff] }
0x1319   :  { %v6807_v8 = vsel %vm6806_vm5, %v6805_v31, 0.0  ;;  %v6814_v32 = vmul.f32 %v6805_v31, %v6805_v31 }
0x131a   :  { %v6808_v16 = vrot.slane %v6807_v8, 4 }
0x131b   :  { %v6815_v33 = vsel %vm6806_vm5, %v6814_v32, 0.0  ;;  %v11747_v32 = vpack.c.bf16 %v8708_v10, %v8707_v30 }
0x131c   :  { %v6809_v34 = vadd.f32 %v6808_v16, %v6807_v8  ;;  %v6816_v36 = vrot.slane %v6815_v33, 4  ;;  %v8705_v8 = vld [vmem:[%s14065_s12 + $0x78] sm:$0xff] }
0x131e   :  { %v6810_v37 = vrot.slane %v6809_v34, 2  ;;  %v6817_v38 = vadd.f32 %v6816_v36, %v6815_v33  ;;  %v8709_v33 = vld [vmem:[%s14065_s12 + $0x90] sm:$0xff] }
0x1320   :  { %v6811_v39 = vadd.f32 %v6810_v37, %v6809_v34  ;;  %v6818_v40 = vrot.slane %v6817_v38, 2  ;;  %v8710_v34 = vld [vmem:[%s14065_s12 + $0x98] sm:$0xff]  ;;  %v8712_v37 = vld [vmem:[%s14065_s12 + $0xa0] sm:$0xff] }
0x1321   :  { %v11750_v36 = vpack.c.bf16 %v8710_v34, %v8709_v33 }
0x1322   :  { %v6812_v43 = vrot.slane %v6811_v39, 1  ;;  %v6819_v44 = vadd.f32 %v6818_v40, %v6817_v38  ;;  %v8713_v38 = vld [vmem:[%s14065_s12 + $0xa8] sm:$0xff] }
0x1324   :  { %v6813_v45 = vadd.f32 %v6812_v43, %v6811_v39  ;;  %v6820_v46 = vrot.slane %v6819_v44, 1 }
0x1326   :  { %10731 = vmatmul.mubr.msk.f32.vlgmr.msra.gmra.mrb[44].mxu1 %vm3467_vm2, %v6813_v45  ;;  %v6821_v47 = vadd.f32 %v6820_v46, %v6819_v44  ;;  %v11753_v46 = vpack.c.bf16 %v8713_v38, %v8712_v37 }
0x1327   :  { %10746 = vmatprep.mubr.msk.f32.mxu1 %vm12631_vm1, %v12632_v35 }
0x1328   :  { %10742 = vmatmul.mubr.msk.f32.vlgmr.msra.gmra.mrb[72].mxu0 %vm3467_vm2, %v6821_v47  ;;  %v8714_v47 = vld [vmem:[%s14065_s12 + $0xb0] sm:$0xff] }
0x1329   :  { %10768 = vmatprep.mubr.msk.f32.mxu0 %vm12631_vm1, %v12632_v35  ;;  %11730 = vmatpush3.bf16.msra.mxu0 %v11729_v42  ;;  %v8720_v42 = vld [vmem:[%s14065_s12 + $0xc8] sm:$0xff] }
0x132a   :  { %11731 = vmatprep.subr.bf16.mxu0 %v12630_v29 }
0x132d   :  { %11733 = vmatpush3.bf16.msra.mxu0 %v11732_v41  ;;  %v11756_v41 = vpack.c.bf16 %v8715_v49, %v8714_v47 }
0x132e   :  { %10782 = vmatprep.subr.mxu0 %v12632_v35 }
0x13f9   :  { %v6895_v54 = vpop.f32.mrb[44].mxu1 }
0x13fa   :  { %v6899_v27 = vmul.f32 0.125, %v6895_v54  ;;  %v10732_v59 = vpop.f32.mrb[45].mxu1  ;;  %v7618_v54 = vld [vmem:[#allocation38 + $0x4] sm:$0x3] }
0x13fb   :  { %v6969_v56 = vpop.f32.mrb[72].mxu0 }
0x13fc   :  { %v6974_v60 = vmul.f32 %v6899_v27, %v6899_v27  ;;  %v6973_v61 = vmul.f32 0.125, %v6969_v56  ;;  %v10743_v51 = vpop.f32.mrb[73].mxu0  ;;  %v6980_v63 = vrot.slane %v6899_v27, %v13529_v3  ;;  %v11759_v27 = vpack.c.bf16 %v8720_v42, %v8719_v50 }
0x13fd   :  { %v8725_v51 = vld [vmem:[%s14065_s12 + $0xe8] sm:$0xff] }
0x13fe   :  { %v6975_v62 = vsub.f32 %v6973_v61, %v6974_v60  ;;  %v6981_v48 = vsub.f32 %v6805_v31, %v6980_v63  ;;  %v8704_v31 = vld [vmem:[%s14065_s12 + $0x70] sm:$0xff]  ;;  %v8724_v61 = vld [vmem:[%s14065_s12 + $0xe0] sm:$0xff]  ;;  %v8722_v63 = vld [vmem:[%s14065_s12 + $0xd8] sm:$0xff] }
0x13ff   :  { %v11744_v16 = vpack.c.bf16 %v8705_v8, %v8704_v31 }
0x1400   :  { %v6989_v25 = vadd.f32 0.8, %v6975_v62  ;;  %v6988_v1 = vmul.f32 %v8685_v0, %v6981_v48  ;;  %v11765_v62 = vpack.c.bf16 %v8725_v51, %v8724_v61  ;;  %v8726_v0 = vld [vmem:[%s14065_s12 + $0xf0] sm:$0xff] }
0x1402   :  { %11976 = vrsqrt.f32 %v6989_v25  ;;  %v8721_v25 = vld [vmem:[%s14065_s12 + $0xd0] sm:$0xff] }
0x1403   :  { %v11762_v48 = vpack.c.bf16 %v8722_v63, %v8721_v25 }
0x140c   :  { %v11977_v58 = vpop.eup %11976 }
0x140d   :  { %v6994_v2 = vrot.slane %v11977_v58, %v13529_v3  ;;  %v8727_v58 = vld [vmem:[%s14065_s12 + $0xf8] sm:$0xff] }
0x140f   :  { %v6995_v7 = vmul.f32 %v6994_v2, %v6988_v1  ;;  %v11768_v1 = vpack.c.bf16 %v8727_v58, %v8726_v0  ;;  %v8729_v2 = vld [vmem:[%s14065_s12 + $0x100] sm:$0xff] }
0x1411   :  { %v13898_v9 = vadd.f32 %v8686_v4, %v6995_v7  ;;  %v8730_v4 = vld [vmem:[%s14065_s12 + $0x108] sm:$0xff] }
0x1413   :  { %10745 = vmatpush3.msk.msra.mxu1 %vm7009_vm6, %v13898_v9 }
0x1414   :  { %10747 = vmatmul.mubr.msk.f32.vlgmr.msra.gmra.mrb[46].mxu1 %vm7005_vm7, %v7004_v11  ;;  %11722 = vmatprep.subr.bf16.mxu1 %v12630_v29 }
0x1415   :  { %11724 = vmatpush3.bf16.msra.mxu1 %v11723_v12  ;;  %10757 = vmatprep.mubr.msk.f32.mxu1 %vm12631_vm1, %v12632_v35  ;;  %v11771_v12 = vpack.c.bf16 %v8730_v4, %v8729_v2 }
0x1416   :  { %11725 = vmatprep.subr.bf16.mxu1 %v12630_v29 }
0x1419   :  { %11727 = vmatpush3.bf16.msra.mxu1 %v11726_v15  ;;  %v8732_v15 = vld [vmem:[%s14065_s12 + $0x118] sm:$0xff] }
0x141a   :  { %11734 = vmatprep.subr.bf16.mxu1 %v12630_v29 }
0x14e7   :  { %v7079_v24 = vpop.f32.mrb[46].mxu1 }
0x14e8   :  { %10758 = vmatmul.mubr.msk.f32.vlgmr.msra.gmra.mrb[48].mxu1 %vm3467_vm2, %v7079_v24  ;;  %10769 = vmatmul.mubr.msk.f32.vlgmr.msra.gmra.mrb[74].mxu0 %vm3467_vm2, %v7079_v24  ;;  %v10748_v19 = vpop.f32.mrb[47].mxu1 }
0x14e9   :  { %11736 = vmatpush3.bf16.msra.mxu1 %v11735_v20  ;;  %10783 = vmatpush3.msk.msra.mxu0 %vm7009_vm6, %v13898_v9  ;;  %v11774_v20 = vpack.c.bf16 %v8732_v15, %v8731_v14 }
0x14ea   :  { %11737 = vmatprep.subr.bf16.mxu1 %v12630_v29  ;;  %10784 = vmatprep.mubr.msk.f32.mxu0 %vm12631_vm1, %v12632_v35 }
0x14eb   :  { %10779 = vmatprep.mubr.msk.f32.mxu1 %vm12631_vm1, %v12632_v35  ;;  %11740 = vmatprep.subr.bf16.mxu0 %v12630_v29 }
0x14ec   :  { %10785 = vmatmul.mubr.msk.f32.vlgmr.msra.gmra.mrb[76].mxu0 %vm7005_vm7, %v7312_v28 }
0x14ed   :  { %11739 = vmatpush3.bf16.msra.mxu1 %v11738_v26  ;;  %11742 = vmatpush3.bf16.msra.mxu0 %v11741_v5 }
0x14ee   :  { %11746 = vmatprep.subr.bf16.mxu1 %v12630_v29  ;;  %11743 = vmatprep.subr.bf16.mxu0 %v12630_v29 }
0x14ef   :  { %10795 = vmatprep.mubr.msk.f32.mxu0 %vm12631_vm1, %v12632_v35 }
0x14f0   :  { %10780 = vmatmul.mubr.msk.f32.vlgmr.msra.gmra.mrb[50].mxu1 %vm3467_vm2, %v7079_v24  ;;  %v7949_v24 = vld [vmem:[%s12821_s5 + $0x8] sm:$0xff]  ;;  %s14067_s5 = sld [smem:[#allocation74_spill]] }
0x14f1   :  { %11748 = vmatpush3.bf16.msra.mxu1 %v11747_v32  ;;  %11745 = vmatpush3.bf16.msra.mxu0 %v11744_v16  ;;  %v11777_v19 = vpack.c.bf16 %v7949_v24, %v7948_v23  ;;  %v8734_v32 = vld [vmem:[#allocation40] ss:$0 sm:$0xff] }
0x14f2   :  { %11749 = vmatprep.subr.bf16.mxu1 %v12630_v29  ;;  %10806 = vmatprep.mubr.msk.f32.mxu1 %vm12631_vm1, %v12632_v35 }
0x14f3   :  { %11752 = vmatprep.subr.bf16.mxu0 %v12630_v29 }
0x14f5   :  { %11751 = vmatpush3.bf16.msra.mxu1 %v11750_v36 }
0x14f6   :  { %10820 = vmatprep.subr.mxu1 %v12632_v35  ;;  %v8737_v58 = vld [vmem:[%s14067_s5] ss:$0 sm:$0xff] }
0x15bb   :  { %v7161_v39 = vpop.f32.mrb[48].mxu1  ;;  %v7231_v40 = vpop.f32.mrb[74].mxu0 }
0x15bc   :  { %v7232_v43 = vadd.f32 %v7231_v40, %v7161_v39  ;;  %v10759_v44 = vpop.f32.mrb[49].mxu1  ;;  %v10770_v45 = vpop.f32.mrb[75].mxu0 }
0x15bf   :  { %v7382_v52 = vpop.f32.mrb[76].mxu0 }
0x15c0   :  { %10796 = vmatmul.mubr.msk.f32.vlgmr.msra.gmra.mrb[78].mxu0 %vm3467_vm2, %v7382_v52  ;;  %10807 = vmatmul.mubr.msk.f32.vlgmr.msra.gmra.mrb[52].mxu1 %vm3467_vm2, %v7382_v52  ;;  %v10786_v53 = vpop.f32.mrb[77].mxu0 }
0x15c1   :  { %11754 = vmatpush3.bf16.msra.mxu0 %v11753_v46  ;;  %10821 = vmatpush3.msk.msra.mxu1 %vm7009_vm6, %v13898_v9 }
0x15c2   :  { %11755 = vmatprep.subr.bf16.mxu0 %v12630_v29  ;;  %10822 = vmatprep.mubr.msk.f32.mxu1 %vm12631_vm1, %v12632_v35 }
0x15c3   :  { %v7306_v59 = vpop.f32.mrb[50].mxu1  ;;  %10817 = vmatprep.mubr.msk.f32.mxu0 %vm12631_vm1, %v12632_v35  ;;  %11758 = vmatprep.subr.bf16.mxu1 %v12630_v29 }
0x15c4   :  { %v7310_v56 = vadd.f32 %v7306_v59, %v7232_v43  ;;  %v10781_v60 = vpop.f32.mrb[51].mxu1  ;;  %10823 = vmatmul.mubr.msk.f32.vlgmr.msra.gmra.mrb[54].mxu1 %vm7005_vm7, %v7618_v54  ;;  %v8129_v54 = vld [vmem:[%s12826_s14 + $0x8] sm:$0xff] }
0x15c5   :  { %11757 = vmatpush3.bf16.msra.mxu0 %v11756_v41  ;;  %11760 = vmatpush3.bf16.msra.mxu1 %v11759_v27  ;;  %v8128_v41 = vld [vmem:[%s12826_s14] sm:$0xff] }
0x15c6   :  { %11764 = vmatprep.subr.bf16.mxu0 %v12630_v29  ;;  %11761 = vmatprep.subr.bf16.mxu1 %v12630_v29  ;;  %v11783_v27 = vpack.c.bf16 %v8129_v54, %v8128_v41 }
0x15c7   :  { %10833 = vmatprep.mubr.msk.f32.mxu1 %vm12631_vm1, %v12632_v35 }
0x15c8   :  { %10818 = vmatmul.mubr.msk.f32.vlgmr.msra.gmra.mrb[80].mxu0 %vm3467_vm2, %v7382_v52 }
0x15c9   :  { %10844 = vmatprep.mubr.msk.f32.mxu0 %vm12631_vm1, %v12632_v35  ;;  %11766 = vmatpush3.bf16.msra.mxu0 %v11765_v62 }
0x15ca   :  { %11767 = vmatprep.subr.bf16.mxu0 %v12630_v29  ;;  %11763 = vmatpush3.bf16.msra.mxu1 %v11762_v48 }
0x15cb   :  { %11770 = vmatprep.subr.bf16.mxu1 %v12630_v29 }
0x15cd   :  { %11769 = vmatpush3.bf16.msra.mxu0 %v11768_v1 }
0x15ce   :  { %11776 = vmatprep.subr.bf16.mxu0 %v12630_v29 }
0x1693   :  { %v7460_v55 = vpop.f32.mrb[78].mxu0  ;;  %v7536_v6 = vpop.f32.mrb[52].mxu1 }
0x1694   :  { %v7464_v7 = vadd.f32 %v7460_v55, %v7310_v56  ;;  %v10797_v9 = vpop.f32.mrb[79].mxu0  ;;  %v10808_v11 = vpop.f32.mrb[53].mxu1  ;;  %v8738_v55 = vld [vmem:[%s14068_s23] ss:$0 sm:$0xff] }
0x1695   :  { %v8739_v9 = vld [vmem:[#allocation2] ss:$0 sm:$0xff] }
0x1696   :  { %v7540_v13 = vadd.f32 %v7536_v6, %v7464_v7 }
0x1697   :  { %v7688_v17 = vpop.f32.mrb[54].mxu1 }
0x1698   :  { %10834 = vmatmul.mubr.msk.f32.vlgmr.msra.gmra.mrb[56].mxu1 %vm3467_vm2, %v7688_v17  ;;  %v10824_v18 = vpop.f32.mrb[55].mxu1  ;;  %10845 = vmatmul.mubr.msk.f32.vlgmr.msra.gmra.mrb[82].mxu0 %vm3467_vm2, %v7688_v17 }
0x1699   :  { %11772 = vmatpush3.bf16.msra.mxu1 %v11771_v12  ;;  %10855 = vmatprep.mubr.msk.f32.mxu1 %vm12631_vm1, %v12632_v35 }
0x169a   :  { %11773 = vmatprep.subr.bf16.mxu1 %v12630_v29  ;;  %10862 = vmatprep.mubr.msk.f32.mxu0 %vm12631_vm1, %v12632_v35 }
0x169b   :  { %v7612_v57 = vpop.f32.mrb[80].mxu0  ;;  %11778 = vmatpush3.bf16.msra.mxu0 %v11777_v19 }
0x169c   :  { %v7616_v21 = vadd.f32 %v7612_v57, %v7540_v13  ;;  %v10819_v22 = vpop.f32.mrb[81].mxu0  ;;  %11779 = vmatprep.subr.bf16.mxu0 %v12630_v29 }
0x169d   :  { %11775 = vmatpush3.bf16.msra.mxu1 %v11774_v20 }
0x169e   :  { %11782 = vmatprep.subr.bf16.mxu1 %v12630_v29 }
0x16a0   :  { %10856 = vmatmul.mubr.msk.f32.vlgmr.msra.gmra.mrb[58].mxu1 %vm3467_vm2, %v7688_v17 }
0x16a1   :  { %10876 = vmatprep.mubr.msk.f32.mxu1 %vm12631_vm1, %v12632_v35  ;;  %11784 = vmatpush3.bf16.msra.mxu1 %v11783_v27 }
0x176b   :  { %v7766_v26 = vpop.f32.mrb[56].mxu1  ;;  %v7842_v28 = vpop.f32.mrb[82].mxu0 }
0x176c   :  { %v7770_v5 = vadd.f32 %v7766_v26, %v7616_v21  ;;  %v10835_v30 = vpop.f32.mrb[57].mxu1  ;;  %v10846_v10 = vpop.f32.mrb[83].mxu0 }
0x176e   :  { %v7846_v31 = vadd.f32 %v7842_v28, %v7770_v5 }
0x1773   :  { %v7918_v8 = vpop.f32.mrb[58].mxu1 }
0x1774   :  { %v7922_v16 = vadd.f32 %v7918_v8, %v7846_v31  ;;  %v10857_v33 = vpop.f32.mrb[59].mxu1 }
0x1776   :  { %v7930_v34 = vadd.f32 %v8734_v32, %v7922_v16 }
0x1778   :  { %v7931_v36 = vmax.f32 %v7930_v34, 0.0 }
0x177a   :  { %v7933_v37 = vsel %vm7932_vm8, %v7931_v36, 0.0  ;;  %v7940_v38 = vmul.f32 %v7931_v36, %v7931_v36 }
0x177b   :  { %v7934_v39 = vrot.slane %v7933_v37, 4 }
0x177c   :  { %v7941_v40 = vsel %vm7932_vm8, %v7940_v38, 0.0 }
0x177d   :  { %v7935_v43 = vadd.f32 %v7934_v39, %v7933_v37  ;;  %v7942_v29 = vrot.slane %v7941_v40, 4 }
0x177f   :  { %v7936_v44 = vrot.slane %v7935_v43, 2  ;;  %v7943_v45 = vadd.f32 %v7942_v29, %v7941_v40 }
0x1781   :  { %v7937_v46 = vadd.f32 %v7936_v44, %v7935_v43  ;;  %v7944_v47 = vrot.slane %v7943_v45, 2 }
0x1783   :  { %v7938_v49 = vrot.slane %v7937_v46, 1  ;;  %v7945_v50 = vadd.f32 %v7944_v47, %v7943_v45 }
0x1785   :  { %v7939_v42 = vadd.f32 %v7938_v49, %v7937_v46  ;;  %v7946_v52 = vrot.slane %v7945_v50, 1 }
0x1787   :  { %10863 = vmatmul.mubr.msk.f32.vlgmr.msra.gmra.mrb[84].mxu0 %vm4726_vm3, %v7939_v42  ;;  %v7947_v53 = vadd.f32 %v7946_v52, %v7945_v50 }
0x1788   :  { %11781 = vmatpush3.bf16.msra.mxu0 %v11777_v19  ;;  %10869 = vmatprep.mubr.msk.f32.mxu0 %vm12631_vm1, %v12632_v35 }
0x178b   :  { %10870 = vmatmul.mubr.msk.f32.vlgmr.msra.gmra.mrb[86].mxu0 %vm4726_vm3, %v7947_v53 }
0x185a   :  { %v8019_v59 = vpop.f32.mrb[84].mxu0 }
0x185b   :  { %v8023_v56 = vmul.f32 0.5, %v8019_v59  ;;  %v10864_v60 = vpop.f32.mrb[85].mxu0 }
0x185d   :  { %v8098_v51 = vmul.f32 %v8023_v56, %v8023_v56  ;;  %v8104_v35 = vrot.slane %v8023_v56, %v13529_v3 }
0x185e   :  { %v8093_v61 = vpop.f32.mrb[86].mxu0 }
0x185f   :  { %v8097_v62 = vmul.f32 0.5, %v8093_v61  ;;  %v10871_v25 = vpop.f32.mrb[87].mxu0  ;;  %v8105_v0 = vsub.f32 %v7931_v36, %v8104_v35 }
0x1861   :  { %v8099_v63 = vsub.f32 %v8097_v62, %v8098_v51  ;;  %v8112_v2 = vmul.f32 %v8737_v58, %v8105_v0 }
0x1863   :  { %v8113_v48 = vadd.f32 0.8, %v8099_v63 }
0x1865   :  { %11978 = vrsqrt.f32 %v8113_v48 }
0x186f   :  { %v11979_v1 = vpop.eup %11978 }
0x1870   :  { %v8118_v4 = vrot.slane %v11979_v1, %v13529_v3 }
0x1872   :  { %v8119_v6 = vmul.f32 %v8118_v4, %v8112_v2 }
0x1874   :  { %v8127_v7 = vadd.f32 %v8738_v55, %v8119_v6 }
0x1876   :  { %10877 = vmatmul.mubr.msk.f32.vlgmr.msra.gmra.mrb[60].mxu1 %vm4726_vm3, %v8127_v7 }
0x1949   :  { %v8206_v11 = vpop.f32.mrb[60].mxu1 }
0x194a   :  { %v8207_v12 = vadd.f32 %v8739_v9, %v8206_v11  ;;  %v10878_v13 = vpop.f32.mrb[61].mxu1 }
0x194c   :  { %v8210_v14 = vsub.f32 0.0, %v8207_v12 }
0x194e   :  { %v8211_v15 = vmul.f32 1.442695, %v8210_v14 }
0x1950   :  { %11980 = vpow2.f32 %v8211_v15 }
0x195a   :  { %v11981_v17 = vpop.eup %11980 }
0x195b   :  { %v8213_v18 = vadd.f32 1.0, %v11981_v17 }
0x195d   :  { %11982 = vrcp.f32 %v8213_v18 }
0x1967   :  { %v11983_v20 = vpop.eup %11982 }
0x1968   :  { %8217 = vst.msk [vmem:[%s12834_s29] sm:$0x3] %vm8216_vm9, %v11983_v20 }
0x1969   :  { %8222 = vsyncpa [#allocation4], 1 }
0x196a   :  { %8223 = vsyncpa [#allocation6], 1 }
0x196b   :  { %8224 = vsyncpa [#allocation9], 1 }
0x196c   :  { %8225 = vsyncpa [#allocation12], 1 }
0x196d   :  { %8226 = vsyncpa [#allocation15], 1 }
0x196e   :  { %8227 = vsyncpa [#allocation18], 1 }
0x196f   :  { %8228 = vsyncpa [#allocation21], 1 }
0x1970   :  { %8229 = vsyncpa [#allocation24], 1 }
0x1971   :  { %8230 = vsyncpa [#allocation27], 1 }
0x1972   :  { %8231 = vsyncpa [#allocation30], 1 }
0x1973   :  { %8232 = vsyncpa [#allocation33], 1 }
0x1974   :  { %8233 = vsyncpa [#allocation36], 1 }
0x1975   :  { %8234 = vsyncpa [#allocation39], 1 }

</bundles_post_ra>
